<compile_context>
chip_gen: v6e
topology: v6e:2x2x1
jax: 0.10.0
libtpu: 0.0.40
codegen_flags: <defaults>
</compile_context>

<pallas_src>
import jax
import jax.numpy as jnp
from jax import lax
from jax.experimental import pallas as pl
from jax.experimental.pallas import tpu as pltpu  # noqa: F401  (imported per convention)

# ----------------------------- small config ---------------------------------
VOCAB   = 128          # vocab_size
DIM     = 32           # hidden_size == emb_dim
DEPTH   = 2            # depth
HEADS   = 4            # heads
DH      = DIM // HEADS # head dim
HDH     = HEADS * DH   # == DIM
FF      = 4 * DIM      # feed-forward inner dim (== VOCAB here, exploited in packing)
MAX_SEQ = 16           # max_position_embeddings (== full_attn_thres -> full attn)
T       = MAX_SEQ
B       = 2
R       = B * T        # flattened rows

LN_EPS = 1e-5
TOKEN_SELF_ATTN_VALUE = -5e4
MASK_NEG = -1e9        # additive causal fill (safe: exp underflows to 0 after row-max)

# Row layout of the packed per-layer (DIM,)-vector table.
_V_LNF_W, _V_LNF_B, _V_BO, _V_LNG_W, _V_LNG_B, _V_B2 = range(6)
_V_PER_LAYER = 6
_V_LNO_W = _V_PER_LAYER * DEPTH
_V_LNO_B = _V_LNO_W + 1
_V_ROWS  = _V_LNO_B + 1


def _layernorm(x, w, b):
    mu = jnp.mean(x, axis=-1, keepdims=True)
    var = jnp.mean((x - mu) ** 2, axis=-1, keepdims=True)
    return (x - mu) * lax.rsqrt(var + LN_EPS) * w + b


def _forward_core(ids, tok, wqk, wv, wo, wff1, wff2, wlog, pos, vec, wide, recip):
    """Shared math. Arguments are Pallas Refs (kernel) or plain arrays (reference);
    both are indexed uniformly with [...] / [l].  Returns (R, VOCAB) f32 logits."""
    bf16 = jnp.bfloat16

    # ---- fused embedding gather: one-hot @ tok_emb on the MXU ------------------
    ids2d = ids[...]                                          # (R, 1) int32
    vocab_iota = lax.broadcasted_iota(jnp.int32, (R, VOCAB), 1)
    onehot = (vocab_iota == ids2d).astype(bf16)               # (R, VOCAB)
    x = jnp.dot(onehot, tok[...], preferred_element_type=jnp.float32) + pos[...]

    # ---- attention masks, hoisted, additive-multiplicative form ----------------
    r_idx = lax.broadcasted_iota(jnp.int32, (T, T), 0)
    c_idx = lax.broadcasted_iota(jnp.int32, (T, T), 1)
    keep = (c_idx < r_idx).astype(jnp.float32)                # strictly-lower kept
    fill = jnp.where(c_idx == r_idx, jnp.float32(TOKEN_SELF_ATTN_VALUE),
                     jnp.where(c_idx > r_idx, jnp.float32(MASK_NEG),
                               jnp.float32(0.0)))             # (T, T)

    x1 = x
    x2 = x
    for l in range(DEPTH):
        vb = _V_PER_LAYER * l
        wqk_l = wqk[l]        # (HEADS, DIM, DH)  bf16, DH**-0.5 pre-folded
        wv_l  = wv[l]         # (HEADS, DIM, DH)  bf16
        wo_l  = wo[l]         # (HEADS, DH, DIM)  bf16

        # ---- f: PreNorm + full shared-QK causal self-attention -----------------
        h_in = _layernorm(x2, vec[vb + _V_LNF_W], vec[vb + _V_LNF_B])
        h_bc = jnp.broadcast_to(h_in.astype(bf16)[None], (HEADS, R, DIM))
        # heads land directly on a leading batch axis: no lane slicing / concats.
        qk_h = jnp.einsum('hrd,hde->hre', h_bc, wqk_l,
                          preferred_element_type=jnp.float32)     # (H, R, DH)
        v_h = jnp.einsum('hrd,hde->hre', h_bc, wv_l,
                         preferred_element_type=jnp.float32)      # (H, R, DH)
        qk_g = qk_h.reshape(HEADS * B, T, DH)                     # pure view (row-major)
        v_g = v_h.reshape(HEADS * B, T, DH).astype(bf16)
        # keys = L2-normalized shared qk (F.normalize, eps=1e-12)
        k_g = qk_g * lax.rsqrt(
            jnp.maximum(jnp.sum(qk_g * qk_g, axis=-1, keepdims=True), 1e-24))
        dots = jnp.einsum('gtd,gsd->gts', qk_g.astype(bf16), k_g.astype(bf16),
                          preferred_element_type=jnp.float32)     # (G, T, T)
        dots = dots * keep + fill                                 # self + causal mask
        dots = dots - jnp.max(dots, axis=-1, keepdims=True)
        p = jnp.exp(dots)
        attn = p * recip(jnp.sum(p, axis=-1, keepdims=True))
        ho_g = jnp.einsum('gts,gsd->gtd', attn.astype(bf16), v_g,
                          preferred_element_type=jnp.float32)     # (G, T, DH)
        ho_h = ho_g.reshape(HEADS, R, DH).astype(bf16)
        f_prj = jnp.einsum('hrd,hdn->hrn', ho_h, wo_l,
                           preferred_element_type=jnp.float32)    # (H, R, DIM)
        f_out = jnp.sum(f_prj, axis=0) + vec[vb + _V_BO]
        y1 = x1 + f_out

        # ---- g: PreNorm + FeedForward (GELU, tanh approximation) ---------------
        g_in = _layernorm(y1, vec[vb + _V_LNG_W], vec[vb + _V_LNG_B])
        hid = jnp.dot(g_in.astype(bf16), wff1[l],
                      preferred_element_type=jnp.float32) + wide[l]
        hid = jax.nn.gelu(hid, approximate=True)
        g_out = jnp.dot(hid.astype(bf16), wff2[l],
                        preferred_element_type=jnp.float32) + vec[vb + _V_B2]
        y2 = x2 + g_out

        x1, x2 = y1, y2

    xm = 0.5 * (x1 + x2)                      # Reformer: mean of the two streams
    xn = _layernorm(xm, vec[_V_LNO_W], vec[_V_LNO_B])
    logits = jnp.dot(xn.astype(bf16), wlog[...],
                     preferred_element_type=jnp.float32) + wide[DEPTH]
    return logits


# ------------------------------ Pallas kernel --------------------------------
def reformer_kernel(ids_ref, tok_ref, pos_ref, vec_ref, wide_ref,
                    wqk_ref, wv_ref, wo_ref, wff1_ref, wff2_ref, wlog_ref,
                    out_ref):
    logits = _forward_core(ids_ref, tok_ref, wqk_ref, wv_ref, wo_ref,
                           wff1_ref, wff2_ref, wlog_ref, pos_ref, vec_ref, wide_ref,
                           lambda s: pl.reciprocal(s, approx=True))
    out_ref[...] = logits.reshape(B, T, VOCAB)


def reformer_forward(ids2d, packed):
    """ids2d: (B*T, 1) int32 -> logits (B, T, VOCAB) float32."""
    # Grid-less call: one invocation, every operand a single whole-array VMEM block
    # (total footprint ~0.2 MiB) -> no per-grid-step overhead.
    return pl.pallas_call(
        reformer_kernel,
        out_shape=jax.ShapeDtypeStruct((B, T, VOCAB), jnp.float32),
    )(ids2d, *packed)


# ------------------------- pure-JAX reference ---------------------------------
def reference_forward(ids2d, packed):
    """Same math as the kernel (exact reciprocal instead of EUP approx)."""
    tok, pos, vec, wide, wqk, wv, wo, wff1, wff2, wlog = packed
    logits = _forward_core(ids2d, tok, wqk, wv, wo, wff1, wff2, wlog, pos, vec, wide,
                           lambda s: 1.0 / s)
    return logits.reshape(B, T, VOCAB)


# --------------------------- deterministic init -------------------------------
def init_params(key):
    ks = jax.random.split(key, 8)

    def nrm(k, shape, scale=0.02):
        return (scale * jax.random.normal(k, shape)).astype(jnp.float32)

    tok_emb = nrm(ks[0], (VOCAB, DIM))
    pos_emb = nrm(ks[1], (MAX_SEQ, DIM))

    lnf_w = jnp.ones((DEPTH, DIM), jnp.float32)
    lnf_b = jnp.zeros((DEPTH, DIM), jnp.float32)
    wqk = nrm(ks[2], (DEPTH, DIM, HDH))
    wv  = nrm(ks[3], (DEPTH, DIM, HDH))
    wo  = nrm(ks[4], (DEPTH, HDH, DIM))
    bo  = jnp.zeros((DEPTH, DIM), jnp.float32)
    lng_w = jnp.ones((DEPTH, DIM), jnp.float32)
    lng_b = jnp.zeros((DEPTH, DIM), jnp.float32)
    w1 = nrm(ks[5], (DEPTH, DIM, FF))
    b1 = jnp.zeros((DEPTH, FF), jnp.float32)
    w2 = nrm(ks[6], (DEPTH, FF, DIM))
    b2 = jnp.zeros((DEPTH, DIM), jnp.float32)
    lno_w = jnp.ones((1, DIM), jnp.float32)
    lno_b = jnp.zeros((1, DIM), jnp.float32)
    wl = nrm(ks[7], (DIM, VOCAB))
    bl = jnp.zeros((1, VOCAB), jnp.float32)

    params = (lnf_w, lnf_b, wqk, wv, wo, bo,
              lng_w, lng_b, w1, b1, w2, b2,
              lno_w, lno_b, wl, bl)
    return tok_emb, pos_emb, params


def pack_params(tok_emb, pos_emb, params):
    """Host-side packing: per-head bf16 MXU weights (scale folded), f32 bias/LN
    tables, bf16 token-embedding table and pre-tiled f32 positional rows."""
    (lnf_w, lnf_b, wqk, wv, wo, bo,
     lng_w, lng_b, w1, b1, w2, b2,
     lno_w, lno_b, wl, bl) = params
    bf16 = jnp.bfloat16

    vec_rows = []
    for l in range(DEPTH):
        vec_rows += [lnf_w[l], lnf_b[l], bo[l], lng_w[l], lng_b[l], b2[l]]
    vec_rows += [lno_w[0], lno_b[0]]
    vec = jnp.stack(vec_rows, axis=0).astype(jnp.float32)        # (_V_ROWS, DIM)
    assert vec.shape == (_V_ROWS, DIM)

    assert FF == VOCAB  # lets per-layer FF bias and logits bias share one 128-wide table
    wide = jnp.concatenate([b1, bl], axis=0).astype(jnp.float32)  # (DEPTH+1, 128)

    # Fold the attention scale into wqk: keys are L2-normalized, so scaling qk only
    # scales the queries -> exactly equivalent to multiplying dots by DH**-0.5.
    scale = DH ** -0.5
    wqk_h = (wqk * scale).reshape(DEPTH, DIM, HEADS, DH).transpose(0, 2, 1, 3).astype(bf16)
    wv_h = wv.reshape(DEPTH, DIM, HEADS, DH).transpose(0, 2, 1, 3).astype(bf16)
    wo_h = wo.reshape(DEPTH, HEADS, DH, DIM).astype(bf16)

    tok_b = tok_emb.astype(bf16)                                  # (VOCAB, DIM)
    pos_t = jnp.tile(pos_emb[:T], (B, 1)).astype(jnp.float32)     # (B*T, DIM)

    return (tok_b, pos_t, vec, wide, wqk_h, wv_h, wo_h,
            w1.astype(bf16), w2.astype(bf16), wl.astype(bf16))


if __name__ == "__main__":
    key = jax.random.PRNGKey(0)
    tok_emb, pos_emb, params = init_params(key)
    packed = pack_params(tok_emb, pos_emb, params)

    input_ids = jax.random.randint(jax.random.PRNGKey(1), (B, T), 0, VOCAB,
                                   dtype=jnp.int32)
    ids2d = input_ids.reshape(R, 1)           # batch-major rows, matches pos tiling

    logits = reformer_forward(ids2d, packed)
    logits = jax.block_until_ready(logits)

    # Pure-JAX reference of the same math for a sanity check.
    ref = reference_forward(ids2d, packed)
    assert logits.shape == (B, T, VOCAB)
    assert jnp.allclose(logits, ref, atol=5e-3, rtol=5e-3), "mismatch vs reference"

    print("KERNEL_OK")
</pallas_src>

<mosaic_0001>
module attributes {stable_mosaic.version = 11 : i64} {
  func.func @reformer_kernel(%arg0: memref<32x1xi32, #tpu.memory_space<vmem>>, %arg1: memref<128x32xbf16, #tpu.memory_space<vmem>>, %arg2: memref<32x32xf32, #tpu.memory_space<vmem>>, %arg3: memref<14x32xf32, #tpu.memory_space<vmem>>, %arg4: memref<3x128xf32, #tpu.memory_space<vmem>>, %arg5: memref<2x4x32x8xbf16, #tpu.memory_space<vmem>>, %arg6: memref<2x4x32x8xbf16, #tpu.memory_space<vmem>>, %arg7: memref<2x4x8x32xbf16, #tpu.memory_space<vmem>>, %arg8: memref<2x32x128xbf16, #tpu.memory_space<vmem>>, %arg9: memref<2x128x32xbf16, #tpu.memory_space<vmem>>, %arg10: memref<32x128xbf16, #tpu.memory_space<vmem>>, %arg11: memref<2x16x128xf32, #tpu.memory_space<vmem>>) attributes {dimension_semantics = [], scalar_prefetch = 0 : i64, scratch_operands = 0 : i64, tpu.core_type = #tpu.core_type<tc>} {
    %c0 = arith.constant 0 : index
    %c0_0 = arith.constant 0 : index
    %0 = vector.load %arg0[%c0, %c0_0] : memref<32x1xi32, #tpu.memory_space<vmem>>, vector<32x1xi32>
    %1 = tpu.iota {dimensions = array<i32: 1>} : vector<32x128xi32>
    %2 = vector.broadcast %0 : vector<32x1xi32> to vector<32x128xi32>
    %3 = arith.cmpi eq, %1, %2 : vector<32x128xi32>
    %4 = arith.extui %3 : vector<32x128xi1> to vector<32x128xi32>
    %5 = arith.sitofp %4 : vector<32x128xi32> to vector<32x128xf32>
    %6 = arith.truncf %5 : vector<32x128xf32> to vector<32x128xbf16>
    %c0_1 = arith.constant 0 : index
    %c0_2 = arith.constant 0 : index
    %7 = vector.load %arg1[%c0_1, %c0_2] : memref<128x32xbf16, #tpu.memory_space<vmem>>, vector<128x32xbf16>
    %cst = arith.constant dense<0.000000e+00> : vector<32x32xf32>
    %8 = tpu.matmul %6, %7, %cst {dimension_numbers = #tpu.dot_dimension_numbers<[1], [0], [0], [1], [0, 0, 1, 1], [], []>} : vector<32x128xbf16>, vector<128x32xbf16>, vector<32x32xf32> -> vector<32x32xf32>
    %c0_3 = arith.constant 0 : index
    %c0_4 = arith.constant 0 : index
    %9 = vector.load %arg2[%c0_3, %c0_4] : memref<32x32xf32, #tpu.memory_space<vmem>>, vector<32x32xf32>
    %10 = arith.addf %8, %9 : vector<32x32xf32>
    %11 = tpu.iota {dimensions = array<i32: 0>} : vector<16x16xi32>
    %12 = tpu.iota {dimensions = array<i32: 1>} : vector<16x16xi32>
    %13 = arith.cmpi slt, %12, %11 : vector<16x16xi32>
    %14 = arith.extui %13 : vector<16x16xi1> to vector<16x16xi32>
    %15 = arith.sitofp %14 : vector<16x16xi32> to vector<16x16xf32>
    %16 = arith.cmpi eq, %12, %11 : vector<16x16xi32>
    %17 = arith.cmpi sgt, %12, %11 : vector<16x16xi32>
    %cst_5 = arith.constant -1.000000e+09 : f32
    %cst_6 = arith.constant 0.000000e+00 : f32
    %18 = vector.broadcast %cst_5 : f32 to vector<16x16xf32>
    %19 = vector.broadcast %cst_6 : f32 to vector<16x16xf32>
    %20 = arith.select %17, %18, %19 : vector<16x16xi1>, vector<16x16xf32>
    %cst_7 = arith.constant -5.000000e+04 : f32
    %21 = vector.broadcast %cst_7 : f32 to vector<16x16xf32>
    %22 = arith.select %16, %21, %20 : vector<16x16xi1>, vector<16x16xf32>
    %c0_8 = arith.constant 0 : index
    %c0_9 = arith.constant 0 : index
    %c0_10 = arith.constant 0 : index
    %c0_11 = arith.constant 0 : index
    %23 = vector.load %arg5[%c0_8, %c0_9, %c0_10, %c0_11] : memref<2x4x32x8xbf16, #tpu.memory_space<vmem>>, vector<1x4x32x8xbf16>
    %24 = vector.shape_cast %23 : vector<1x4x32x8xbf16> to vector<4x32x8xbf16>
    %c0_12 = arith.constant 0 : index
    %c0_13 = arith.constant 0 : index
    %c0_14 = arith.constant 0 : index
    %c0_15 = arith.constant 0 : index
    %25 = vector.load %arg6[%c0_12, %c0_13, %c0_14, %c0_15] : memref<2x4x32x8xbf16, #tpu.memory_space<vmem>>, vector<1x4x32x8xbf16>
    %26 = vector.shape_cast %25 : vector<1x4x32x8xbf16> to vector<4x32x8xbf16>
    %c0_16 = arith.constant 0 : index
    %c0_17 = arith.constant 0 : index
    %c0_18 = arith.constant 0 : index
    %c0_19 = arith.constant 0 : index
    %27 = vector.load %arg7[%c0_16, %c0_17, %c0_18, %c0_19] : memref<2x4x8x32xbf16, #tpu.memory_space<vmem>>, vector<1x4x8x32xbf16>
    %28 = vector.shape_cast %27 : vector<1x4x8x32xbf16> to vector<4x8x32xbf16>
    %c0_20 = arith.constant 0 : index
    %c0_21 = arith.constant 0 : index
    %29 = vector.load %arg3[%c0_20, %c0_21] : memref<14x32xf32, #tpu.memory_space<vmem>>, vector<1x32xf32>
    %30 = vector.shape_cast %29 : vector<1x32xf32> to vector<32xf32>
    %c1 = arith.constant 1 : index
    %c0_22 = arith.constant 0 : index
    %31 = vector.load %arg3[%c1, %c0_22] : memref<14x32xf32, #tpu.memory_space<vmem>>, vector<1x32xf32>
    %32 = vector.shape_cast %31 : vector<1x32xf32> to vector<32xf32>
    %cst_23 = arith.constant dense<0.000000e+00> : vector<32xf32>
    %33 = vector.multi_reduction <add>, %10, %cst_23 [1] : vector<32x32xf32> to vector<32xf32>
    %34 = vector.shape_cast %33 : vector<32xf32> to vector<32x1xf32>
    %cst_24 = arith.constant 3.200000e+01 : f32
    %35 = vector.broadcast %cst_24 : f32 to vector<32x1xf32>
    %36 = arith.divf %34, %35 : vector<32x1xf32>
    %37 = vector.broadcast %36 : vector<32x1xf32> to vector<32x32xf32>
    %38 = arith.subf %10, %37 : vector<32x32xf32>
    %39 = arith.mulf %38, %38 : vector<32x32xf32>
    %cst_25 = arith.constant dense<0.000000e+00> : vector<32xf32>
    %40 = vector.multi_reduction <add>, %39, %cst_25 [1] : vector<32x32xf32> to vector<32xf32>
    %41 = vector.shape_cast %40 : vector<32xf32> to vector<32x1xf32>
    %cst_26 = arith.constant 3.200000e+01 : f32
    %42 = vector.broadcast %cst_26 : f32 to vector<32x1xf32>
    %43 = arith.divf %41, %42 : vector<32x1xf32>
    %44 = vector.broadcast %36 : vector<32x1xf32> to vector<32x32xf32>
    %45 = arith.subf %10, %44 : vector<32x32xf32>
    %cst_27 = arith.constant 9.99999974E-6 : f32
    %46 = vector.broadcast %cst_27 : f32 to vector<32x1xf32>
    %47 = arith.addf %43, %46 : vector<32x1xf32>
    %48 = math.rsqrt %47 : vector<32x1xf32>
    %49 = vector.broadcast %48 : vector<32x1xf32> to vector<32x32xf32>
    %50 = arith.mulf %45, %49 : vector<32x32xf32>
    %51 = vector.shape_cast %30 : vector<32xf32> to vector<1x32xf32>
    %52 = vector.broadcast %51 : vector<1x32xf32> to vector<32x32xf32>
    %53 = arith.mulf %50, %52 : vector<32x32xf32>
    %54 = vector.shape_cast %32 : vector<32xf32> to vector<1x32xf32>
    %55 = vector.broadcast %54 : vector<1x32xf32> to vector<32x32xf32>
    %56 = arith.addf %53, %55 : vector<32x32xf32>
    %57 = arith.truncf %56 : vector<32x32xf32> to vector<32x32xbf16>
    %58 = vector.shape_cast %57 : vector<32x32xbf16> to vector<1x32x32xbf16>
    %59 = vector.shape_cast %58 : vector<1x32x32xbf16> to vector<1x32x32xbf16>
    %60 = vector.broadcast %59 : vector<1x32x32xbf16> to vector<4x32x32xbf16>
    "tpu.trace_start"() <{level = 10 : i32, message = "hrd,hde->hre"}> : () -> ()
    %cst_28 = arith.constant dense<0.000000e+00> : vector<4x32x8xf32>
    %61 = tpu.matmul %60, %24, %cst_28 {dimension_numbers = #tpu.dot_dimension_numbers<[2], [1], [1], [2], [0, 0, 0, 1, 1, 2], [0], [0]>} : vector<4x32x32xbf16>, vector<4x32x8xbf16>, vector<4x32x8xf32> -> vector<4x32x8xf32>
    %cst_29 = arith.constant dense<0.000000e+00> : vector<4x32x8xf32>
    %62 = tpu.matmul %60, %26, %cst_29 {dimension_numbers = #tpu.dot_dimension_numbers<[2], [1], [1], [2], [0, 0, 0, 1, 1, 2], [0], [0]>} : vector<4x32x32xbf16>, vector<4x32x8xbf16>, vector<4x32x8xf32> -> vector<4x32x8xf32>
    "tpu.trace_stop"() : () -> ()
    %63 = vector.shape_cast %61 : vector<4x32x8xf32> to vector<8x16x8xf32>
    %64 = vector.shape_cast %62 : vector<4x32x8xf32> to vector<8x16x8xf32>
    %65 = arith.truncf %64 : vector<8x16x8xf32> to vector<8x16x8xbf16>
    %66 = arith.mulf %63, %63 : vector<8x16x8xf32>
    %cst_30 = arith.constant dense<0.000000e+00> : vector<8x16xf32>
    %67 = vector.multi_reduction <add>, %66, %cst_30 [2] : vector<8x16x8xf32> to vector<8x16xf32>
    %68 = vector.shape_cast %67 : vector<8x16xf32> to vector<8x16x1xf32>
    %cst_31 = arith.constant 1.000000e-24 : f32
    %69 = vector.broadcast %cst_31 : f32 to vector<8x16x1xf32>
    %70 = arith.maximumf %68, %69 : vector<8x16x1xf32>
    %71 = math.rsqrt %70 : vector<8x16x1xf32>
    %72 = vector.broadcast %71 : vector<8x16x1xf32> to vector<8x16x8xf32>
    %73 = arith.mulf %63, %72 : vector<8x16x8xf32>
    %74 = arith.truncf %63 : vector<8x16x8xf32> to vector<8x16x8xbf16>
    %75 = arith.truncf %73 : vector<8x16x8xf32> to vector<8x16x8xbf16>
    "tpu.trace_start"() <{level = 10 : i32, message = "gtd,gsd->gts"}> : () -> ()
    %cst_32 = arith.constant dense<0.000000e+00> : vector<8x16x16xf32>
    %76 = tpu.matmul %74, %75, %cst_32 {dimension_numbers = #tpu.dot_dimension_numbers<[2], [2], [1], [1], [0, 0, 0, 1, 1, 1], [0], [0]>} : vector<8x16x8xbf16>, vector<8x16x8xbf16>, vector<8x16x16xf32> -> vector<8x16x16xf32>
    "tpu.trace_stop"() : () -> ()
    %77 = vector.shape_cast %15 : vector<16x16xf32> to vector<1x16x16xf32>
    %78 = vector.broadcast %77 : vector<1x16x16xf32> to vector<8x16x16xf32>
    %79 = arith.mulf %76, %78 : vector<8x16x16xf32>
    %80 = vector.shape_cast %22 : vector<16x16xf32> to vector<1x16x16xf32>
    %81 = vector.broadcast %80 : vector<1x16x16xf32> to vector<8x16x16xf32>
    %82 = arith.addf %79, %81 : vector<8x16x16xf32>
    %cst_33 = arith.constant dense<0xFF800000> : vector<8x16xf32>
    %83 = vector.multi_reduction <maximumf>, %82, %cst_33 [2] : vector<8x16x16xf32> to vector<8x16xf32>
    %84 = vector.shape_cast %83 : vector<8x16xf32> to vector<8x16x1xf32>
    %85 = vector.broadcast %84 : vector<8x16x1xf32> to vector<8x16x16xf32>
    %86 = arith.subf %82, %85 : vector<8x16x16xf32>
    %87 = math.exp %86 : vector<8x16x16xf32>
    %cst_34 = arith.constant dense<0.000000e+00> : vector<8x16xf32>
    %88 = vector.multi_reduction <add>, %87, %cst_34 [2] : vector<8x16x16xf32> to vector<8x16xf32>
    %89 = vector.shape_cast %88 : vector<8x16xf32> to vector<8x16x1xf32>
    %90 = tpu.reciprocal %89 {approx = true} : vector<8x16x1xf32> -> vector<8x16x1xf32>
    %91 = vector.broadcast %90 : vector<8x16x1xf32> to vector<8x16x16xf32>
    %92 = arith.mulf %87, %91 : vector<8x16x16xf32>
    %93 = arith.truncf %92 : vector<8x16x16xf32> to vector<8x16x16xbf16>
    "tpu.trace_start"() <{level = 10 : i32, message = "gts,gsd->gtd"}> : () -> ()
    %cst_35 = arith.constant dense<0.000000e+00> : vector<8x16x8xf32>
    %94 = tpu.matmul %93, %65, %cst_35 {dimension_numbers = #tpu.dot_dimension_numbers<[2], [1], [1], [2], [0, 0, 0, 1, 1, 2], [0], [0]>} : vector<8x16x16xbf16>, vector<8x16x8xbf16>, vector<8x16x8xf32> -> vector<8x16x8xf32>
    "tpu.trace_stop"() : () -> ()
    %95 = vector.shape_cast %94 : vector<8x16x8xf32> to vector<4x32x8xf32>
    %96 = arith.truncf %95 : vector<4x32x8xf32> to vector<4x32x8xbf16>
    "tpu.trace_start"() <{level = 10 : i32, message = "hrd,hdn->hrn"}> : () -> ()
    %cst_36 = arith.constant dense<0.000000e+00> : vector<4x32x32xf32>
    %97 = tpu.matmul %96, %28, %cst_36 {dimension_numbers = #tpu.dot_dimension_numbers<[2], [1], [1], [2], [0, 0, 0, 1, 1, 2], [0], [0]>} : vector<4x32x8xbf16>, vector<4x8x32xbf16>, vector<4x32x32xf32> -> vector<4x32x32xf32>
    "tpu.trace_stop"() : () -> ()
    %cst_37 = arith.constant dense<0.000000e+00> : vector<32x32xf32>
    %98 = vector.multi_reduction <add>, %97, %cst_37 [0] : vector<4x32x32xf32> to vector<32x32xf32>
    %c2 = arith.constant 2 : index
    %c0_38 = arith.constant 0 : index
    %99 = vector.load %arg3[%c2, %c0_38] : memref<14x32xf32, #tpu.memory_space<vmem>>, vector<1x32xf32>
    %100 = vector.shape_cast %99 : vector<1x32xf32> to vector<32xf32>
    %101 = vector.shape_cast %100 : vector<32xf32> to vector<1x32xf32>
    %102 = vector.broadcast %101 : vector<1x32xf32> to vector<32x32xf32>
    %103 = arith.addf %98, %102 : vector<32x32xf32>
    %104 = arith.addf %10, %103 : vector<32x32xf32>
    %c3 = arith.constant 3 : index
    %c0_39 = arith.constant 0 : index
    %105 = vector.load %arg3[%c3, %c0_39] : memref<14x32xf32, #tpu.memory_space<vmem>>, vector<1x32xf32>
    %106 = vector.shape_cast %105 : vector<1x32xf32> to vector<32xf32>
    %c4 = arith.constant 4 : index
    %c0_40 = arith.constant 0 : index
    %107 = vector.load %arg3[%c4, %c0_40] : memref<14x32xf32, #tpu.memory_space<vmem>>, vector<1x32xf32>
    %108 = vector.shape_cast %107 : vector<1x32xf32> to vector<32xf32>
    %cst_41 = arith.constant dense<0.000000e+00> : vector<32xf32>
    %109 = vector.multi_reduction <add>, %104, %cst_41 [1] : vector<32x32xf32> to vector<32xf32>
    %110 = vector.shape_cast %109 : vector<32xf32> to vector<32x1xf32>
    %cst_42 = arith.constant 3.200000e+01 : f32
    %111 = vector.broadcast %cst_42 : f32 to vector<32x1xf32>
    %112 = arith.divf %110, %111 : vector<32x1xf32>
    %113 = vector.broadcast %112 : vector<32x1xf32> to vector<32x32xf32>
    %114 = arith.subf %104, %113 : vector<32x32xf32>
    %115 = arith.mulf %114, %114 : vector<32x32xf32>
    %cst_43 = arith.constant dense<0.000000e+00> : vector<32xf32>
    %116 = vector.multi_reduction <add>, %115, %cst_43 [1] : vector<32x32xf32> to vector<32xf32>
    %117 = vector.shape_cast %116 : vector<32xf32> to vector<32x1xf32>
    %cst_44 = arith.constant 3.200000e+01 : f32
    %118 = vector.broadcast %cst_44 : f32 to vector<32x1xf32>
    %119 = arith.divf %117, %118 : vector<32x1xf32>
    %120 = vector.broadcast %112 : vector<32x1xf32> to vector<32x32xf32>
    %121 = arith.subf %104, %120 : vector<32x32xf32>
    %cst_45 = arith.constant 9.99999974E-6 : f32
    %122 = vector.broadcast %cst_45 : f32 to vector<32x1xf32>
    %123 = arith.addf %119, %122 : vector<32x1xf32>
    %124 = math.rsqrt %123 : vector<32x1xf32>
    %125 = vector.broadcast %124 : vector<32x1xf32> to vector<32x32xf32>
    %126 = arith.mulf %121, %125 : vector<32x32xf32>
    %127 = vector.shape_cast %106 : vector<32xf32> to vector<1x32xf32>
    %128 = vector.broadcast %127 : vector<1x32xf32> to vector<32x32xf32>
    %129 = arith.mulf %126, %128 : vector<32x32xf32>
    %130 = vector.shape_cast %108 : vector<32xf32> to vector<1x32xf32>
    %131 = vector.broadcast %130 : vector<1x32xf32> to vector<32x32xf32>
    %132 = arith.addf %129, %131 : vector<32x32xf32>
    %133 = arith.truncf %132 : vector<32x32xf32> to vector<32x32xbf16>
    %c0_46 = arith.constant 0 : index
    %c0_47 = arith.constant 0 : index
    %c0_48 = arith.constant 0 : index
    %134 = vector.load %arg8[%c0_46, %c0_47, %c0_48] : memref<2x32x128xbf16, #tpu.memory_space<vmem>>, vector<1x32x128xbf16>
    %135 = vector.shape_cast %134 : vector<1x32x128xbf16> to vector<32x128xbf16>
    %cst_49 = arith.constant dense<0.000000e+00> : vector<32x128xf32>
    %136 = tpu.matmul %133, %135, %cst_49 {dimension_numbers = #tpu.dot_dimension_numbers<[1], [0], [0], [1], [0, 0, 1, 1], [], []>} : vector<32x32xbf16>, vector<32x128xbf16>, vector<32x128xf32> -> vector<32x128xf32>
    %c0_50 = arith.constant 0 : index
    %c0_51 = arith.constant 0 : index
    %137 = vector.load %arg4[%c0_50, %c0_51] : memref<3x128xf32, #tpu.memory_space<vmem>>, vector<1x128xf32>
    %138 = vector.shape_cast %137 : vector<1x128xf32> to vector<128xf32>
    %139 = vector.shape_cast %138 : vector<128xf32> to vector<1x128xf32>
    %140 = vector.broadcast %139 : vector<1x128xf32> to vector<32x128xf32>
    %141 = arith.addf %136, %140 : vector<32x128xf32>
    %142 = arith.mulf %141, %141 : vector<32x128xf32>
    %143 = arith.mulf %141, %142 : vector<32x128xf32>
    %cst_52 = arith.constant 4.471500e-02 : f32
    %144 = vector.broadcast %cst_52 : f32 to vector<32x128xf32>
    %145 = arith.mulf %144, %143 : vector<32x128xf32>
    %146 = arith.addf %141, %145 : vector<32x128xf32>
    %cst_53 = arith.constant 0.797884583 : f32
    %147 = vector.broadcast %cst_53 : f32 to vector<32x128xf32>
    %148 = arith.mulf %147, %146 : vector<32x128xf32>
    %149 = math.tanh %148 : vector<32x128xf32>
    %cst_54 = arith.constant 1.000000e+00 : f32
    %150 = vector.broadcast %cst_54 : f32 to vector<32x128xf32>
    %151 = arith.addf %150, %149 : vector<32x128xf32>
    %cst_55 = arith.constant 5.000000e-01 : f32
    %152 = vector.broadcast %cst_55 : f32 to vector<32x128xf32>
    %153 = arith.mulf %152, %151 : vector<32x128xf32>
    %154 = arith.mulf %141, %153 : vector<32x128xf32>
    %155 = arith.truncf %154 : vector<32x128xf32> to vector<32x128xbf16>
    %c0_56 = arith.constant 0 : index
    %c0_57 = arith.constant 0 : index
    %c0_58 = arith.constant 0 : index
    %156 = vector.load %arg9[%c0_56, %c0_57, %c0_58] : memref<2x128x32xbf16, #tpu.memory_space<vmem>>, vector<1x128x32xbf16>
    %157 = vector.shape_cast %156 : vector<1x128x32xbf16> to vector<128x32xbf16>
    %cst_59 = arith.constant dense<0.000000e+00> : vector<32x32xf32>
    %158 = tpu.matmul %155, %157, %cst_59 {dimension_numbers = #tpu.dot_dimension_numbers<[1], [0], [0], [1], [0, 0, 1, 1], [], []>} : vector<32x128xbf16>, vector<128x32xbf16>, vector<32x32xf32> -> vector<32x32xf32>
    %c5 = arith.constant 5 : index
    %c0_60 = arith.constant 0 : index
    %159 = vector.load %arg3[%c5, %c0_60] : memref<14x32xf32, #tpu.memory_space<vmem>>, vector<1x32xf32>
    %160 = vector.shape_cast %159 : vector<1x32xf32> to vector<32xf32>
    %161 = vector.shape_cast %160 : vector<32xf32> to vector<1x32xf32>
    %162 = vector.broadcast %161 : vector<1x32xf32> to vector<32x32xf32>
    %163 = arith.addf %158, %162 : vector<32x32xf32>
    %164 = arith.addf %10, %163 : vector<32x32xf32>
    %c1_61 = arith.constant 1 : index
    %c0_62 = arith.constant 0 : index
    %c0_63 = arith.constant 0 : index
    %c0_64 = arith.constant 0 : index
    %165 = vector.load %arg5[%c1_61, %c0_62, %c0_63, %c0_64] : memref<2x4x32x8xbf16, #tpu.memory_space<vmem>>, vector<1x4x32x8xbf16>
    %166 = vector.shape_cast %165 : vector<1x4x32x8xbf16> to vector<4x32x8xbf16>
    %c1_65 = arith.constant 1 : index
    %c0_66 = arith.constant 0 : index
    %c0_67 = arith.constant 0 : index
    %c0_68 = arith.constant 0 : index
    %167 = vector.load %arg6[%c1_65, %c0_66, %c0_67, %c0_68] : memref<2x4x32x8xbf16, #tpu.memory_space<vmem>>, vector<1x4x32x8xbf16>
    %168 = vector.shape_cast %167 : vector<1x4x32x8xbf16> to vector<4x32x8xbf16>
    %c1_69 = arith.constant 1 : index
    %c0_70 = arith.constant 0 : index
    %c0_71 = arith.constant 0 : index
    %c0_72 = arith.constant 0 : index
    %169 = vector.load %arg7[%c1_69, %c0_70, %c0_71, %c0_72] : memref<2x4x8x32xbf16, #tpu.memory_space<vmem>>, vector<1x4x8x32xbf16>
    %170 = vector.shape_cast %169 : vector<1x4x8x32xbf16> to vector<4x8x32xbf16>
    %c6 = arith.constant 6 : index
    %c0_73 = arith.constant 0 : index
    %171 = vector.load %arg3[%c6, %c0_73] : memref<14x32xf32, #tpu.memory_space<vmem>>, vector<1x32xf32>
    %172 = vector.shape_cast %171 : vector<1x32xf32> to vector<32xf32>
    %c7 = arith.constant 7 : index
    %c0_74 = arith.constant 0 : index
    %173 = vector.load %arg3[%c7, %c0_74] : memref<14x32xf32, #tpu.memory_space<vmem>>, vector<1x32xf32>
    %174 = vector.shape_cast %173 : vector<1x32xf32> to vector<32xf32>
    %cst_75 = arith.constant dense<0.000000e+00> : vector<32xf32>
    %175 = vector.multi_reduction <add>, %164, %cst_75 [1] : vector<32x32xf32> to vector<32xf32>
    %176 = vector.shape_cast %175 : vector<32xf32> to vector<32x1xf32>
    %cst_76 = arith.constant 3.200000e+01 : f32
    %177 = vector.broadcast %cst_76 : f32 to vector<32x1xf32>
    %178 = arith.divf %176, %177 : vector<32x1xf32>
    %179 = vector.broadcast %178 : vector<32x1xf32> to vector<32x32xf32>
    %180 = arith.subf %164, %179 : vector<32x32xf32>
    %181 = arith.mulf %180, %180 : vector<32x32xf32>
    %cst_77 = arith.constant dense<0.000000e+00> : vector<32xf32>
    %182 = vector.multi_reduction <add>, %181, %cst_77 [1] : vector<32x32xf32> to vector<32xf32>
    %183 = vector.shape_cast %182 : vector<32xf32> to vector<32x1xf32>
    %cst_78 = arith.constant 3.200000e+01 : f32
    %184 = vector.broadcast %cst_78 : f32 to vector<32x1xf32>
    %185 = arith.divf %183, %184 : vector<32x1xf32>
    %186 = vector.broadcast %178 : vector<32x1xf32> to vector<32x32xf32>
    %187 = arith.subf %164, %186 : vector<32x32xf32>
    %cst_79 = arith.constant 9.99999974E-6 : f32
    %188 = vector.broadcast %cst_79 : f32 to vector<32x1xf32>
    %189 = arith.addf %185, %188 : vector<32x1xf32>
    %190 = math.rsqrt %189 : vector<32x1xf32>
    %191 = vector.broadcast %190 : vector<32x1xf32> to vector<32x32xf32>
    %192 = arith.mulf %187, %191 : vector<32x32xf32>
    %193 = vector.shape_cast %172 : vector<32xf32> to vector<1x32xf32>
    %194 = vector.broadcast %193 : vector<1x32xf32> to vector<32x32xf32>
    %195 = arith.mulf %192, %194 : vector<32x32xf32>
    %196 = vector.shape_cast %174 : vector<32xf32> to vector<1x32xf32>
    %197 = vector.broadcast %196 : vector<1x32xf32> to vector<32x32xf32>
    %198 = arith.addf %195, %197 : vector<32x32xf32>
    %199 = arith.truncf %198 : vector<32x32xf32> to vector<32x32xbf16>
    %200 = vector.shape_cast %199 : vector<32x32xbf16> to vector<1x32x32xbf16>
    %201 = vector.shape_cast %200 : vector<1x32x32xbf16> to vector<1x32x32xbf16>
    %202 = vector.broadcast %201 : vector<1x32x32xbf16> to vector<4x32x32xbf16>
    "tpu.trace_start"() <{level = 10 : i32, message = "hrd,hde->hre"}> : () -> ()
    %cst_80 = arith.constant dense<0.000000e+00> : vector<4x32x8xf32>
    %203 = tpu.matmul %202, %166, %cst_80 {dimension_numbers = #tpu.dot_dimension_numbers<[2], [1], [1], [2], [0, 0, 0, 1, 1, 2], [0], [0]>} : vector<4x32x32xbf16>, vector<4x32x8xbf16>, vector<4x32x8xf32> -> vector<4x32x8xf32>
    %cst_81 = arith.constant dense<0.000000e+00> : vector<4x32x8xf32>
    %204 = tpu.matmul %202, %168, %cst_81 {dimension_numbers = #tpu.dot_dimension_numbers<[2], [1], [1], [2], [0, 0, 0, 1, 1, 2], [0], [0]>} : vector<4x32x32xbf16>, vector<4x32x8xbf16>, vector<4x32x8xf32> -> vector<4x32x8xf32>
    "tpu.trace_stop"() : () -> ()
    %205 = vector.shape_cast %203 : vector<4x32x8xf32> to vector<8x16x8xf32>
    %206 = vector.shape_cast %204 : vector<4x32x8xf32> to vector<8x16x8xf32>
    %207 = arith.truncf %206 : vector<8x16x8xf32> to vector<8x16x8xbf16>
    %208 = arith.mulf %205, %205 : vector<8x16x8xf32>
    %cst_82 = arith.constant dense<0.000000e+00> : vector<8x16xf32>
    %209 = vector.multi_reduction <add>, %208, %cst_82 [2] : vector<8x16x8xf32> to vector<8x16xf32>
    %210 = vector.shape_cast %209 : vector<8x16xf32> to vector<8x16x1xf32>
    %cst_83 = arith.constant 1.000000e-24 : f32
    %211 = vector.broadcast %cst_83 : f32 to vector<8x16x1xf32>
    %212 = arith.maximumf %210, %211 : vector<8x16x1xf32>
    %213 = math.rsqrt %212 : vector<8x16x1xf32>
    %214 = vector.broadcast %213 : vector<8x16x1xf32> to vector<8x16x8xf32>
    %215 = arith.mulf %205, %214 : vector<8x16x8xf32>
    %216 = arith.truncf %205 : vector<8x16x8xf32> to vector<8x16x8xbf16>
    %217 = arith.truncf %215 : vector<8x16x8xf32> to vector<8x16x8xbf16>
    "tpu.trace_start"() <{level = 10 : i32, message = "gtd,gsd->gts"}> : () -> ()
    %cst_84 = arith.constant dense<0.000000e+00> : vector<8x16x16xf32>
    %218 = tpu.matmul %216, %217, %cst_84 {dimension_numbers = #tpu.dot_dimension_numbers<[2], [2], [1], [1], [0, 0, 0, 1, 1, 1], [0], [0]>} : vector<8x16x8xbf16>, vector<8x16x8xbf16>, vector<8x16x16xf32> -> vector<8x16x16xf32>
    "tpu.trace_stop"() : () -> ()
    %219 = vector.shape_cast %15 : vector<16x16xf32> to vector<1x16x16xf32>
    %220 = vector.broadcast %219 : vector<1x16x16xf32> to vector<8x16x16xf32>
    %221 = arith.mulf %218, %220 : vector<8x16x16xf32>
    %222 = vector.shape_cast %22 : vector<16x16xf32> to vector<1x16x16xf32>
    %223 = vector.broadcast %222 : vector<1x16x16xf32> to vector<8x16x16xf32>
    %224 = arith.addf %221, %223 : vector<8x16x16xf32>
    %cst_85 = arith.constant dense<0xFF800000> : vector<8x16xf32>
    %225 = vector.multi_reduction <maximumf>, %224, %cst_85 [2] : vector<8x16x16xf32> to vector<8x16xf32>
    %226 = vector.shape_cast %225 : vector<8x16xf32> to vector<8x16x1xf32>
    %227 = vector.broadcast %226 : vector<8x16x1xf32> to vector<8x16x16xf32>
    %228 = arith.subf %224, %227 : vector<8x16x16xf32>
    %229 = math.exp %228 : vector<8x16x16xf32>
    %cst_86 = arith.constant dense<0.000000e+00> : vector<8x16xf32>
    %230 = vector.multi_reduction <add>, %229, %cst_86 [2] : vector<8x16x16xf32> to vector<8x16xf32>
    %231 = vector.shape_cast %230 : vector<8x16xf32> to vector<8x16x1xf32>
    %232 = tpu.reciprocal %231 {approx = true} : vector<8x16x1xf32> -> vector<8x16x1xf32>
    %233 = vector.broadcast %232 : vector<8x16x1xf32> to vector<8x16x16xf32>
    %234 = arith.mulf %229, %233 : vector<8x16x16xf32>
    %235 = arith.truncf %234 : vector<8x16x16xf32> to vector<8x16x16xbf16>
    "tpu.trace_start"() <{level = 10 : i32, message = "gts,gsd->gtd"}> : () -> ()
    %cst_87 = arith.constant dense<0.000000e+00> : vector<8x16x8xf32>
    %236 = tpu.matmul %235, %207, %cst_87 {dimension_numbers = #tpu.dot_dimension_numbers<[2], [1], [1], [2], [0, 0, 0, 1, 1, 2], [0], [0]>} : vector<8x16x16xbf16>, vector<8x16x8xbf16>, vector<8x16x8xf32> -> vector<8x16x8xf32>
    "tpu.trace_stop"() : () -> ()
    %237 = vector.shape_cast %236 : vector<8x16x8xf32> to vector<4x32x8xf32>
    %238 = arith.truncf %237 : vector<4x32x8xf32> to vector<4x32x8xbf16>
    "tpu.trace_start"() <{level = 10 : i32, message = "hrd,hdn->hrn"}> : () -> ()
    %cst_88 = arith.constant dense<0.000000e+00> : vector<4x32x32xf32>
    %239 = tpu.matmul %238, %170, %cst_88 {dimension_numbers = #tpu.dot_dimension_numbers<[2], [1], [1], [2], [0, 0, 0, 1, 1, 2], [0], [0]>} : vector<4x32x8xbf16>, vector<4x8x32xbf16>, vector<4x32x32xf32> -> vector<4x32x32xf32>
    "tpu.trace_stop"() : () -> ()
    %cst_89 = arith.constant dense<0.000000e+00> : vector<32x32xf32>
    %240 = vector.multi_reduction <add>, %239, %cst_89 [0] : vector<4x32x32xf32> to vector<32x32xf32>
    %c8 = arith.constant 8 : index
    %c0_90 = arith.constant 0 : index
    %241 = vector.load %arg3[%c8, %c0_90] : memref<14x32xf32, #tpu.memory_space<vmem>>, vector<1x32xf32>
    %242 = vector.shape_cast %241 : vector<1x32xf32> to vector<32xf32>
    %243 = vector.shape_cast %242 : vector<32xf32> to vector<1x32xf32>
    %244 = vector.broadcast %243 : vector<1x32xf32> to vector<32x32xf32>
    %245 = arith.addf %240, %244 : vector<32x32xf32>
    %246 = arith.addf %104, %245 : vector<32x32xf32>
    %c9 = arith.constant 9 : index
    %c0_91 = arith.constant 0 : index
    %247 = vector.load %arg3[%c9, %c0_91] : memref<14x32xf32, #tpu.memory_space<vmem>>, vector<1x32xf32>
    %248 = vector.shape_cast %247 : vector<1x32xf32> to vector<32xf32>
    %c10 = arith.constant 10 : index
    %c0_92 = arith.constant 0 : index
    %249 = vector.load %arg3[%c10, %c0_92] : memref<14x32xf32, #tpu.memory_space<vmem>>, vector<1x32xf32>
    %250 = vector.shape_cast %249 : vector<1x32xf32> to vector<32xf32>
    %cst_93 = arith.constant dense<0.000000e+00> : vector<32xf32>
    %251 = vector.multi_reduction <add>, %246, %cst_93 [1] : vector<32x32xf32> to vector<32xf32>
    %252 = vector.shape_cast %251 : vector<32xf32> to vector<32x1xf32>
    %cst_94 = arith.constant 3.200000e+01 : f32
    %253 = vector.broadcast %cst_94 : f32 to vector<32x1xf32>
    %254 = arith.divf %252, %253 : vector<32x1xf32>
    %255 = vector.broadcast %254 : vector<32x1xf32> to vector<32x32xf32>
    %256 = arith.subf %246, %255 : vector<32x32xf32>
    %257 = arith.mulf %256, %256 : vector<32x32xf32>
    %cst_95 = arith.constant dense<0.000000e+00> : vector<32xf32>
    %258 = vector.multi_reduction <add>, %257, %cst_95 [1] : vector<32x32xf32> to vector<32xf32>
    %259 = vector.shape_cast %258 : vector<32xf32> to vector<32x1xf32>
    %cst_96 = arith.constant 3.200000e+01 : f32
    %260 = vector.broadcast %cst_96 : f32 to vector<32x1xf32>
    %261 = arith.divf %259, %260 : vector<32x1xf32>
    %262 = vector.broadcast %254 : vector<32x1xf32> to vector<32x32xf32>
    %263 = arith.subf %246, %262 : vector<32x32xf32>
    %cst_97 = arith.constant 9.99999974E-6 : f32
    %264 = vector.broadcast %cst_97 : f32 to vector<32x1xf32>
    %265 = arith.addf %261, %264 : vector<32x1xf32>
    %266 = math.rsqrt %265 : vector<32x1xf32>
    %267 = vector.broadcast %266 : vector<32x1xf32> to vector<32x32xf32>
    %268 = arith.mulf %263, %267 : vector<32x32xf32>
    %269 = vector.shape_cast %248 : vector<32xf32> to vector<1x32xf32>
    %270 = vector.broadcast %269 : vector<1x32xf32> to vector<32x32xf32>
    %271 = arith.mulf %268, %270 : vector<32x32xf32>
    %272 = vector.shape_cast %250 : vector<32xf32> to vector<1x32xf32>
    %273 = vector.broadcast %272 : vector<1x32xf32> to vector<32x32xf32>
    %274 = arith.addf %271, %273 : vector<32x32xf32>
    %275 = arith.truncf %274 : vector<32x32xf32> to vector<32x32xbf16>
    %c1_98 = arith.constant 1 : index
    %c0_99 = arith.constant 0 : index
    %c0_100 = arith.constant 0 : index
    %276 = vector.load %arg8[%c1_98, %c0_99, %c0_100] : memref<2x32x128xbf16, #tpu.memory_space<vmem>>, vector<1x32x128xbf16>
    %277 = vector.shape_cast %276 : vector<1x32x128xbf16> to vector<32x128xbf16>
    %cst_101 = arith.constant dense<0.000000e+00> : vector<32x128xf32>
    %278 = tpu.matmul %275, %277, %cst_101 {dimension_numbers = #tpu.dot_dimension_numbers<[1], [0], [0], [1], [0, 0, 1, 1], [], []>} : vector<32x32xbf16>, vector<32x128xbf16>, vector<32x128xf32> -> vector<32x128xf32>
    %c1_102 = arith.constant 1 : index
    %c0_103 = arith.constant 0 : index
    %279 = vector.load %arg4[%c1_102, %c0_103] : memref<3x128xf32, #tpu.memory_space<vmem>>, vector<1x128xf32>
    %280 = vector.shape_cast %279 : vector<1x128xf32> to vector<128xf32>
    %281 = vector.shape_cast %280 : vector<128xf32> to vector<1x128xf32>
    %282 = vector.broadcast %281 : vector<1x128xf32> to vector<32x128xf32>
    %283 = arith.addf %278, %282 : vector<32x128xf32>
    %284 = arith.mulf %283, %283 : vector<32x128xf32>
    %285 = arith.mulf %283, %284 : vector<32x128xf32>
    %cst_104 = arith.constant 4.471500e-02 : f32
    %286 = vector.broadcast %cst_104 : f32 to vector<32x128xf32>
    %287 = arith.mulf %286, %285 : vector<32x128xf32>
    %288 = arith.addf %283, %287 : vector<32x128xf32>
    %cst_105 = arith.constant 0.797884583 : f32
    %289 = vector.broadcast %cst_105 : f32 to vector<32x128xf32>
    %290 = arith.mulf %289, %288 : vector<32x128xf32>
    %291 = math.tanh %290 : vector<32x128xf32>
    %cst_106 = arith.constant 1.000000e+00 : f32
    %292 = vector.broadcast %cst_106 : f32 to vector<32x128xf32>
    %293 = arith.addf %292, %291 : vector<32x128xf32>
    %cst_107 = arith.constant 5.000000e-01 : f32
    %294 = vector.broadcast %cst_107 : f32 to vector<32x128xf32>
    %295 = arith.mulf %294, %293 : vector<32x128xf32>
    %296 = arith.mulf %283, %295 : vector<32x128xf32>
    %297 = arith.truncf %296 : vector<32x128xf32> to vector<32x128xbf16>
    %c1_108 = arith.constant 1 : index
    %c0_109 = arith.constant 0 : index
    %c0_110 = arith.constant 0 : index
    %298 = vector.load %arg9[%c1_108, %c0_109, %c0_110] : memref<2x128x32xbf16, #tpu.memory_space<vmem>>, vector<1x128x32xbf16>
    %299 = vector.shape_cast %298 : vector<1x128x32xbf16> to vector<128x32xbf16>
    %cst_111 = arith.constant dense<0.000000e+00> : vector<32x32xf32>
    %300 = tpu.matmul %297, %299, %cst_111 {dimension_numbers = #tpu.dot_dimension_numbers<[1], [0], [0], [1], [0, 0, 1, 1], [], []>} : vector<32x128xbf16>, vector<128x32xbf16>, vector<32x32xf32> -> vector<32x32xf32>
    %c11 = arith.constant 11 : index
    %c0_112 = arith.constant 0 : index
    %301 = vector.load %arg3[%c11, %c0_112] : memref<14x32xf32, #tpu.memory_space<vmem>>, vector<1x32xf32>
    %302 = vector.shape_cast %301 : vector<1x32xf32> to vector<32xf32>
    %303 = vector.shape_cast %302 : vector<32xf32> to vector<1x32xf32>
    %304 = vector.broadcast %303 : vector<1x32xf32> to vector<32x32xf32>
    %305 = arith.addf %300, %304 : vector<32x32xf32>
    %306 = arith.addf %164, %305 : vector<32x32xf32>
    %307 = arith.addf %246, %306 : vector<32x32xf32>
    %cst_113 = arith.constant 5.000000e-01 : f32
    %308 = vector.broadcast %cst_113 : f32 to vector<32x32xf32>
    %309 = arith.mulf %308, %307 : vector<32x32xf32>
    %c12 = arith.constant 12 : index
    %c0_114 = arith.constant 0 : index
    %310 = vector.load %arg3[%c12, %c0_114] : memref<14x32xf32, #tpu.memory_space<vmem>>, vector<1x32xf32>
    %311 = vector.shape_cast %310 : vector<1x32xf32> to vector<32xf32>
    %c13 = arith.constant 13 : index
    %c0_115 = arith.constant 0 : index
    %312 = vector.load %arg3[%c13, %c0_115] : memref<14x32xf32, #tpu.memory_space<vmem>>, vector<1x32xf32>
    %313 = vector.shape_cast %312 : vector<1x32xf32> to vector<32xf32>
    %cst_116 = arith.constant dense<0.000000e+00> : vector<32xf32>
    %314 = vector.multi_reduction <add>, %309, %cst_116 [1] : vector<32x32xf32> to vector<32xf32>
    %315 = vector.shape_cast %314 : vector<32xf32> to vector<32x1xf32>
    %cst_117 = arith.constant 3.200000e+01 : f32
    %316 = vector.broadcast %cst_117 : f32 to vector<32x1xf32>
    %317 = arith.divf %315, %316 : vector<32x1xf32>
    %318 = vector.broadcast %317 : vector<32x1xf32> to vector<32x32xf32>
    %319 = arith.subf %309, %318 : vector<32x32xf32>
    %320 = arith.mulf %319, %319 : vector<32x32xf32>
    %cst_118 = arith.constant dense<0.000000e+00> : vector<32xf32>
    %321 = vector.multi_reduction <add>, %320, %cst_118 [1] : vector<32x32xf32> to vector<32xf32>
    %322 = vector.shape_cast %321 : vector<32xf32> to vector<32x1xf32>
    %cst_119 = arith.constant 3.200000e+01 : f32
    %323 = vector.broadcast %cst_119 : f32 to vector<32x1xf32>
    %324 = arith.divf %322, %323 : vector<32x1xf32>
    %325 = vector.broadcast %317 : vector<32x1xf32> to vector<32x32xf32>
    %326 = arith.subf %309, %325 : vector<32x32xf32>
    %cst_120 = arith.constant 9.99999974E-6 : f32
    %327 = vector.broadcast %cst_120 : f32 to vector<32x1xf32>
    %328 = arith.addf %324, %327 : vector<32x1xf32>
    %329 = math.rsqrt %328 : vector<32x1xf32>
    %330 = vector.broadcast %329 : vector<32x1xf32> to vector<32x32xf32>
    %331 = arith.mulf %326, %330 : vector<32x32xf32>
    %332 = vector.shape_cast %311 : vector<32xf32> to vector<1x32xf32>
    %333 = vector.broadcast %332 : vector<1x32xf32> to vector<32x32xf32>
    %334 = arith.mulf %331, %333 : vector<32x32xf32>
    %335 = vector.shape_cast %313 : vector<32xf32> to vector<1x32xf32>
    %336 = vector.broadcast %335 : vector<1x32xf32> to vector<32x32xf32>
    %337 = arith.addf %334, %336 : vector<32x32xf32>
    %338 = arith.truncf %337 : vector<32x32xf32> to vector<32x32xbf16>
    %c0_121 = arith.constant 0 : index
    %c0_122 = arith.constant 0 : index
    %339 = vector.load %arg10[%c0_121, %c0_122] : memref<32x128xbf16, #tpu.memory_space<vmem>>, vector<32x128xbf16>
    %cst_123 = arith.constant dense<0.000000e+00> : vector<32x128xf32>
    %340 = tpu.matmul %338, %339, %cst_123 {dimension_numbers = #tpu.dot_dimension_numbers<[1], [0], [0], [1], [0, 0, 1, 1], [], []>} : vector<32x32xbf16>, vector<32x128xbf16>, vector<32x128xf32> -> vector<32x128xf32>
    %c2_124 = arith.constant 2 : index
    %c0_125 = arith.constant 0 : index
    %341 = vector.load %arg4[%c2_124, %c0_125] : memref<3x128xf32, #tpu.memory_space<vmem>>, vector<1x128xf32>
    %342 = vector.shape_cast %341 : vector<1x128xf32> to vector<128xf32>
    %343 = vector.shape_cast %342 : vector<128xf32> to vector<1x128xf32>
    %344 = vector.broadcast %343 : vector<1x128xf32> to vector<32x128xf32>
    %345 = arith.addf %340, %344 : vector<32x128xf32>
    %346 = vector.shape_cast %345 : vector<32x128xf32> to vector<2x16x128xf32>
    %c0_126 = arith.constant 0 : index
    %c0_127 = arith.constant 0 : index
    %c0_128 = arith.constant 0 : index
    %347 = vector.load %arg11[%c0_126, %c0_127, %c0_128] : memref<2x16x128xf32, #tpu.memory_space<vmem>>, vector<2x16x128xf32>
    tpu.vector_store %arg11[%c0_126, %c0_127, %c0_128], %346 {strides = array<i32>} : memref<2x16x128xf32, #tpu.memory_space<vmem>>, vector<2x16x128xf32>,
    return
  }
}

</mosaic_0001>

<bundles_post_ra>
// kernel: tpu_custom_call.1
= control target key start
LH: loop header
LB: loop body
LE: loop exit
PB: predicated region body
PF: predicated region fallthrough
CT: control target
= control target key end

     0   :  { %v6160_v2 = vmov 0   ;;  %s7639_s0 = inlined_call_operand.vmem [shape: s32[32,1], index: 0, kind: input, shape index: {}]   ;;  %s7640_s1 = inlined_call_operand.vmem [shape: bf16[128,32], index: 1, kind: input, shape index: {}]   ;;  %s7641_s2 = inlined_call_operand.vmem [shape: f32[32,32], index: 2, kind: input, shape index: {}]   ;;  %s7642_s3 = inlined_call_operand.vmem [shape: f32[14,32], index: 3, kind: input, shape index: {}]   ;;  %s7643_s4 = inlined_call_operand.vmem [shape: f32[3,128], index: 4, kind: input, shape index: {}]   ;;  %s7644_s5 = inlined_call_operand.vmem [shape: bf16[2,4,32,8], index: 5, kind: input, shape index: {}]   ;;  %s7645_s6 = inlined_call_operand.vmem [shape: bf16[2,4,32,8], index: 6, kind: input, shape index: {}]   ;;  %s7646_s7 = inlined_call_operand.vmem [shape: bf16[2,4,8,32], index: 7, kind: input, shape index: {}]   ;;  %s7647_s8 = inlined_call_operand.vmem [shape: bf16[2,32,128], index: 8, kind: input, shape index: {}]   ;;  %s7648_s9 = inlined_call_operand.vmem [shape: bf16[2,128,32], index: 9, kind: input, shape index: {}]   ;;  %s7649_s10 = inlined_call_operand.vmem [shape: bf16[32,128], index: 10, kind: input, shape index: {}]   ;;  %s7650_s11 = inlined_call_operand.hbm [shape: f32[2,16,128], index: 11, kind: output, shape index: {}]  }
   0x1   :  { %v42_v0 = vld [vmem:[%s7639_s0 + $0x10] sm:$0xff]  ;;  %v40_v1 = vld [vmem:[%s7639_s0] sm:$0xff]  ;;  %5827 = vset.pattern.permute.xlu1 %v6160_v2  ;;  %5826 = vset.pattern.permute.xlu0 %v6160_v2  ;;  %v43_v3 = vld [vmem:[%s7639_s0 + $0x18] sm:$0xff] }
   0x2   :  { %v41_v4 = vld [vmem:[%s7639_s0 + $0x8] sm:$0xff]  ;;  %53 = vperm.xlu1 %5827, %v42_v0   ;;  %47 = vperm.xlu0 %5826, %v40_v1   ;;  %v5828_v5 = vld [vmem:[%s7640_s1 + $0x38] sm:$0xff]   ;;  %v5829_v6 = vld [vmem:[%s7640_s1 + $0x30] sm:$0xff]  }
   0x3   :  { %5359 = vmatprep.subr.bf16.mxu0 %v5828_v5  ;;  %v5830_v7 = vld [vmem:[%s7640_s1 + $0x28] sm:$0xff]   ;;  %v5831_v8 = vld [vmem:[%s7640_s1 + $0x20] sm:$0xff]   ;;  %v5832_v9 = vld [vmem:[%s7640_s1 + $0x18] sm:$0xff]  }
   0x4   :  { %5360 = vmatpush3.bf16.msra.mxu0 %v5828_v5  ;;  %v5833_v10 = vld [vmem:[%s7640_s1 + $0x10] sm:$0xff]   ;;  %v5834_v11 = vld [vmem:[%s7640_s1 + $0x8] sm:$0xff]   ;;  %v5835_v12 = vld [vmem:[%s7640_s1] sm:$0xff]  }
   0x5   :  { %5361 = vmatprep.subr.bf16.mxu0 %v5829_v6 }
   0x6   :  { %56 = vperm.xlu1 %5827, %v43_v3   ;;  %50 = vperm.xlu0 %5826, %v41_v4  }
   0x8   :  { %5362 = vmatpush3.bf16.msra.mxu0 %v5829_v6 }
   0x9   :  { %5363 = vmatprep.subr.bf16.mxu0 %v5830_v7 }
   0xc   :  { %5364 = vmatpush3.bf16.msra.mxu0 %v5830_v7 }
   0xd   :  { %5365 = vmatprep.subr.bf16.mxu0 %v5831_v8 }
  0x10   :  { %5366 = vmatpush3.bf16.msra.mxu0 %v5831_v8 }
  0x11   :  { %5367 = vmatprep.subr.bf16.mxu0 %v5832_v9 }
  0x14   :  { %5368 = vmatpush3.bf16.msra.mxu0 %v5832_v9 }
  0x15   :  { %5369 = vmatprep.subr.bf16.mxu0 %v5833_v10 }
  0x18   :  { %5370 = vmatpush3.bf16.msra.mxu0 %v5833_v10 }
  0x19   :  { %5371 = vmatprep.subr.bf16.mxu0 %v5834_v11 }
  0x1c   :  { %5372 = vmatpush3.bf16.msra.mxu0 %v5834_v11 }
  0x1d   :  { %5373 = vmatprep.subr.bf16.mxu0 %v5835_v12 }
  0x20   :  { %5374 = vmatpush3.bf16.msra.mxu0 %v5835_v12 }
  0x21   :  { %16 = vsyncpa [#allocation3], 0  ;;  %v44_v13 = vlaneseq  ;;  %v6161_v19 = vmov 1.0|1.0   ;;  %v88_v21 = vld [vmem:[%s7641_s2] sm:$0xff]  ;;  %v90_v22 = vld [vmem:[%s7641_s2 + $0x10] sm:$0xff] }
  0x22   :  { %v89_v26 = vld [vmem:[%s7641_s2 + $0x8] sm:$0xff]  ;;  %vm244_vm6 = vcmask 261120   ;;  %v91_v29 = vld [vmem:[%s7641_s2 + $0x18] sm:$0xff]  ;;  %v5838_v58 = vld [vmem:[%s7644_s5] sm:$0xff]   ;;  %v6162_v61 = vmov 0.0   ;;  %vm834_vm7 = vcmask 64512  }
  0x23   :  { %v6264_v16 = vand.u32 127, %v44_v13  ;;  %v5836_v56 = vld [vmem:[%s7644_s5 + $0x8] sm:$0xff]   ;;  %v5839_v59 = vld [vmem:[%s7645_s6 + $0x20] sm:$0xff]   ;;  %v5840_v60 = vld [vmem:[%s7644_s5 + $0x18] sm:$0xff]   ;;  %vm6163_vm8 = vmmov 0   ;;  %vm1355_vm15 = vcmask 130048  }
  0x24   :  { %v5837_v57 = vld [vmem:[%s7645_s6 + $0x28] sm:$0xff]   ;;  %5379 = vmatprep.subr.bf16.mxu1 %v5836_v56  ;;  %v4952_v12 = vld [vmem:[%s7642_s3] ss:$0 sm:$0xff] }
  0x25   :  { %5427 = vmatprep.subr.bf16.mxu0 %v5837_v57  ;;  %5380 = vmatpush3.bf16.msra.mxu1 %v5836_v56 }
  0x26   :  { %5381 = vmatprep.subr.bf16.mxu1 %v5838_v58 }
  0x29   :  { %5382 = vmatpush3.bf16.msra.mxu1 %v5838_v58 }
  0x2a   :  { %5387 = vmatprep.subr.bf16.mxu1 %v5840_v60 }
  0x7d   :  { %v54_v14 = vpop.permute.xlu1 %53  ;;  %v48_v15 = vpop.permute.xlu0 %47 }
  0x7e   :  { %vm60_vm0 = vcmp.eq.s32.totalorder %v6264_v16, %v54_v14  ;;  %vm58_vm4 = vcmp.eq.s32.totalorder %v6264_v16, %v48_v15 }
  0x81   :  { %v57_v17 = vpop.permute.xlu1 %56  ;;  %v51_v18 = vpop.permute.xlu0 %50 }
  0x82   :  { %vm61_vm1 = vcmp.eq.s32.totalorder %v6264_v16, %v57_v17  ;;  %vm59_vm2 = vcmp.eq.s32.totalorder %v6264_v16, %v51_v18 }
  0x83   :  { %vm4948_vm3 = vmpackc.low %vm61_vm1, %vm60_vm0  ;;  %vm1906_vm0 = vcmask 1043456  }
  0x84   :  { %vm4946_vm5 = vmpackc.low %vm59_vm2, %vm58_vm4 }
  0x85   :  { %5375 = vmatprep.mubr.msk.bf16.mxu0 %vm4946_vm5, %v6161_v19 }
  0x86   :  { %5376 = vmatmul.mubr.msk.bf16.vlgmr.msra.gmra.mxu0 %vm4948_vm3, %v6161_v19 }
  0x87   :  { %5428 = vmatpush3.bf16.msra.mxu0 %v5837_v57 }
  0x88   :  { %5429 = vmatprep.subr.bf16.mxu0 %v5839_v59 }
  0x8b   :  { %5430 = vmatpush3.bf16.msra.mxu0 %v5839_v59 }
  0x8c   :  { %5443 = vmatprep.subr.bf16.mxu0 %v6162_v61 }
 0x146   :  { %v5377_v20 = vpop.f32.mrf.mxu0 }
 0x147   :  { %v6281_v27 = vadd.f32 %v5377_v20, %v90_v22  ;;  %v4953_v20 = vld [vmem:[%s7642_s3 + $0x1] ss:$0 sm:$0xff] }
 0x148   :  { %v174_v23 = vpop.f32.mrf.mxu0 }
 0x149   :  { %v6276_v24 = vadd.f32 %v174_v23, %v88_v21  ;;  %v251_v34 = vsel %vm244_vm6, %v6281_v27, 0.0 }
 0x14a   :  { %v5378_v25 = vpop.f32.mrf.mxu0 }
 0x14b   :  { %v245_v28 = vsel %vm244_vm6, %v6276_v24, 0.0  ;;  %v6290_v32 = vadd.f32 %v5378_v25, %v91_v29 }
 0x14c   :  { %v177_v30 = vpop.f32.mrf.mxu0  ;;  %246 = vadd.xlane.f32.xlu0 %v245_v28 }
 0x14d   :  { %v6288_v31 = vadd.f32 %v177_v30, %v89_v26  ;;  %v254_v35 = vsel %vm244_vm6, %v6290_v32, 0.0 }
 0x14f   :  { %v248_v33 = vsel %vm244_vm6, %v6288_v31, 0.0 }
 0x150   :  { %249 = vadd.xlane.f32.xlu1 %v248_v33  ;;  %252 = vadd.xlane.f32.xlu0 %v251_v34 }
 0x154   :  { %255 = vadd.xlane.f32.xlu0 %v254_v35 }
 0x1d5   :  { %v247_v36 = vpop.xlane.xlu0 %246 }
 0x1d6   :  { %v258_v37 = vmul.f32 0.03125, %v247_v36  ;;  %v5841_v36 = vld [vmem:[%s7644_s5 + $0x10] sm:$0xff]  }
 0x1d8   :  { %v262_v38 = vsub.f32 %v6276_v24, %v258_v37  ;;  %v5842_v37 = vld [vmem:[%s7644_s5 + $0x28] sm:$0xff]  }
 0x1d9   :  { %v250_v39 = vpop.xlane.xlu1 %249  ;;  %v253_v40 = vpop.xlane.xlu0 %252 }
 0x1da   :  { %v259_v41 = vmul.f32 0.03125, %v250_v39  ;;  %v260_v42 = vmul.f32 0.03125, %v253_v40  ;;  %v266_v43 = vmul.f32 %v262_v38, %v262_v38  ;;  %v5844_v39 = vld [vmem:[%s7644_s5 + $0x38] sm:$0xff]   ;;  %v5845_v40 = vld [vmem:[%s7644_s5 + $0x30] sm:$0xff]  }
 0x1dc   :  { %v263_v44 = vsub.f32 %v6288_v31, %v259_v41  ;;  %v264_v45 = vsub.f32 %v6281_v27, %v260_v42  ;;  %v270_v46 = vsel %vm244_vm6, %v266_v43, 0.0  ;;  %v5846_v41 = vld [vmem:[%s7645_s6 + $0x8] sm:$0xff]   ;;  %v5847_v42 = vld [vmem:[%s7645_s6] sm:$0xff]   ;;  %v5848_v43 = vld [vmem:[%s7645_s6 + $0x18] sm:$0xff]  }
 0x1dd   :  { %271 = vadd.xlane.f32.xlu1 %v270_v46  ;;  %v256_v47 = vpop.xlane.xlu0 %255  ;;  %v5851_v46 = vld [vmem:[%s7645_s6 + $0x30] sm:$0xff]  }
 0x1de   :  { %v261_v48 = vmul.f32 0.03125, %v256_v47  ;;  %v267_v49 = vmul.f32 %v263_v44, %v263_v44  ;;  %v268_v50 = vmul.f32 %v264_v45, %v264_v45 }
 0x1e0   :  { %v265_v51 = vsub.f32 %v6290_v32, %v261_v48  ;;  %v273_v52 = vsel %vm244_vm6, %v267_v49, 0.0  ;;  %v276_v53 = vsel %vm244_vm6, %v268_v50, 0.0 }
 0x1e1   :  { %274 = vadd.xlane.f32.xlu0 %v273_v52  ;;  %277 = vadd.xlane.f32.xlu1 %v276_v53 }
 0x1e2   :  { %v269_v54 = vmul.f32 %v265_v51, %v265_v51 }
 0x1e4   :  { %v279_v55 = vsel %vm244_vm6, %v269_v54, 0.0 }
 0x1e5   :  { %280 = vadd.xlane.f32.xlu0 %v279_v55 }
 0x266   :  { %v272_v62 = vpop.xlane.xlu1 %271 }
 0x267   :  { %v282_v63 = vmul.f32 0.03125, %v272_v62 }
 0x269   :  { %v286_v0 = vadd.f32 1e-05, %v282_v63 }
 0x26a   :  { %v278_v1 = vpop.xlane.xlu1 %277  ;;  %v275_v2 = vpop.xlane.xlu0 %274 }
 0x26b   :  { %5890 = vrsqrt.f32 %v286_v0  ;;  %v284_v3 = vmul.f32 0.03125, %v278_v1  ;;  %v283_v4 = vmul.f32 0.03125, %v275_v2 }
 0x26d   :  { %v288_v5 = vadd.f32 1e-05, %v284_v3  ;;  %v287_v6 = vadd.f32 1e-05, %v283_v4 }
 0x26e   :  { %v281_v7 = vpop.xlane.xlu0 %280 }
 0x26f   :  { %5892 = vrsqrt.f32 %v288_v5  ;;  %v285_v8 = vmul.f32 0.03125, %v281_v7 }
 0x270   :  { %5894 = vrsqrt.f32 %v287_v6 }
 0x271   :  { %v289_v9 = vadd.f32 1e-05, %v285_v8 }
 0x273   :  { %5896 = vrsqrt.f32 %v289_v9 }
 0x278   :  { %v5891_v10 = vpop.eup %5890 }
 0x279   :  { %v294_v11 = vmul.f32 %v5891_v10, %v262_v38  ;;  %v5843_v38 = vld [vmem:[%s7644_s5 + $0x20] sm:$0xff]  }
 0x27b   :  { %v302_v18 = vmul.f32 %v4952_v12, %v294_v11 }
 0x27c   :  { %v5893_v14 = vpop.eup %5892 }
 0x27d   :  { %v5895_v15 = vpop.eup %5894  ;;  %v296_v17 = vmul.f32 %v5893_v14, %v264_v45  ;;  %v310_v26 = vadd.f32 %v4953_v20, %v302_v18  ;;  %v5850_v45 = vld [vmem:[%s7645_s6 + $0x38] sm:$0xff]  }
 0x27e   :  { %v295_v19 = vmul.f32 %v5895_v15, %v263_v44  ;;  %v5849_v44 = vld [vmem:[%s7645_s6 + $0x10] sm:$0xff]  }
 0x27f   :  { %v304_v23 = vmul.f32 %v4952_v12, %v296_v17 }
 0x280   :  { %v5897_v21 = vpop.eup %5896  ;;  %v303_v22 = vmul.f32 %v4952_v12, %v295_v19 }
 0x281   :  { %v297_v25 = vmul.f32 %v5897_v21, %v265_v51  ;;  %v312_v33 = vadd.f32 %v4953_v20, %v304_v23 }
 0x282   :  { %v311_v28 = vadd.f32 %v4953_v20, %v303_v22 }
 0x283   :  { %v305_v29 = vmul.f32 %v4952_v12, %v297_v25 }
 0x284   :  { %v314_v30 = vpack.c.bf16 %v311_v28, %v310_v26 }
 0x285   :  { %v313_v34 = vadd.f32 %v4953_v20, %v305_v29 }
 0x286   :  { %5383 = vmatprep.mubr.msk.bf16.mxu1 %vm244_vm6, %v314_v30  ;;  %5431 = vmatprep.mubr.msk.bf16.mxu0 %vm244_vm6, %v314_v30 }
 0x287   :  { %v315_v35 = vpack.c.bf16 %v313_v34, %v312_v33 }
 0x289   :  { %5384 = vmatmul.mubr.msk.bf16.vlgmr.msra.gmra.mxu1 %vm244_vm6, %v315_v35  ;;  %5432 = vmatmul.mubr.msk.bf16.vlgmr.msra.gmra.mxu0 %vm244_vm6, %v315_v35 }
 0x28a   :  { %5388 = vmatpush3.bf16.msra.mxu1 %v5840_v60  ;;  %5391 = vmatprep.mubr.msk.bf16.mxu1 %vm244_vm6, %v314_v30 }
 0x28b   :  { %5389 = vmatprep.subr.bf16.mxu1 %v5841_v36  ;;  %5445 = vmatprep.mubr.msk.bf16.mxu0 %vm6163_vm8, %v6162_v61 }
 0x28e   :  { %5390 = vmatpush3.bf16.msra.mxu1 %v5841_v36 }
 0x28f   :  { %5395 = vmatprep.subr.bf16.mxu1 %v5842_v37 }
 0x291   :  { %5392 = vmatmul.mubr.msk.bf16.vlgmr.msra.gmra.mxu1 %vm244_vm6, %v315_v35 }
 0x292   :  { %5396 = vmatpush3.bf16.msra.mxu1 %v5842_v37  ;;  %5399 = vmatprep.mubr.msk.bf16.mxu1 %vm244_vm6, %v314_v30 }
 0x293   :  { %5397 = vmatprep.subr.bf16.mxu1 %v5843_v38 }
 0x296   :  { %5398 = vmatpush3.bf16.msra.mxu1 %v5843_v38 }
 0x297   :  { %5403 = vmatprep.subr.bf16.mxu1 %v5844_v39 }
 0x299   :  { %5400 = vmatmul.mubr.msk.bf16.vlgmr.msra.gmra.mxu1 %vm244_vm6, %v315_v35 }
 0x29a   :  { %5404 = vmatpush3.bf16.msra.mxu1 %v5844_v39  ;;  %5407 = vmatprep.mubr.msk.bf16.mxu1 %vm244_vm6, %v314_v30 }
 0x29b   :  { %5405 = vmatprep.subr.bf16.mxu1 %v5845_v40 }
 0x29e   :  { %5406 = vmatpush3.bf16.msra.mxu1 %v5845_v40 }
 0x29f   :  { %5411 = vmatprep.subr.bf16.mxu1 %v5846_v41 }
 0x2a1   :  { %5408 = vmatmul.mubr.msk.bf16.vlgmr.msra.gmra.mxu1 %vm244_vm6, %v315_v35 }
 0x2a2   :  { %5412 = vmatpush3.bf16.msra.mxu1 %v5846_v41  ;;  %5415 = vmatprep.mubr.msk.bf16.mxu1 %vm244_vm6, %v314_v30 }
 0x2a3   :  { %5413 = vmatprep.subr.bf16.mxu1 %v5847_v42 }
 0x2a6   :  { %5414 = vmatpush3.bf16.msra.mxu1 %v5847_v42 }
 0x2a7   :  { %5419 = vmatprep.subr.bf16.mxu1 %v5848_v43 }
 0x2a9   :  { %5416 = vmatmul.mubr.msk.bf16.vlgmr.msra.gmra.mxu1 %vm244_vm6, %v315_v35 }
 0x2aa   :  { %5420 = vmatpush3.bf16.msra.mxu1 %v5848_v43  ;;  %5423 = vmatprep.mubr.msk.bf16.mxu1 %vm244_vm6, %v314_v30 }
 0x2ab   :  { %5421 = vmatprep.subr.bf16.mxu1 %v5849_v44 }
 0x2ae   :  { %5422 = vmatpush3.bf16.msra.mxu1 %v5849_v44 }
 0x2af   :  { %5435 = vmatprep.subr.bf16.mxu1 %v5850_v45 }
 0x2b1   :  { %5424 = vmatmul.mubr.msk.bf16.vlgmr.msra.gmra.mxu1 %vm244_vm6, %v315_v35 }
 0x2b2   :  { %5436 = vmatpush3.bf16.msra.mxu1 %v5850_v45  ;;  %5439 = vmatprep.mubr.msk.bf16.mxu1 %vm244_vm6, %v314_v30 }
 0x2b3   :  { %5437 = vmatprep.subr.bf16.mxu1 %v5851_v46 }
 0x2b6   :  { %5438 = vmatpush3.bf16.msra.mxu1 %v5851_v46 }
 0x2b7   :  { %5449 = vmatprep.subr.bf16.mxu1 %v6162_v61 }
 0x2b9   :  { %5440 = vmatmul.mubr.msk.bf16.vlgmr.msra.gmra.mxu1 %vm244_vm6, %v315_v35 }
 0x2ba   :  { %5451 = vmatprep.mubr.msk.bf16.mxu1 %vm6163_vm8, %v6162_v61 }
 0x349   :  { %v6378_v47 = vpop.f32.mrf.mxu1  ;;  %v6380_v48 = vpop.f32.mrf.mxu0 }
 0x34a   :  { %v820_v56 = vmul.f32 %v6378_v47, %v6378_v47 }
 0x34b   :  { %v6382_v49 = vpop.f32.mrf.mxu1  ;;  %v6384_v50 = vpop.f32.mrf.mxu0 }
 0x34c   :  { %v818_v51 = vmul.f32 %v6382_v49, %v6382_v49  ;;  %v841_v60 = vsel %vm834_vm7, %v820_v56, 0.0 }
 0x34d   :  { %v6388_v52 = vpop.f32.mrf.mxu1  ;;  %v6390_v53 = vpop.f32.mrf.mxu0 }
 0x34e   :  { %v815_v54 = vpack.c.bf16 %v6390_v53, %v6380_v48  ;;  %v835_v55 = vsel %vm834_vm7, %v818_v51, 0.0  ;;  %v821_v63 = vmul.f32 %v6388_v52, %v6388_v52 }
 0x34f   :  { %836 = vadd.xlane.f32.xlu1 %v835_v55  ;;  %v6397_v57 = vpop.f32.mrf.mxu1 }
 0x350   :  { %v819_v58 = vmul.f32 %v6397_v57, %v6397_v57  ;;  %v844_v3 = vsel %vm834_vm7, %v821_v63, 0.0 }
 0x351   :  { %v6401_v59 = vpop.f32.mrf.mxu1 }
 0x352   :  { %v838_v62 = vsel %vm834_vm7, %v819_v58, 0.0  ;;  %v824_v5 = vmul.f32 %v6401_v59, %v6401_v59 }
 0x353   :  { %842 = vadd.xlane.f32.xlu1 %v841_v60  ;;  %839 = vadd.xlane.f32.xlu0 %v838_v62  ;;  %v6407_v0 = vpop.f32.mrf.mxu1 }
 0x354   :  { %v822_v1 = vmul.f32 %v6407_v0, %v6407_v0  ;;  %v853_v9 = vsel %vm834_vm7, %v824_v5, 0.0 }
 0x355   :  { %v6411_v2 = vpop.f32.mrf.mxu1 }
 0x356   :  { %v847_v4 = vsel %vm834_vm7, %v822_v1, 0.0  ;;  %v825_v11 = vmul.f32 %v6411_v2, %v6411_v2 }
 0x357   :  { %845 = vadd.xlane.f32.xlu0 %v844_v3  ;;  %848 = vadd.xlane.f32.xlu1 %v847_v4  ;;  %v6417_v6 = vpop.f32.mrf.mxu1 }
 0x358   :  { %v823_v7 = vmul.f32 %v6417_v6, %v6417_v6  ;;  %v856_v17 = vsel %vm834_vm7, %v825_v11, 0.0 }
 0x359   :  { %v6421_v8 = vpop.f32.mrf.mxu1 }
 0x35a   :  { %v850_v10 = vsel %vm834_vm7, %v823_v7, 0.0  ;;  %v828_v19 = vmul.f32 %v6421_v8, %v6421_v8 }
 0x35b   :  { %854 = vadd.xlane.f32.xlu1 %v853_v9  ;;  %851 = vadd.xlane.f32.xlu0 %v850_v10  ;;  %v6427_v12 = vpop.f32.mrf.mxu1 }
 0x35c   :  { %v826_v14 = vmul.f32 %v6427_v12, %v6427_v12  ;;  %v865_v23 = vsel %vm834_vm7, %v828_v19, 0.0 }
 0x35d   :  { %v6431_v15 = vpop.f32.mrf.mxu1 }
 0x35e   :  { %v859_v18 = vsel %vm834_vm7, %v826_v14, 0.0  ;;  %v829_v26 = vmul.f32 %v6431_v15, %v6431_v15 }
 0x35f   :  { %857 = vadd.xlane.f32.xlu0 %v856_v17  ;;  %860 = vadd.xlane.f32.xlu1 %v859_v18  ;;  %v6437_v20 = vpop.f32.mrf.mxu1 }
 0x360   :  { %v827_v21 = vmul.f32 %v6437_v20, %v6437_v20  ;;  %v868_v33 = vsel %vm834_vm7, %v829_v26, 0.0 }
 0x361   :  { %v6441_v22 = vpop.f32.mrf.mxu1 }
 0x362   :  { %v862_v25 = vsel %vm834_vm7, %v827_v21, 0.0  ;;  %v832_v35 = vmul.f32 %v6441_v22, %v6441_v22 }
 0x363   :  { %866 = vadd.xlane.f32.xlu1 %v865_v23  ;;  %863 = vadd.xlane.f32.xlu0 %v862_v25  ;;  %v6447_v28 = vpop.f32.mrf.mxu1 }
 0x364   :  { %v830_v29 = vmul.f32 %v6447_v28, %v6447_v28  ;;  %v877_v39 = vsel %vm834_vm7, %v832_v35, 0.0 }
 0x365   :  { %v6451_v30 = vpop.f32.mrf.mxu1 }
 0x366   :  { %v871_v34 = vsel %vm834_vm7, %v830_v29, 0.0  ;;  %v833_v41 = vmul.f32 %v6451_v30, %v6451_v30 }
 0x367   :  { %869 = vadd.xlane.f32.xlu0 %v868_v33  ;;  %872 = vadd.xlane.f32.xlu1 %v871_v34  ;;  %v6457_v36 = vpop.f32.mrf.mxu1 }
 0x368   :  { %v831_v37 = vmul.f32 %v6457_v36, %v6457_v36  ;;  %v880_v44 = vsel %vm834_vm7, %v833_v41, 0.0 }
 0x369   :  { %v6461_v38 = vpop.f32.mrf.mxu1 }
 0x36a   :  { %v874_v40 = vsel %vm834_vm7, %v831_v37, 0.0 }
 0x36b   :  { %878 = vadd.xlane.f32.xlu1 %v877_v39  ;;  %875 = vadd.xlane.f32.xlu0 %v874_v40  ;;  %v6467_v42 = vpop.f32.mrf.mxu1 }
 0x36d   :  { %v6469_v43 = vpop.f32.mrf.mxu1 }
 0x36f   :  { %881 = vadd.xlane.f32.xlu0 %v880_v44  ;;  %v6472_v45 = vpop.f32.mrf.mxu1 }
 0x371   :  { %v6474_v46 = vpop.f32.mrf.mxu1 }
 0x373   :  { %v6476_v51 = vpop.f32.mrf.mxu1 }
 0x375   :  { %v6478_v55 = vpop.f32.mrf.mxu1 }
 0x376   :  { %v813_v56 = vpack.c.bf16 %v6478_v55, %v6474_v46 }
 0x377   :  { %v6482_v58 = vpop.f32.mrf.mxu1 }
 0x378   :  { %v812_v60 = vpack.c.bf16 %v6482_v58, %v6476_v51 }
 0x379   :  { %v6486_v62 = vpop.f32.mrf.mxu1 }
 0x37b   :  { %v6492_v63 = vpop.f32.mrf.mxu1 }
 0x37d   :  { %v6494_v1 = vpop.f32.mrf.mxu1 }
 0x37e   :  { %v817_v3 = vpack.c.bf16 %v6494_v1, %v6486_v62  ;;  %v239_v1 = vld [vmem:[%s7646_s7 + $0x4] sm:$0xf] }
 0x3d8   :  { %v837_v4 = vpop.xlane.xlu1 %836 }
 0x3d9   :  { %v883_v5 = vmax.f32 %v837_v4, 1e-24 }
 0x3db   :  { %5898 = vrsqrt.f32 %v883_v5 }
 0x3dc   :  { %v843_v7 = vpop.xlane.xlu1 %842  ;;  %v840_v9 = vpop.xlane.xlu0 %839 }
 0x3dd   :  { %v885_v10 = vmax.f32 %v843_v7, 1e-24  ;;  %v884_v11 = vmax.f32 %v840_v9, 1e-24 }
 0x3df   :  { %5900 = vrsqrt.f32 %v884_v11 }
 0x3e0   :  { %v846_v14 = vpop.xlane.xlu0 %845  ;;  %v849_v17 = vpop.xlane.xlu1 %848  ;;  %5902 = vrsqrt.f32 %v885_v10 }
 0x3e1   :  { %v886_v18 = vmax.f32 %v846_v14, 1e-24  ;;  %v887_v19 = vmax.f32 %v849_v17, 1e-24 }
 0x3e3   :  { %5904 = vrsqrt.f32 %v886_v18 }
 0x3e4   :  { %v855_v21 = vpop.xlane.xlu1 %854  ;;  %v852_v23 = vpop.xlane.xlu0 %851  ;;  %5906 = vrsqrt.f32 %v887_v19 }
 0x3e5   :  { %v889_v25 = vmax.f32 %v855_v21, 1e-24  ;;  %v888_v26 = vmax.f32 %v852_v23, 1e-24 }
 0x3e7   :  { %5908 = vrsqrt.f32 %v888_v26 }
 0x3e8   :  { %v858_v29 = vpop.xlane.xlu0 %857  ;;  %v861_v33 = vpop.xlane.xlu1 %860  ;;  %5910 = vrsqrt.f32 %v889_v25 }
 0x3e9   :  { %v890_v34 = vmax.f32 %v858_v29, 1e-24  ;;  %v891_v35 = vmax.f32 %v861_v33, 1e-24  ;;  %v5899_v37 = vpop.eup %5898 }
 0x3ea   :  { %v915_v7 = vmul.f32 %v5899_v37, %v6382_v49 }
 0x3eb   :  { %5912 = vrsqrt.f32 %v890_v34 }
 0x3ec   :  { %v867_v39 = vpop.xlane.xlu1 %866  ;;  %v864_v40 = vpop.xlane.xlu0 %863  ;;  %5914 = vrsqrt.f32 %v891_v35 }
 0x3ed   :  { %v5901_v41 = vpop.eup %5900  ;;  %v893_v44 = vmax.f32 %v867_v39, 1e-24  ;;  %v892_v4 = vmax.f32 %v864_v40, 1e-24 }
 0x3ee   :  { %v5903_v5 = vpop.eup %5902  ;;  %v916_v9 = vmul.f32 %v5901_v41, %v6397_v57 }
 0x3ef   :  { %5916 = vrsqrt.f32 %v892_v4  ;;  %v917_v19 = vmul.f32 %v5903_v5, %v6378_v47 }
 0x3f0   :  { %v5905_v10 = vpop.eup %5904  ;;  %v870_v11 = vpop.xlane.xlu0 %869  ;;  %v939_v17 = vpack.c.bf16 %v916_v9, %v915_v7  ;;  %5918 = vrsqrt.f32 %v893_v44  ;;  %v931_v7 = vpack.c.bf16 %v6397_v57, %v6382_v49 }
 0x3f1   :  { %v873_v14 = vpop.xlane.xlu1 %872  ;;  %v894_v18 = vmax.f32 %v870_v11, 1e-24  ;;  %v918_v21 = vmul.f32 %v5905_v10, %v6388_v52  ;;  %v5907_v26 = vpop.eup %5906 }
 0x3f2   :  { %v895_v23 = vmax.f32 %v873_v14, 1e-24  ;;  %v951_v25 = vsel %vm834_vm7, %v939_v17, 0  ;;  %v919_v44 = vmul.f32 %v5907_v26, %v6407_v0 }
 0x3f3   :  { %5920 = vrsqrt.f32 %v894_v18  ;;  %5444 = vmatpush3.bf16.xpose.msra.mxu0 %v951_v25  ;;  %v940_v29 = vpack.c.bf16 %v918_v21, %v917_v19  ;;  %v932_v21 = vpack.c.bf16 %v6388_v52, %v6378_v47  ;;  %v933_v52 = vpack.c.bf16 %v6417_v6, %v6407_v0 }
 0x3f4   :  { %v876_v34 = vpop.xlane.xlu0 %875  ;;  %5455 = vmatprep.subr.bf16.mxu0 %v6162_v61  ;;  %v5909_v35 = vpop.eup %5908  ;;  %5922 = vrsqrt.f32 %v895_v23 }
 0x3f5   :  { %v879_v33 = vpop.xlane.xlu1 %878  ;;  %v896_v39 = vmax.f32 %v876_v34, 1e-24  ;;  %v998_v40 = vsel %vm834_vm7, %v940_v29, 0  ;;  %v5911_v41 = vpop.eup %5910  ;;  %v920_v4 = vmul.f32 %v5909_v35, %v6417_v6 }
 0x3f6   :  { %v897_v37 = vmax.f32 %v879_v33, 1e-24  ;;  %5450 = vmatpush3.bf16.xpose.msra.mxu1 %v998_v40  ;;  %v921_v14 = vmul.f32 %v5911_v41, %v6401_v59  ;;  %v934_v40 = vpack.c.bf16 %v6411_v2, %v6401_v59 }
 0x3f7   :  { %5461 = vmatprep.subr.bf16.mxu1 %v6162_v61  ;;  %5924 = vrsqrt.f32 %v896_v39  ;;  %v941_v10 = vpack.c.bf16 %v920_v4, %v919_v44 }
 0x3f8   :  { %v5913_v5 = vpop.eup %5912  ;;  %v882_v9 = vpop.xlane.xlu0 %881  ;;  %5926 = vrsqrt.f32 %v897_v37 }
 0x3f9   :  { %v898_v11 = vmax.f32 %v882_v9, 1e-24  ;;  %v922_v17 = vmul.f32 %v5913_v5, %v6411_v2  ;;  %v1045_v18 = vsel %vm834_vm7, %v941_v10, 0  ;;  %v5915_v19 = vpop.eup %5914  ;;  %v935_v2 = vpack.c.bf16 %v6437_v20, %v6427_v12 }
 0x3fa   :  { %5446 = vmatmul.mubr.msk.bf16.vlgmr.msra.gmra.mxu0 %vm834_vm7, %v931_v7  ;;  %v923_v26 = vmul.f32 %v5915_v19, %v6427_v12 }
 0x3fb   :  { %5928 = vrsqrt.f32 %v898_v11  ;;  %5456 = vmatpush3.bf16.xpose.msra.mxu0 %v1045_v18  ;;  %v942_v49 = vpack.c.bf16 %v922_v17, %v921_v14  ;;  %5457 = vmatprep.mubr.msk.bf16.mxu0 %vm6163_vm8, %v6162_v61  ;;  %v936_v14 = vpack.c.bf16 %v6431_v15, %v6421_v8  ;;  %v811_v18 = vpack.c.bf16 %v6469_v43, %v6461_v38  ;;  %v6590_v43 = vpop.f32.mrf.mxu1 }
 0x3fc   :  { %5467 = vmatprep.subr.bf16.mxu0 %v6162_v61  ;;  %v5917_v57 = vpop.eup %5916 }
 0x3fd   :  { %5452 = vmatmul.mubr.msk.bf16.vlgmr.msra.gmra.mxu1 %vm834_vm7, %v932_v21  ;;  %v1092_v23 = vsel %vm834_vm7, %v942_v49, 0  ;;  %v5919_v25 = vpop.eup %5918  ;;  %v924_v29 = vmul.f32 %v5917_v57, %v6437_v20  ;;  %v938_v20 = vpack.c.bf16 %v6451_v30, %v6441_v22 }
 0x3fe   :  { %5462 = vmatpush3.bf16.xpose.msra.mxu1 %v1092_v23  ;;  %5463 = vmatprep.mubr.msk.bf16.mxu1 %vm6163_vm8, %v6162_v61  ;;  %v925_v34 = vmul.f32 %v5919_v25, %v6421_v8  ;;  %v937_v8 = vpack.c.bf16 %v6457_v36, %v6447_v28 }
 0x3ff   :  { %5473 = vmatprep.subr.bf16.mxu1 %v6162_v61  ;;  %v943_v33 = vpack.c.bf16 %v924_v29, %v923_v26 }
 0x400   :  { %v5921_v47 = vpop.eup %5920 }
 0x401   :  { %v926_v35 = vmul.f32 %v5921_v47, %v6431_v15  ;;  %v1139_v37 = vsel %vm834_vm7, %v943_v33, 0  ;;  %v5923_v39 = vpop.eup %5922  ;;  %v810_v15 = vpack.c.bf16 %v6472_v45, %v6467_v42 }
 0x402   :  { %5458 = vmatmul.mubr.msk.bf16.vlgmr.msra.gmra.mxu0 %vm834_vm7, %v933_v52  ;;  %v927_v4 = vmul.f32 %v5923_v39, %v6447_v28  ;;  %v190_v28 = vshrl.u32 %v44_v13, 7 }
 0x403   :  { %5468 = vmatpush3.bf16.xpose.msra.mxu0 %v1139_v37  ;;  %v944_v41 = vpack.c.bf16 %v926_v35, %v925_v34  ;;  %5469 = vmatprep.mubr.msk.bf16.mxu0 %vm6163_vm8, %v6162_v61 }
 0x404   :  { %5479 = vmatprep.subr.bf16.mxu0 %v6162_v61  ;;  %v5925_v0 = vpop.eup %5924  ;;  %vm200_vm9 = vcmp.gt.s32.totalorder %v6264_v16, %v190_v28  ;;  %vm192_vm10 = vcmp.lt.s32.totalorder %v6264_v16, %v190_v28  ;;  %vm198_vm11 = vcmp.eq.s32.totalorder %v6264_v16, %v190_v28 }
 0x405   :  { %5464 = vmatmul.mubr.msk.bf16.vlgmr.msra.gmra.mxu1 %vm834_vm7, %v934_v40  ;;  %v1186_v6 = vsel %vm834_vm7, %v944_v41, 0  ;;  %v5927_v44 = vpop.eup %5926  ;;  %v928_v5 = vmul.f32 %v5925_v0, %v6457_v36  ;;  %v6582_v36 = vpop.f32.mrf.mxu0  ;;  %v6585_v38 = vsel %vm192_vm10, 1.0, %v6162_v61 }
 0x406   :  { %5474 = vmatpush3.bf16.xpose.msra.mxu1 %v1186_v6  ;;  %5475 = vmatprep.mubr.msk.bf16.mxu1 %vm6163_vm8, %v6162_v61  ;;  %v929_v9 = vmul.f32 %v5927_v44, %v6441_v22  ;;  %v191_v22 = vadd.s32 8, %v190_v28 }
 0x407   :  { %5485 = vmatprep.subr.bf16.mxu1 %v6162_v61  ;;  %v945_v7 = vpack.c.bf16 %v928_v5, %v927_v4 }
 0x408   :  { %v5929_v59 = vpop.eup %5928  ;;  %vm201_vm12 = vcmp.gt.s32.totalorder %v6264_v16, %v191_v22  ;;  %vm193_vm13 = vcmp.lt.s32.totalorder %v6264_v16, %v191_v22  ;;  %vm199_vm14 = vcmp.eq.s32.totalorder %v6264_v16, %v191_v22 }
 0x409   :  { %v930_v10 = vmul.f32 %v5929_v59, %v6451_v30  ;;  %v1233_v11 = vsel %vm834_vm7, %v945_v7, 0  ;;  %v202_v30 = vsel %vm200_vm9, -1e+09, %v6162_v61  ;;  %v203_v19 = vsel %vm201_vm12, -1e+09, %v6162_v61 }
 0x40a   :  { %5470 = vmatmul.mubr.msk.bf16.vlgmr.msra.gmra.mxu0 %vm834_vm7, %v935_v2  ;;  %v6588_v42 = vsel %vm198_vm11, -50000.0, %v202_v30  ;;  %v6596_v49 = vsel %vm193_vm13, 1.0, %v6162_v61  ;;  %v6602_v29 = vsel %vm199_vm14, -50000.0, %v203_v19 }
 0x40b   :  { %5480 = vmatpush3.bf16.xpose.msra.mxu0 %v1233_v11  ;;  %v946_v17 = vpack.c.bf16 %v930_v10, %v929_v9  ;;  %5481 = vmatprep.mubr.msk.bf16.mxu0 %vm6163_vm8, %v6162_v61 }
 0x40c   :  { %5491 = vmatprep.subr.bf16.mxu0 %v6162_v61 }
 0x40d   :  { %5476 = vmatmul.mubr.msk.bf16.vlgmr.msra.gmra.mxu1 %vm834_vm7, %v936_v14  ;;  %v1280_v12 = vsel %vm834_vm7, %v946_v17, 0 }
 0x40e   :  { %5486 = vmatpush3.bf16.xpose.msra.mxu1 %v1280_v12  ;;  %5487 = vmatprep.mubr.msk.bf16.mxu1 %vm6163_vm8, %v6162_v61 }
 0x40f   :  { %5497 = vmatprep.subr.bf16.mxu1 %v6162_v61 }
 0x412   :  { %5482 = vmatmul.mubr.msk.bf16.vlgmr.msra.gmra.mxu0 %vm834_vm7, %v937_v8 }
 0x413   :  { %5492 = vmatpush3.bf16.msra.mxu0 %v810_v15  ;;  %5493 = vmatprep.mubr.msk.bf16.mxu0 %vm6163_vm8, %v6162_v61 }
 0x414   :  { %5503 = vmatprep.subr.bf16.mxu0 %v6162_v61 }
 0x415   :  { %5488 = vmatmul.mubr.msk.bf16.vlgmr.msra.gmra.mxu1 %vm834_vm7, %v938_v20 }
 0x416   :  { %5498 = vmatpush3.bf16.msra.mxu1 %v811_v18  ;;  %5499 = vmatprep.mubr.msk.bf16.mxu1 %vm6163_vm8, %v6162_v61 }
 0x417   :  { %5509 = vmatprep.subr.bf16.mxu1 %v6162_v61 }
 0x4ba   :  { %v987_v13 = vpop.f32.mrf.mxu0 }
 0x4bb   :  { %v1323_v45 = vmul.f32 %v6585_v38, %v987_v13 }
 0x4bc   :  { %v5447_v21 = vpop.f32.mrf.mxu0 }
 0x4bd   :  { %v1034_v57 = vpop.f32.mrf.mxu1  ;;  %v6599_v23 = vadd.f32 %v1323_v45, %v6588_v42 }
 0x4be   :  { %v990_v25 = vpop.f32.mrf.mxu0  ;;  %v1325_v26 = vmul.f32 %v6585_v38, %v1034_v57 }
 0x4bf   :  { %v1324_v47 = vmul.f32 %v6596_v49, %v990_v25  ;;  %v1356_v16 = vsel %vm1355_vm15, %v6599_v23, -inf  ;;  %v5453_v52 = vpop.f32.mrf.mxu1 }
 0x4c0   :  { %v5448_v33 = vpop.f32.mrf.mxu0  ;;  %1357 = vmax.xlane.f32.xlu1 %v1356_v16  ;;  %v6608_v34 = vadd.f32 %v1325_v26, %v6588_v42 }
 0x4c1   :  { %v1037_v35 = vpop.f32.mrf.mxu1  ;;  %v6611_v37 = vadd.f32 %v1324_v47, %v6602_v29 }
 0x4c2   :  { %v1326_v39 = vmul.f32 %v6596_v49, %v1037_v35  ;;  %v1081_v40 = vpop.f32.mrf.mxu0  ;;  %v1362_v41 = vsel %vm1355_vm15, %v6608_v34, -inf }
 0x4c3   :  { %v1327_v0 = vmul.f32 %v6585_v38, %v1081_v40  ;;  %v1359_v6 = vsel %vm1355_vm15, %v6611_v37, -inf  ;;  %v5454_v44 = vpop.f32.mrf.mxu1 }
 0x4c4   :  { %v5459_v4 = vpop.f32.mrf.mxu0  ;;  %1360 = vmax.xlane.f32.xlu0 %v1359_v6  ;;  %1363 = vmax.xlane.f32.xlu1 %v1362_v41  ;;  %v6620_v5 = vadd.f32 %v1326_v39, %v6602_v29 }
 0x4c5   :  { %v1128_v59 = vpop.f32.mrf.mxu1  ;;  %v6623_v2 = vadd.f32 %v1327_v0, %v6588_v42 }
 0x4c6   :  { %v1084_v7 = vpop.f32.mrf.mxu0  ;;  %v1329_v9 = vmul.f32 %v6585_v38, %v1128_v59  ;;  %v1365_v10 = vsel %vm1355_vm15, %v6620_v5, -inf }
 0x4c7   :  { %v1328_v11 = vmul.f32 %v6596_v49, %v1084_v7  ;;  %v1368_v14 = vsel %vm1355_vm15, %v6623_v2, -inf  ;;  %v5465_v17 = vpop.f32.mrf.mxu1 }
 0x4c8   :  { %v5460_v12 = vpop.f32.mrf.mxu0  ;;  %1369 = vmax.xlane.f32.xlu1 %v1368_v14  ;;  %1366 = vmax.xlane.f32.xlu0 %v1365_v10  ;;  %v6632_v8 = vadd.f32 %v1329_v9, %v6588_v42 }
 0x4c9   :  { %v1131_v15 = vpop.f32.mrf.mxu1  ;;  %v6635_v20 = vadd.f32 %v1328_v11, %v6602_v29 }
 0x4ca   :  { %v1330_v18 = vmul.f32 %v6596_v49, %v1131_v15  ;;  %v1175_v28 = vpop.f32.mrf.mxu0  ;;  %v1374_v22 = vsel %vm1355_vm15, %v6632_v8, -inf }
 0x4cb   :  { %v1331_v30 = vmul.f32 %v6585_v38, %v1175_v28  ;;  %v1371_v13 = vsel %vm1355_vm15, %v6635_v20, -inf  ;;  %v5466_v45 = vpop.f32.mrf.mxu1 }
 0x4cc   :  { %v5471_v19 = vpop.f32.mrf.mxu0  ;;  %1372 = vmax.xlane.f32.xlu0 %v1371_v13  ;;  %1375 = vmax.xlane.f32.xlu1 %v1374_v22  ;;  %v6644_v21 = vadd.f32 %v1330_v18, %v6602_v29 }
 0x4cd   :  { %v1222_v57 = vpop.f32.mrf.mxu1  ;;  %v6647_v25 = vadd.f32 %v1331_v30, %v6588_v42 }
 0x4ce   :  { %v1178_v26 = vpop.f32.mrf.mxu0  ;;  %v1333_v47 = vmul.f32 %v6585_v38, %v1222_v57  ;;  %v1377_v16 = vsel %vm1355_vm15, %v6644_v21, -inf }
 0x4cf   :  { %v1332_v52 = vmul.f32 %v6596_v49, %v1178_v26  ;;  %v1380_v33 = vsel %vm1355_vm15, %v6647_v25, -inf  ;;  %v5477_v35 = vpop.f32.mrf.mxu1 }
 0x4d0   :  { %v5472_v39 = vpop.f32.mrf.mxu0  ;;  %1381 = vmax.xlane.f32.xlu1 %v1380_v33  ;;  %1378 = vmax.xlane.f32.xlu0 %v1377_v16  ;;  %v6656_v40 = vadd.f32 %v1333_v47, %v6588_v42 }
 0x4d1   :  { %v1225_v41 = vpop.f32.mrf.mxu1  ;;  %v6659_v0 = vadd.f32 %v1332_v52, %v6602_v29 }
 0x4d2   :  { %v1334_v6 = vmul.f32 %v6596_v49, %v1225_v41  ;;  %v1269_v44 = vpop.f32.mrf.mxu0  ;;  %v1386_v4 = vsel %vm1355_vm15, %v6656_v40, -inf }
 0x4d3   :  { %v1335_v59 = vmul.f32 %v6585_v38, %v1269_v44  ;;  %v1383_v7 = vsel %vm1355_vm15, %v6659_v0, -inf  ;;  %v5478_v9 = vpop.f32.mrf.mxu1 }
 0x4d4   :  { %v5483_v10 = vpop.f32.mrf.mxu0  ;;  %1384 = vmax.xlane.f32.xlu0 %v1383_v7  ;;  %1387 = vmax.xlane.f32.xlu1 %v1386_v4  ;;  %v6668_v11 = vadd.f32 %v1334_v6, %v6602_v29 }
 0x4d5   :  { %v1316_v14 = vpop.f32.mrf.mxu1  ;;  %v6671_v17 = vadd.f32 %v1335_v59, %v6588_v42 }
 0x4d6   :  { %v1272_v12 = vpop.f32.mrf.mxu0  ;;  %v1337_v15 = vmul.f32 %v6585_v38, %v1316_v14  ;;  %v1389_v18 = vsel %vm1355_vm15, %v6668_v11, -inf }
 0x4d7   :  { %v1336_v28 = vmul.f32 %v6596_v49, %v1272_v12  ;;  %v1392_v22 = vsel %vm1355_vm15, %v6671_v17, -inf  ;;  %v5489_v30 = vpop.f32.mrf.mxu1 }
 0x4d8   :  { %v5484_v13 = vpop.f32.mrf.mxu0  ;;  %1393 = vmax.xlane.f32.xlu1 %v1392_v22  ;;  %1390 = vmax.xlane.f32.xlu0 %v1389_v18  ;;  %v6680_v45 = vadd.f32 %v1337_v15, %v6588_v42 }
 0x4d9   :  { %v1319_v19 = vpop.f32.mrf.mxu1  ;;  %v6683_v57 = vadd.f32 %v1336_v28, %v6602_v29 }
 0x4da   :  { %v1338_v26 = vmul.f32 %v6596_v49, %v1319_v19  ;;  %v1398_v47 = vsel %vm1355_vm15, %v6680_v45, -inf }
 0x4db   :  { %v1395_v16 = vsel %vm1355_vm15, %v6683_v57, -inf  ;;  %v5490_v52 = vpop.f32.mrf.mxu1 }
 0x4dc   :  { %1396 = vmax.xlane.f32.xlu0 %v1395_v16  ;;  %1399 = vmax.xlane.f32.xlu1 %v1398_v47  ;;  %v6691_v33 = vadd.f32 %v1338_v26, %v6602_v29 }
 0x4de   :  { %v1401_v35 = vsel %vm1355_vm15, %v6691_v33, -inf }
 0x4e0   :  { %1402 = vmax.xlane.f32.xlu0 %v1401_v35 }
 0x549   :  { %v1358_v39 = vpop.xlane.xlu1 %1357 }
 0x54a   :  { %v1404_v41 = vsub.f32 %v6599_v23, %v1358_v39 }
 0x54c   :  { %v1420_v6 = vmul.f32 1.442695, %v1404_v41 }
 0x54d   :  { %v1361_v44 = vpop.xlane.xlu0 %1360  ;;  %v1364_v4 = vpop.xlane.xlu1 %1363 }
 0x54e   :  { %5930 = vpow2.f32 %v1420_v6  ;;  %v1405_v59 = vsub.f32 %v6611_v37, %v1361_v44  ;;  %v1406_v7 = vsub.f32 %v6608_v34, %v1364_v4 }
 0x550   :  { %v1422_v9 = vmul.f32 1.442695, %v1405_v59  ;;  %v1424_v10 = vmul.f32 1.442695, %v1406_v7 }
 0x551   :  { %v1370_v14 = vpop.xlane.xlu1 %1369  ;;  %v1367_v12 = vpop.xlane.xlu0 %1366 }
 0x552   :  { %5932 = vpow2.f32 %v1422_v9  ;;  %v1408_v15 = vsub.f32 %v6623_v2, %v1370_v14  ;;  %v1407_v18 = vsub.f32 %v6620_v5, %v1367_v12 }
 0x553   :  { %5934 = vpow2.f32 %v1424_v10 }
 0x554   :  { %v1428_v28 = vmul.f32 1.442695, %v1408_v15  ;;  %v1426_v23 = vmul.f32 1.442695, %v1407_v18 }
 0x555   :  { %v1373_v22 = vpop.xlane.xlu0 %1372  ;;  %v1376_v30 = vpop.xlane.xlu1 %1375 }
 0x556   :  { %5936 = vpow2.f32 %v1428_v28  ;;  %v1409_v13 = vsub.f32 %v6635_v20, %v1373_v22  ;;  %v1410_v37 = vsub.f32 %v6632_v8, %v1376_v30 }
 0x557   :  { %5938 = vpow2.f32 %v1426_v23 }
 0x558   :  { %v1430_v34 = vmul.f32 1.442695, %v1409_v13  ;;  %v1432_v19 = vmul.f32 1.442695, %v1410_v37 }
 0x559   :  { %v1382_v26 = vpop.xlane.xlu1 %1381  ;;  %v1379_v47 = vpop.xlane.xlu0 %1378 }
 0x55a   :  { %5940 = vpow2.f32 %v1430_v34  ;;  %v1412_v2 = vsub.f32 %v6647_v25, %v1382_v26  ;;  %v1411_v5 = vsub.f32 %v6644_v21, %v1379_v47 }
 0x55b   :  { %v6704_v16 = vpop.eup %5930  ;;  %5942 = vpow2.f32 %v1432_v19 }
 0x55c   :  { %v1436_v52 = vmul.f32 1.442695, %v1412_v2  ;;  %v1434_v35 = vmul.f32 1.442695, %v1411_v5  ;;  %v1452_v20 = vsel %vm1355_vm15, %v6704_v16, 0.0 }
 0x55d   :  { %v1385_v39 = vpop.xlane.xlu0 %1384  ;;  %v1388_v8 = vpop.xlane.xlu1 %1387  ;;  %1453 = vadd.xlane.f32.xlu1 %v1452_v20 }
 0x55e   :  { %5944 = vpow2.f32 %v1436_v52  ;;  %v1413_v41 = vsub.f32 %v6659_v0, %v1385_v39  ;;  %v1414_v6 = vsub.f32 %v6656_v40, %v1388_v8 }
 0x55f   :  { %v6710_v44 = vpop.eup %5932  ;;  %5946 = vpow2.f32 %v1434_v35 }
 0x560   :  { %v6712_v21 = vpop.eup %5934  ;;  %v1438_v25 = vmul.f32 1.442695, %v1413_v41  ;;  %v1440_v4 = vmul.f32 1.442695, %v1414_v6  ;;  %v1455_v59 = vsel %vm1355_vm15, %v6710_v44, 0.0 }
 0x561   :  { %v1394_v7 = vpop.xlane.xlu1 %1393  ;;  %v1391_v9 = vpop.xlane.xlu0 %1390  ;;  %v1458_v10 = vsel %vm1355_vm15, %v6712_v21, 0.0  ;;  %1456 = vadd.xlane.f32.xlu0 %v1455_v59 }
 0x562   :  { %5948 = vpow2.f32 %v1438_v25  ;;  %v1416_v0 = vsub.f32 %v6671_v17, %v1394_v7  ;;  %v1415_v40 = vsub.f32 %v6668_v11, %v1391_v9  ;;  %1459 = vadd.xlane.f32.xlu1 %v1458_v10 }
 0x563   :  { %v6720_v14 = vpop.eup %5936  ;;  %5950 = vpow2.f32 %v1440_v4 }
 0x564   :  { %v6722_v12 = vpop.eup %5938  ;;  %v1444_v15 = vmul.f32 1.442695, %v1416_v0  ;;  %v1442_v18 = vmul.f32 1.442695, %v1415_v40  ;;  %v1464_v28 = vsel %vm1355_vm15, %v6720_v14, 0.0 }
 0x565   :  { %v1397_v23 = vpop.xlane.xlu0 %1396  ;;  %v1400_v22 = vpop.xlane.xlu1 %1399  ;;  %v1461_v30 = vsel %vm1355_vm15, %v6722_v12, 0.0 }
 0x566   :  { %5952 = vpow2.f32 %v1444_v15  ;;  %v1417_v17 = vsub.f32 %v6683_v57, %v1397_v23  ;;  %1465 = vadd.xlane.f32.xlu1 %v1464_v28  ;;  %v1418_v11 = vsub.f32 %v6680_v45, %v1400_v22  ;;  %1462 = vadd.xlane.f32.xlu0 %v1461_v30 }
 0x567   :  { %v6730_v13 = vpop.eup %5940  ;;  %5954 = vpow2.f32 %v1442_v18 }
 0x568   :  { %v6732_v37 = vpop.eup %5942  ;;  %v1446_v34 = vmul.f32 1.442695, %v1417_v17  ;;  %v1448_v19 = vmul.f32 1.442695, %v1418_v11  ;;  %v1467_v26 = vsel %vm1355_vm15, %v6730_v13, 0.0 }
 0x569   :  { %v1470_v47 = vsel %vm1355_vm15, %v6732_v37, 0.0  ;;  %v1403_v2 = vpop.xlane.xlu0 %1402 }
 0x56a   :  { %5956 = vpow2.f32 %v1446_v34  ;;  %1471 = vadd.xlane.f32.xlu1 %v1470_v47  ;;  %1468 = vadd.xlane.f32.xlu0 %v1467_v26  ;;  %v1419_v45 = vsub.f32 %v6691_v33, %v1403_v2 }
 0x56b   :  { %v6739_v57 = vpop.eup %5944  ;;  %5958 = vpow2.f32 %v1448_v19 }
 0x56c   :  { %v6741_v5 = vpop.eup %5946  ;;  %v1450_v52 = vmul.f32 1.442695, %v1419_v45  ;;  %v1476_v35 = vsel %vm1355_vm15, %v6739_v57, 0.0 }
 0x56d   :  { %v1473_v20 = vsel %vm1355_vm15, %v6741_v5, 0.0 }
 0x56e   :  { %5960 = vpow2.f32 %v1450_v52  ;;  %1477 = vadd.xlane.f32.xlu1 %v1476_v35  ;;  %1474 = vadd.xlane.f32.xlu0 %v1473_v20 }
 0x56f   :  { %v6747_v39 = vpop.eup %5948 }
 0x570   :  { %v6749_v8 = vpop.eup %5950  ;;  %v1479_v33 = vsel %vm1355_vm15, %v6747_v39, 0.0 }
 0x571   :  { %v1482_v41 = vsel %vm1355_vm15, %v6749_v8, 0.0 }
 0x572   :  { %1483 = vadd.xlane.f32.xlu1 %v1482_v41  ;;  %1480 = vadd.xlane.f32.xlu0 %v1479_v33 }
 0x573   :  { %v6755_v6 = vpop.eup %5952 }
 0x574   :  { %v6757_v25 = vpop.eup %5954  ;;  %v1488_v4 = vsel %vm1355_vm15, %v6755_v6, 0.0 }
 0x575   :  { %v1485_v59 = vsel %vm1355_vm15, %v6757_v25, 0.0 }
 0x576   :  { %1489 = vadd.xlane.f32.xlu1 %v1488_v4  ;;  %1486 = vadd.xlane.f32.xlu0 %v1485_v59 }
 0x577   :  { %v6763_v7 = vpop.eup %5956 }
 0x578   :  { %v6765_v9 = vpop.eup %5958  ;;  %v1491_v10 = vsel %vm1355_vm15, %v6763_v7, 0.0 }
 0x579   :  { %v1494_v0 = vsel %vm1355_vm15, %v6765_v9, 0.0 }
 0x57a   :  { %1495 = vadd.xlane.f32.xlu1 %v1494_v0  ;;  %1492 = vadd.xlane.f32.xlu0 %v1491_v10 }
 0x57b   :  { %v6771_v40 = vpop.eup %5960 }
 0x57c   :  { %v1497_v15 = vsel %vm1355_vm15, %v6771_v40, 0.0 }
 0x57e   :  { %1498 = vadd.xlane.f32.xlu0 %v1497_v15 }
 0x5e6   :  { %v1454_v18 = vpop.xlane.xlu1 %1453 }
 0x5e7   :  { %5962 = vrcp.f32 %v1454_v18 }
 0x5ea   :  { %v1457_v28 = vpop.xlane.xlu0 %1456 }
 0x5eb   :  { %v1460_v23 = vpop.xlane.xlu1 %1459  ;;  %5964 = vrcp.f32 %v1457_v28 }
 0x5ec   :  { %5966 = vrcp.f32 %v1460_v23  ;;  %v814_v23 = vpack.c.bf16 %v6582_v36, %v6384_v50 }
 0x5ef   :  { %v1466_v22 = vpop.xlane.xlu1 %1465  ;;  %v1463_v30 = vpop.xlane.xlu0 %1462 }
 0x5f0   :  { %5968 = vrcp.f32 %v1463_v30 }
 0x5f1   :  { %5970 = vrcp.f32 %v1466_v22 }
 0x5f3   :  { %v1472_v17 = vpop.xlane.xlu1 %1471  ;;  %v1469_v11 = vpop.xlane.xlu0 %1468 }
 0x5f4   :  { %5972 = vrcp.f32 %v1469_v11  ;;  %v5963_v34 = vpop.eup %5962 }
 0x5f5   :  { %5974 = vrcp.f32 %v1472_v17  ;;  %v1516_v2 = vmul.f32 %v5963_v34, %v6704_v16  ;;  %v816_v17 = vpack.c.bf16 %v6590_v43, %v6492_v63 }
 0x5f7   :  { %v1478_v19 = vpop.xlane.xlu1 %1477  ;;  %v1475_v26 = vpop.xlane.xlu0 %1474 }
 0x5f8   :  { %v5965_v47 = vpop.eup %5964  ;;  %5976 = vrcp.f32 %v1475_v26 }
 0x5f9   :  { %v1517_v45 = vmul.f32 %v5965_v47, %v6710_v44  ;;  %5978 = vrcp.f32 %v1478_v19  ;;  %v5967_v33 = vpop.eup %5966 }
 0x5fa   :  { %v1518_v44 = vmul.f32 %v5967_v33, %v6712_v21 }
 0x5fb   :  { %v1484_v52 = vpop.xlane.xlu1 %1483  ;;  %v1481_v35 = vpop.xlane.xlu0 %1480  ;;  %v1532_v20 = vpack.c.bf16 %v1517_v45, %v1516_v2 }
 0x5fc   :  { %5980 = vrcp.f32 %v1481_v35 }
 0x5fd   :  { %5494 = vmatmul.mubr.msk.bf16.vlgmr.msra.gmra.mxu0 %vm1355_vm15, %v1532_v20  ;;  %v5969_v41 = vpop.eup %5968  ;;  %5982 = vrcp.f32 %v1484_v52 }
 0x5fe   :  { %5504 = vmatpush3.bf16.msra.mxu0 %v812_v60  ;;  %5505 = vmatprep.mubr.msk.bf16.mxu0 %vm6163_vm8, %v6162_v61  ;;  %v1519_v59 = vmul.f32 %v5969_v41, %v6722_v12  ;;  %v5971_v10 = vpop.eup %5970 }
 0x5ff   :  { %v1490_v16 = vpop.xlane.xlu1 %1489  ;;  %v1487_v4 = vpop.xlane.xlu0 %1486  ;;  %5515 = vmatprep.subr.bf16.mxu0 %v6162_v61  ;;  %v1520_v60 = vmul.f32 %v5971_v10, %v6720_v14 }
 0x600   :  { %5984 = vrcp.f32 %v1487_v4  ;;  %v1533_v0 = vpack.c.bf16 %v1519_v59, %v1518_v44 }
 0x601   :  { %v5973_v15 = vpop.eup %5972  ;;  %5986 = vrcp.f32 %v1490_v16 }
 0x602   :  { %5500 = vmatmul.mubr.msk.bf16.vlgmr.msra.gmra.mxu1 %vm1355_vm15, %v1533_v0  ;;  %v1521_v18 = vmul.f32 %v5973_v15, %v6730_v13  ;;  %v5975_v28 = vpop.eup %5974 }
 0x603   :  { %v1496_v51 = vpop.xlane.xlu1 %1495  ;;  %v1493_v58 = vpop.xlane.xlu0 %1492  ;;  %5510 = vmatpush3.bf16.msra.mxu1 %v813_v56  ;;  %5511 = vmatprep.mubr.msk.bf16.mxu1 %vm6163_vm8, %v6162_v61  ;;  %v1522_v13 = vmul.f32 %v5975_v28, %v6732_v37 }
 0x604   :  { %5988 = vrcp.f32 %v1493_v58  ;;  %v1534_v21 = vpack.c.bf16 %v1521_v18, %v1520_v60  ;;  %5521 = vmatprep.subr.bf16.mxu1 %v6162_v61 }
 0x605   :  { %v5977_v12 = vpop.eup %5976  ;;  %5990 = vrcp.f32 %v1496_v51 }
 0x606   :  { %5506 = vmatmul.mubr.msk.bf16.vlgmr.msra.gmra.mxu0 %vm1355_vm15, %v1534_v21  ;;  %v1523_v46 = vmul.f32 %v5977_v12, %v6741_v5  ;;  %v5979_v55 = vpop.eup %5978 }
 0x607   :  { %v1499_v14 = vpop.xlane.xlu0 %1498  ;;  %5516 = vmatpush3.bf16.msra.mxu0 %v814_v23  ;;  %5517 = vmatprep.mubr.msk.bf16.mxu0 %vm6163_vm8, %v6162_v61  ;;  %v1524_v50 = vmul.f32 %v5979_v55, %v6739_v57 }
 0x608   :  { %5992 = vrcp.f32 %v1499_v14  ;;  %v1535_v56 = vpack.c.bf16 %v1523_v46, %v1522_v13  ;;  %5527 = vmatprep.subr.bf16.mxu0 %v6162_v61 }
 0x609   :  { %v5981_v22 = vpop.eup %5980 }
 0x60a   :  { %5512 = vmatmul.mubr.msk.bf16.vlgmr.msra.gmra.mxu1 %vm1355_vm15, %v1535_v56  ;;  %v1525_v36 = vmul.f32 %v5981_v22, %v6747_v39  ;;  %v5983_v30 = vpop.eup %5982 }
 0x60b   :  { %5522 = vmatpush3.bf16.msra.mxu1 %v815_v54  ;;  %5523 = vmatprep.mubr.msk.bf16.mxu1 %vm6163_vm8, %v6162_v61  ;;  %v1526_v57 = vmul.f32 %v5983_v30, %v6749_v8 }
 0x60c   :  { %v1536_v37 = vpack.c.bf16 %v1525_v36, %v1524_v50  ;;  %5533 = vmatprep.subr.bf16.mxu1 %v6162_v61 }
 0x60d   :  { %v5985_v5 = vpop.eup %5984 }
 0x60e   :  { %5518 = vmatmul.mubr.msk.bf16.vlgmr.msra.gmra.mxu0 %vm1355_vm15, %v1536_v37  ;;  %v1527_v39 = vmul.f32 %v5985_v5, %v6757_v25  ;;  %v5987_v11 = vpop.eup %5986 }
 0x60f   :  { %5528 = vmatpush3.bf16.msra.mxu0 %v816_v17  ;;  %5529 = vmatprep.mubr.msk.bf16.mxu0 %vm6163_vm8, %v6162_v61  ;;  %v1528_v34 = vmul.f32 %v5987_v11, %v6755_v6  ;;  %v238_v6 = vld [vmem:[%s7646_s7] sm:$0xf] }
 0x610   :  { %v1537_v48 = vpack.c.bf16 %v1527_v39, %v1526_v57  ;;  %5811 = vmatprep.subr.msk.bf16.mxu0 %vm1906_vm0, %v238_v6  ;;  %v1908_v62 = vsel %vm1906_vm0, %v238_v6, 0 }
 0x611   :  { %v5989_v53 = vpop.eup %5988 }
 0x612   :  { %v5991_v54 = vpop.eup %5990  ;;  %5524 = vmatmul.mubr.msk.bf16.vlgmr.msra.gmra.mxu1 %vm1355_vm15, %v1537_v48  ;;  %v1529_v63 = vmul.f32 %v5989_v53, %v6763_v7  ;;  %v240_v7 = vld [vmem:[%s7646_s7 + $0x8] sm:$0xf] }
 0x613   :  { %5534 = vmatpush3.bf16.msra.mxu1 %v817_v3  ;;  %5535 = vmatprep.mubr.msk.bf16.mxu1 %vm6163_vm8, %v6162_v61  ;;  %v1530_v25 = vmul.f32 %v5991_v54, %v6765_v9  ;;  %v1966_v3 = vsel %vm1906_vm0, %v239_v1, 0  ;;  %v241_v9 = vld [vmem:[%s7646_s7 + $0xc] sm:$0xf]  ;;  %v2024_v4 = vsel %vm1906_vm0, %v240_v7, 0 }
 0x614   :  { %v1538_v8 = vpack.c.bf16 %v1529_v63, %v1528_v34  ;;  %5812 = vmatprep.subr.msk.bf16.mxu1 %vm1906_vm0, %v239_v1  ;;  %v2082_v21 = vsel %vm1906_vm0, %v241_v9, 0 }
 0x615   :  { %v5993_v43 = vpop.eup %5992 }
 0x616   :  { %v1531_v19 = vmul.f32 %v5993_v43, %v6771_v40  ;;  %5530 = vmatmul.mubr.msk.bf16.vlgmr.msra.gmra.mxu0 %vm1355_vm15, %v1538_v8 }
 0x617   :  { %5540 = vmatpush3.bf16.msra.mxu0 %v1908_v62 }
 0x618   :  { %v1539_v26 = vpack.c.bf16 %v1531_v19, %v1530_v25  ;;  %5813 = vmatprep.subr.msk.bf16.mxu0 %vm1906_vm0, %v240_v7 }
 0x61a   :  { %5536 = vmatmul.mubr.msk.bf16.vlgmr.msra.gmra.mxu1 %vm1355_vm15, %v1539_v26 }
 0x61b   :  { %5546 = vmatpush3.bf16.msra.mxu1 %v1966_v3 }
 0x61c   :  { %5814 = vmatprep.subr.msk.bf16.mxu1 %vm1906_vm0, %v241_v9 }
 0x6bd   :  { %v1577_v40 = vpop.f32.mrf.mxu0 }
 0x6bf   :  { %v5495_v47 = vpop.f32.mrf.mxu0 }
 0x6c1   :  { %v1580_v2 = vpop.f32.mrf.mxu0 }
 0x6c2   :  { %v1892_v45 = vpack.c.bf16 %v1580_v2, %v1577_v40  ;;  %v1621_v52 = vpop.f32.mrf.mxu1 }
 0x6c3   :  { %v5496_v35 = vpop.f32.mrf.mxu0 }
 0x6c4   :  { %5541 = vmatprep.mubr.msk.bf16.mxu0 %vm834_vm7, %v1892_v45  ;;  %v5501_v20 = vpop.f32.mrf.mxu1 }
 0x6c6   :  { %v1624_v33 = vpop.f32.mrf.mxu1  ;;  %v1665_v41 = vpop.f32.mrf.mxu0 }
 0x6c7   :  { %v1893_v16 = vpack.c.bf16 %v1624_v33, %v1621_v52 }
 0x6c8   :  { %v5502_v44 = vpop.f32.mrf.mxu1  ;;  %v5507_v59 = vpop.f32.mrf.mxu0 }
 0x6c9   :  { %5542 = vmatmul.mubr.msk.bf16.vlgmr.msra.gmra.mxu0 %vm834_vm7, %v1893_v16 }
 0x6ca   :  { %v1668_v10 = vpop.f32.mrf.mxu0  ;;  %v1709_v0 = vpop.f32.mrf.mxu1  ;;  %5552 = vmatpush3.bf16.msra.mxu0 %v2024_v4 }
 0x6cb   :  { %v1894_v15 = vpack.c.bf16 %v1668_v10, %v1665_v41 }
 0x6cc   :  { %v5508_v51 = vpop.f32.mrf.mxu0  ;;  %v5513_v58 = vpop.f32.mrf.mxu1 }
 0x6cd   :  { %5547 = vmatprep.mubr.msk.bf16.mxu1 %vm834_vm7, %v1894_v15 }
 0x6ce   :  { %v1712_v60 = vpop.f32.mrf.mxu1  ;;  %v1753_v18 = vpop.f32.mrf.mxu0 }
 0x6cf   :  { %v1895_v28 = vpack.c.bf16 %v1712_v60, %v1709_v0 }
 0x6d0   :  { %v5514_v12 = vpop.f32.mrf.mxu1  ;;  %v5519_v23 = vpop.f32.mrf.mxu0 }
 0x6d1   :  { %5548 = vmatmul.mubr.msk.bf16.vlgmr.msra.gmra.mxu1 %vm834_vm7, %v1895_v28  ;;  %v5010_v28 = vld [vmem:[%s7642_s3 + $0x2] ss:$0 sm:$0xff] }
 0x6d2   :  { %v1756_v14 = vpop.f32.mrf.mxu0  ;;  %v1797_v13 = vpop.f32.mrf.mxu1  ;;  %5558 = vmatpush3.bf16.msra.mxu1 %v2082_v21 }
 0x6d3   :  { %v1896_v46 = vpack.c.bf16 %v1756_v14, %v1753_v18 }
 0x6d4   :  { %v5520_v55 = vpop.f32.mrf.mxu0  ;;  %v5525_v56 = vpop.f32.mrf.mxu1 }
 0x6d5   :  { %5553 = vmatprep.mubr.msk.bf16.mxu0 %vm834_vm7, %v1896_v46 }
 0x6d6   :  { %v1800_v22 = vpop.f32.mrf.mxu1  ;;  %v1841_v50 = vpop.f32.mrf.mxu0 }
 0x6d7   :  { %v1897_v36 = vpack.c.bf16 %v1800_v22, %v1797_v13 }
 0x6d8   :  { %v5526_v30 = vpop.f32.mrf.mxu1  ;;  %v5531_v37 = vpop.f32.mrf.mxu0 }
 0x6d9   :  { %5554 = vmatmul.mubr.msk.bf16.vlgmr.msra.gmra.mxu0 %vm834_vm7, %v1897_v36 }
 0x6da   :  { %v1844_v5 = vpop.f32.mrf.mxu0  ;;  %v1885_v17 = vpop.f32.mrf.mxu1 }
 0x6db   :  { %v1898_v57 = vpack.c.bf16 %v1844_v5, %v1841_v50 }
 0x6dc   :  { %v5532_v39 = vpop.f32.mrf.mxu0  ;;  %v5537_v11 = vpop.f32.mrf.mxu1 }
 0x6dd   :  { %5559 = vmatprep.mubr.msk.bf16.mxu1 %vm834_vm7, %v1898_v57 }
 0x6de   :  { %v1888_v48 = vpop.f32.mrf.mxu1 }
 0x6df   :  { %v1899_v53 = vpack.c.bf16 %v1888_v48, %v1885_v17 }
 0x6e0   :  { %v5538_v54 = vpop.f32.mrf.mxu1 }
 0x6e1   :  { %5560 = vmatmul.mubr.msk.bf16.vlgmr.msra.gmra.mxu1 %vm834_vm7, %v1899_v53 }
 0x789   :  { %v5543_v34 = vpop.f32.mrf.mxu0 }
 0x78a   :  { %v2147_v7 = vsel %vm244_vm6, %v5543_v34, 0.0 }
 0x78b   :  { %v1944_v63 = vpop.f32.mrf.mxu0 }
 0x78c   :  { %v2133_v45 = vsel %vm244_vm6, %v1944_v63, 0.0 }
 0x78d   :  { %v5544_v43 = vpop.f32.mrf.mxu0 }
 0x78e   :  { %v2154_v4 = vsel %vm244_vm6, %v5544_v43, 0.0 }
 0x78f   :  { %v1947_v25 = vpop.f32.mrf.mxu0 }
 0x790   :  { %v2140_v60 = vsel %vm244_vm6, %v1947_v25, 0.0 }
 0x791   :  { %v5549_v8 = vpop.f32.mrf.mxu1 }
 0x792   :  { %v2148_v1 = vsel %vm244_vm6, %v5549_v8, 0.0 }
 0x793   :  { %v2002_v19 = vpop.f32.mrf.mxu1  ;;  %v2149_v47 = vadd.f32 %v2148_v1, %v2147_v7 }
 0x794   :  { %v2134_v9 = vsel %vm244_vm6, %v2002_v19, 0.0 }
 0x795   :  { %v5550_v6 = vpop.f32.mrf.mxu1  ;;  %v2135_v20 = vadd.f32 %v2134_v9, %v2133_v45 }
 0x796   :  { %v2155_v52 = vsel %vm244_vm6, %v5550_v6, 0.0 }
 0x797   :  { %v2005_v2 = vpop.f32.mrf.mxu1  ;;  %v2156_v0 = vadd.f32 %v2155_v52, %v2154_v4  ;;  %v5853_v4 = vld [vmem:[%s7647_s8] sm:$0xff]  }
 0x798   :  { %v2141_v44 = vsel %vm244_vm6, %v2005_v2, 0.0 }
 0x799   :  { %v5555_v26 = vpop.f32.mrf.mxu0  ;;  %v2142_v12 = vadd.f32 %v2141_v44, %v2140_v60 }
 0x79a   :  { %v2150_v40 = vsel %vm244_vm6, %v5555_v26, 0.0 }
 0x79b   :  { %v2060_v62 = vpop.f32.mrf.mxu0  ;;  %v2151_v33 = vadd.f32 %v2150_v40, %v2149_v47 }
 0x79c   :  { %v2136_v35 = vsel %vm244_vm6, %v2060_v62, 0.0 }
 0x79d   :  { %v5556_v3 = vpop.f32.mrf.mxu0  ;;  %v2137_v15 = vadd.f32 %v2136_v35, %v2135_v20 }
 0x79e   :  { %v2157_v59 = vsel %vm244_vm6, %v5556_v3, 0.0 }
 0x79f   :  { %v2063_v41 = vpop.f32.mrf.mxu0  ;;  %v2158_v23 = vadd.f32 %v2157_v59, %v2156_v0 }
 0x7a0   :  { %v2143_v18 = vsel %vm244_vm6, %v2063_v41, 0.0 }
 0x7a1   :  { %v5561_v16 = vpop.f32.mrf.mxu1  ;;  %v2144_v55 = vadd.f32 %v2143_v18, %v2142_v12 }
 0x7a2   :  { %v2152_v10 = vsel %vm244_vm6, %v5561_v16, 0.0  ;;  %v5852_v16 = vld [vmem:[%s7647_s8 + $0x8] sm:$0xff]  }
 0x7a3   :  { %v2153_v51 = vadd.f32 %v2152_v10, %v2151_v33  ;;  %v2118_v58 = vpop.f32.mrf.mxu1  ;;  %5563 = vmatprep.subr.bf16.mxu0 %v5852_v16 }
 0x7a4   :  { %v2138_v21 = vsel %vm244_vm6, %v2118_v58, 0.0  ;;  %5564 = vmatpush3.bf16.msra.mxu0 %v5852_v16 }
 0x7a5   :  { %v2139_v14 = vadd.f32 %v2138_v21, %v2137_v15  ;;  %v5562_v13 = vpop.f32.mrf.mxu1  ;;  %v2168_v56 = vadd.f32 %v5010_v28, %v2153_v51  ;;  %5565 = vmatprep.subr.bf16.mxu0 %v5853_v4 }
 0x7a6   :  { %v2159_v46 = vsel %vm244_vm6, %v5562_v13, 0.0  ;;  %v5011_v13 = vld [vmem:[%s7642_s3 + $0x3] ss:$0 sm:$0xff] }
 0x7a7   :  { %v2166_v22 = vadd.f32 %v5010_v28, %v2139_v14  ;;  %v2160_v50 = vadd.f32 %v2159_v46, %v2158_v23  ;;  %v2121_v36 = vpop.f32.mrf.mxu1  ;;  %v6884_v11 = vadd.f32 %v2168_v56, %v6281_v27 }
 0x7a8   :  { %v2145_v30 = vsel %vm244_vm6, %v2121_v36, 0.0  ;;  %5566 = vmatpush3.bf16.msra.mxu0 %v5853_v4  ;;  %v5012_v36 = vld [vmem:[%s7642_s3 + $0x4] ss:$0 sm:$0xff] }
 0x7a9   :  { %v2146_v37 = vadd.f32 %v2145_v30, %v2144_v55  ;;  %v6879_v5 = vadd.f32 %v2166_v22, %v6276_v24  ;;  %v2169_v17 = vadd.f32 %v5010_v28, %v2160_v50  ;;  %v2182_v53 = vsel %vm244_vm6, %v6884_v11, 0.0 }
 0x7ab   :  { %v2167_v57 = vadd.f32 %v5010_v28, %v2146_v37  ;;  %v2176_v39 = vsel %vm244_vm6, %v6879_v5, 0.0  ;;  %v6894_v34 = vadd.f32 %v2169_v17, %v6290_v32 }
 0x7ac   :  { %2177 = vadd.xlane.f32.xlu1 %v2176_v39 }
 0x7ad   :  { %v6887_v48 = vadd.f32 %v2167_v57, %v6288_v31  ;;  %v2185_v63 = vsel %vm244_vm6, %v6894_v34, 0.0 }
 0x7af   :  { %v2179_v54 = vsel %vm244_vm6, %v6887_v48, 0.0 }
 0x7b0   :  { %2183 = vadd.xlane.f32.xlu1 %v2182_v53  ;;  %2180 = vadd.xlane.f32.xlu0 %v2179_v54 }
 0x7b4   :  { %2186 = vadd.xlane.f32.xlu0 %v2185_v63 }
 0x835   :  { %v2178_v43 = vpop.xlane.xlu1 %2177 }
 0x836   :  { %v2188_v8 = vmul.f32 0.03125, %v2178_v43 }
 0x838   :  { %v2192_v25 = vsub.f32 %v6879_v5, %v2188_v8 }
 0x839   :  { %v2184_v19 = vpop.xlane.xlu1 %2183  ;;  %v2181_v26 = vpop.xlane.xlu0 %2180 }
 0x83a   :  { %v2190_v6 = vmul.f32 0.03125, %v2184_v19  ;;  %v2189_v62 = vmul.f32 0.03125, %v2181_v26  ;;  %v2196_v1 = vmul.f32 %v2192_v25, %v2192_v25  ;;  %v5854_v19 = vld [vmem:[%s7648_s9 + $0x38] sm:$0xff]   ;;  %v5855_v26 = vld [vmem:[%s7648_s9 + $0x30] sm:$0xff]  }
 0x83b   :  { %5571 = vmatprep.subr.bf16.mxu1 %v5854_v19 }
 0x83c   :  { %v2194_v3 = vsub.f32 %v6884_v11, %v2190_v6  ;;  %v2193_v7 = vsub.f32 %v6887_v48, %v2189_v62  ;;  %v2200_v9 = vsel %vm244_vm6, %v2196_v1, 0.0  ;;  %5572 = vmatpush3.bf16.msra.mxu1 %v5854_v19  ;;  %v5856_v6 = vld [vmem:[%s7648_s9 + $0x28] sm:$0xff]   ;;  %v5857_v62 = vld [vmem:[%s7648_s9 + $0x20] sm:$0xff]   ;;  %v5858_v1 = vld [vmem:[%s7648_s9 + $0x18] sm:$0xff]  }
 0x83d   :  { %2201 = vadd.xlane.f32.xlu1 %v2200_v9  ;;  %v2187_v40 = vpop.xlane.xlu0 %2186  ;;  %5573 = vmatprep.subr.bf16.mxu1 %v5855_v26  ;;  %v5861_v9 = vld [vmem:[%s7648_s9] sm:$0xff]  }
 0x83e   :  { %v2191_v47 = vmul.f32 0.03125, %v2187_v40  ;;  %v2198_v2 = vmul.f32 %v2194_v3, %v2194_v3  ;;  %v2197_v45 = vmul.f32 %v2193_v7, %v2193_v7  ;;  %v5013_v40 = vld [vmem:[%s7643_s4] ss:$0 sm:$0xff] }
 0x840   :  { %v2195_v52 = vsub.f32 %v6894_v34, %v2191_v47  ;;  %v2206_v35 = vsel %vm244_vm6, %v2198_v2, 0.0  ;;  %v2203_v20 = vsel %vm244_vm6, %v2197_v45, 0.0  ;;  %5574 = vmatpush3.bf16.msra.mxu1 %v5855_v26 }
 0x841   :  { %2207 = vadd.xlane.f32.xlu1 %v2206_v35  ;;  %2204 = vadd.xlane.f32.xlu0 %v2203_v20 }
 0x842   :  { %v2199_v33 = vmul.f32 %v2195_v52, %v2195_v52  ;;  %5575 = vmatprep.subr.bf16.mxu1 %v5856_v6 }
 0x844   :  { %v2209_v41 = vsel %vm244_vm6, %v2199_v33, 0.0  ;;  %5576 = vmatpush3.bf16.msra.mxu1 %v5856_v6 }
 0x845   :  { %2210 = vadd.xlane.f32.xlu0 %v2209_v41  ;;  %5577 = vmatprep.subr.bf16.mxu1 %v5857_v62 }
 0x848   :  { %5578 = vmatpush3.bf16.msra.mxu1 %v5857_v62 }
 0x849   :  { %5579 = vmatprep.subr.bf16.mxu1 %v5858_v1 }
 0x84c   :  { %5580 = vmatpush3.bf16.msra.mxu1 %v5858_v1 }
 0x8c6   :  { %v2202_v44 = vpop.xlane.xlu1 %2201 }
 0x8c7   :  { %v2212_v59 = vmul.f32 0.03125, %v2202_v44 }
 0x8c9   :  { %v2216_v10 = vadd.f32 1e-05, %v2212_v59 }
 0x8ca   :  { %v2208_v0 = vpop.xlane.xlu1 %2207  ;;  %v2205_v15 = vpop.xlane.xlu0 %2204 }
 0x8cb   :  { %5994 = vrsqrt.f32 %v2216_v10  ;;  %v2214_v51 = vmul.f32 0.03125, %v2208_v0  ;;  %v2213_v58 = vmul.f32 0.03125, %v2205_v15 }
 0x8cd   :  { %v2218_v60 = vadd.f32 1e-05, %v2214_v51  ;;  %v2217_v18 = vadd.f32 1e-05, %v2213_v58 }
 0x8ce   :  { %v2211_v28 = vpop.xlane.xlu0 %2210 }
 0x8cf   :  { %5996 = vrsqrt.f32 %v2218_v60  ;;  %v2215_v21 = vmul.f32 0.03125, %v2211_v28 }
 0x8d0   :  { %5998 = vrsqrt.f32 %v2217_v18 }
 0x8d1   :  { %v2219_v12 = vadd.f32 1e-05, %v2215_v21 }
 0x8d3   :  { %6000 = vrsqrt.f32 %v2219_v12 }
 0x8d8   :  { %v5995_v23 = vpop.eup %5994 }
 0x8d9   :  { %v2224_v14 = vmul.f32 %v5995_v23, %v2192_v25 }
 0x8db   :  { %v2232_v50 = vmul.f32 %v5011_v13, %v2224_v14 }
 0x8dc   :  { %v5997_v46 = vpop.eup %5996 }
 0x8dd   :  { %v5999_v55 = vpop.eup %5998  ;;  %v2226_v56 = vmul.f32 %v5997_v46, %v2194_v3  ;;  %v2240_v39 = vadd.f32 %v5012_v36, %v2232_v50  ;;  %v5859_v3 = vld [vmem:[%s7648_s9 + $0x10] sm:$0xff]  }
 0x8de   :  { %v2225_v22 = vmul.f32 %v5999_v55, %v2193_v7  ;;  %5581 = vmatprep.subr.bf16.mxu1 %v5859_v3  ;;  %v5860_v7 = vld [vmem:[%s7648_s9 + $0x8] sm:$0xff]  }
 0x8df   :  { %v2234_v57 = vmul.f32 %v5011_v13, %v2226_v56  ;;  %5582 = vmatpush3.bf16.msra.mxu1 %v5859_v3  ;;  %v5018_v3 = vld [vmem:[%s7642_s3 + $0x5] ss:$0 sm:$0xff] }
 0x8e0   :  { %v6001_v30 = vpop.eup %6000  ;;  %v2233_v37 = vmul.f32 %v5011_v13, %v2225_v22  ;;  %5583 = vmatprep.subr.bf16.mxu1 %v5860_v7 }
 0x8e1   :  { %v2227_v17 = vmul.f32 %v6001_v30, %v2195_v52  ;;  %v2242_v43 = vadd.f32 %v5012_v36, %v2234_v57 }
 0x8e2   :  { %v2241_v53 = vadd.f32 %v5012_v36, %v2233_v37 }
 0x8e3   :  { %v2235_v54 = vmul.f32 %v5011_v13, %v2227_v17  ;;  %5584 = vmatpush3.bf16.msra.mxu1 %v5860_v7 }
 0x8e4   :  { %v2244_v63 = vpack.c.bf16 %v2241_v53, %v2240_v39  ;;  %5585 = vmatprep.subr.bf16.mxu1 %v5861_v9 }
 0x8e5   :  { %v2243_v8 = vadd.f32 %v5012_v36, %v2235_v54 }
 0x8e6   :  { %5567 = vmatprep.mubr.msk.bf16.mxu0 %vm244_vm6, %v2244_v63 }
 0x8e7   :  { %v2245_v25 = vpack.c.bf16 %v2243_v8, %v2242_v43  ;;  %5586 = vmatpush3.bf16.msra.mxu1 %v5861_v9 }
 0x8e9   :  { %5568 = vmatmul.mubr.msk.bf16.vlgmr.msra.gmra.mxu0 %vm244_vm6, %v2245_v25 }
 0x9a9   :  { %v5569_v47 = vpop.f32.mrf.mxu0 }
 0x9aa   :  { %v2316_v2 = vadd.f32 %v5569_v47, %v5013_v40 }
 0x9ab   :  { %v2307_v45 = vpop.f32.mrf.mxu0 }
 0x9ac   :  { %v2324_v52 = vmul.f32 %v2316_v2, %v2316_v2  ;;  %v2308_v35 = vadd.f32 %v5013_v40, %v2307_v45 }
 0x9ad   :  { %v5570_v20 = vpop.f32.mrf.mxu0 }
 0x9ae   :  { %v2328_v33 = vmul.f32 %v2324_v52, %v2316_v2  ;;  %v2322_v41 = vmul.f32 %v2308_v35, %v2308_v35  ;;  %v2319_v16 = vadd.f32 %v5570_v20, %v5013_v40 }
 0x9af   :  { %v2310_v4 = vpop.f32.mrf.mxu0 }
 0x9b0   :  { %v2332_v44 = vmul.f32 0.044715, %v2328_v33  ;;  %v2326_v59 = vmul.f32 %v2322_v41, %v2308_v35  ;;  %v2325_v10 = vmul.f32 %v2319_v16, %v2319_v16  ;;  %v2311_v0 = vadd.f32 %v5013_v40, %v2310_v4 }
 0x9b2   :  { %v2336_v15 = vadd.f32 %v2332_v44, %v2316_v2  ;;  %v2330_v51 = vmul.f32 0.044715, %v2326_v59  ;;  %v2329_v58 = vmul.f32 %v2325_v10, %v2319_v16  ;;  %v2323_v60 = vmul.f32 %v2311_v0, %v2311_v0 }
 0x9b4   :  { %v2340_v18 = vmul.f32 0.7978846, %v2336_v15  ;;  %v2334_v28 = vadd.f32 %v2330_v51, %v2308_v35  ;;  %v2333_v21 = vmul.f32 0.044715, %v2329_v58  ;;  %v2327_v12 = vmul.f32 %v2323_v60, %v2311_v0 }
 0x9b6   :  { %v2338_v23 = vmul.f32 0.7978846, %v2334_v28  ;;  %v2337_v14 = vadd.f32 %v2333_v21, %v2319_v16  ;;  %v2331_v13 = vmul.f32 0.044715, %v2327_v12  ;;  %6002 = vtanh.f32 %v2340_v18 }
 0x9b8   :  { %6004 = vtanh.f32 %v2338_v23  ;;  %v2341_v46 = vmul.f32 0.7978846, %v2337_v14  ;;  %v2335_v55 = vadd.f32 %v2331_v13, %v2311_v0 }
 0x9ba   :  { %6006 = vtanh.f32 %v2341_v46  ;;  %v2339_v56 = vmul.f32 0.7978846, %v2335_v55 }
 0x9bc   :  { %6008 = vtanh.f32 %v2339_v56 }
 0x9c3   :  { %v6003_v22 = vpop.eup %6002 }
 0x9c4   :  { %v2348_v37 = vadd.f32 1.0, %v6003_v22  ;;  %v5862_v22 = vld [vmem:[%s7644_s5 + $0x48] sm:$0xff]  }
 0x9c5   :  { %v6005_v50 = vpop.eup %6004  ;;  %5591 = vmatprep.subr.bf16.mxu0 %v5862_v22 }
 0x9c6   :  { %v2346_v36 = vadd.f32 1.0, %v6005_v50  ;;  %v2352_v63 = vmul.f32 0.5, %v2348_v37  ;;  %v5863_v50 = vld [vmem:[%s7645_s6 + $0x48] sm:$0xff]   ;;  %5592 = vmatpush3.bf16.msra.mxu0 %v5862_v22  ;;  %v5866_v37 = vld [vmem:[%s7644_s5 + $0x58] sm:$0xff]  }
 0x9c7   :  { %v6007_v30 = vpop.eup %6006  ;;  %5623 = vmatprep.subr.bf16.mxu1 %v5863_v50 }
 0x9c8   :  { %v2349_v17 = vadd.f32 1.0, %v6007_v30  ;;  %v2350_v54 = vmul.f32 0.5, %v2346_v36  ;;  %v2356_v26 = vmul.f32 %v2352_v63, %v2316_v2  ;;  %v5864_v36 = vld [vmem:[%s7644_s5 + $0x40] sm:$0xff]  }
 0x9c9   :  { %v6009_v57 = vpop.eup %6008  ;;  %v5865_v30 = vld [vmem:[%s7645_s6 + $0x40] sm:$0xff]   ;;  %5593 = vmatprep.subr.bf16.mxu0 %v5864_v36 }
 0x9ca   :  { %v2353_v39 = vmul.f32 0.5, %v2349_v17  ;;  %v2347_v53 = vadd.f32 1.0, %v6009_v57  ;;  %v2354_v25 = vmul.f32 %v2350_v54, %v2308_v35  ;;  %5594 = vmatpush3.bf16.msra.mxu0 %v5864_v36  ;;  %v5867_v17 = vld [vmem:[%s7645_s6 + $0x68] sm:$0xff]  }
 0x9cb   :  { %5599 = vmatprep.subr.bf16.mxu0 %v5866_v37 }
 0x9cc   :  { %v2351_v43 = vmul.f32 0.5, %v2347_v53  ;;  %v2357_v8 = vmul.f32 %v2353_v39, %v2319_v16 }
 0x9ce   :  { %v2355_v19 = vmul.f32 %v2351_v43, %v2311_v0  ;;  %v2359_v62 = vpack.c.bf16 %v2357_v8, %v2356_v26 }
 0x9d0   :  { %v2358_v6 = vpack.c.bf16 %v2355_v19, %v2354_v25 }
 0x9d2   :  { %5587 = vmatprep.mubr.bf16.mxu1 %v2358_v6 }
 0x9d3   :  { %5588 = vmatmul.mubr.bf16.vlgmr.msra.gmra.mxu1 %v2359_v62 }
 0x9d4   :  { %5624 = vmatpush3.bf16.msra.mxu1 %v5863_v50 }
 0x9d5   :  { %5625 = vmatprep.subr.bf16.mxu1 %v5865_v30 }
 0x9d8   :  { %5626 = vmatpush3.bf16.msra.mxu1 %v5865_v30 }
 0x9d9   :  { %5639 = vmatprep.subr.bf16.mxu1 %v5867_v17 }
 0xa93   :  { %v5589_v1 = vpop.f32.mrf.mxu1 }
 0xa94   :  { %v2472_v9 = vadd.f32 %v5589_v1, %v5018_v3 }
 0xa95   :  { %v2463_v7 = vpop.f32.mrf.mxu1 }
 0xa96   :  { %v2464_v40 = vadd.f32 %v5018_v3, %v2463_v7  ;;  %v6954_v35 = vadd.f32 %v2472_v9, %v6281_v27  ;;  %v5063_v7 = vld [vmem:[%s7642_s3 + $0x6] ss:$0 sm:$0xff] }
 0xa97   :  { %v5590_v47 = vpop.f32.mrf.mxu1 }
 0xa98   :  { %v6951_v45 = vadd.f32 %v2464_v40, %v6276_v24  ;;  %v2475_v2 = vadd.f32 %v5590_v47, %v5018_v3  ;;  %v2529_v4 = vsel %vm244_vm6, %v6954_v35, 0.0 }
 0xa99   :  { %v2466_v52 = vpop.f32.mrf.mxu1 }
 0xa9a   :  { %v2467_v20 = vadd.f32 %v5018_v3, %v2466_v52  ;;  %v2523_v33 = vsel %vm244_vm6, %v6951_v45, 0.0  ;;  %v6962_v16 = vadd.f32 %v2475_v2, %v6290_v32  ;;  %v5064_v2 = vld [vmem:[%s7642_s3 + $0x7] ss:$0 sm:$0xff] }
 0xa9b   :  { %2524 = vadd.xlane.f32.xlu1 %v2523_v33 }
 0xa9c   :  { %v6959_v41 = vadd.f32 %v2467_v20, %v6288_v31  ;;  %v2532_v27 = vsel %vm244_vm6, %v6962_v16, 0.0 }
 0xa9e   :  { %v2526_v24 = vsel %vm244_vm6, %v6959_v41, 0.0 }
 0xa9f   :  { %2527 = vadd.xlane.f32.xlu0 %v2526_v24  ;;  %2530 = vadd.xlane.f32.xlu1 %v2529_v4 }
 0xaa3   :  { %2533 = vadd.xlane.f32.xlu0 %v2532_v27 }
 0xb24   :  { %v2525_v44 = vpop.xlane.xlu1 %2524 }
 0xb25   :  { %v2535_v59 = vmul.f32 0.03125, %v2525_v44 }
 0xb27   :  { %v2539_v31 = vsub.f32 %v6951_v45, %v2535_v59 }
 0xb28   :  { %v2528_v10 = vpop.xlane.xlu0 %2527  ;;  %v2531_v0 = vpop.xlane.xlu1 %2530 }
 0xb29   :  { %v2536_v32 = vmul.f32 0.03125, %v2528_v10  ;;  %v2537_v15 = vmul.f32 0.03125, %v2531_v0  ;;  %v2543_v51 = vmul.f32 %v2539_v31, %v2539_v31 }
 0xb2b   :  { %v2540_v58 = vsub.f32 %v6959_v41, %v2536_v32  ;;  %v2541_v60 = vsub.f32 %v6954_v35, %v2537_v15  ;;  %v2547_v18 = vsel %vm244_vm6, %v2543_v51, 0.0  ;;  %v5868_v51 = vld [vmem:[%s7644_s5 + $0x50] sm:$0xff]  }
 0xb2c   :  { %v2534_v28 = vpop.xlane.xlu0 %2533  ;;  %2548 = vadd.xlane.f32.xlu1 %v2547_v18  ;;  %v5871_v18 = vld [vmem:[%s7644_s5 + $0x60] sm:$0xff]  }
 0xb2d   :  { %v2538_v21 = vmul.f32 0.03125, %v2534_v28  ;;  %v2544_v12 = vmul.f32 %v2540_v58, %v2540_v58  ;;  %v2545_v23 = vmul.f32 %v2541_v60, %v2541_v60  ;;  %v5872_v28 = vld [vmem:[%s7644_s5 + $0x78] sm:$0xff]  }
 0xb2f   :  { %v2542_v14 = vsub.f32 %v6962_v16, %v2538_v21  ;;  %v2550_v13 = vsel %vm244_vm6, %v2544_v12, 0.0  ;;  %v2553_v46 = vsel %vm244_vm6, %v2545_v23, 0.0  ;;  %v5873_v21 = vld [vmem:[%s7644_s5 + $0x70] sm:$0xff]   ;;  %v5874_v12 = vld [vmem:[%s7645_s6 + $0x58] sm:$0xff]  }
 0xb30   :  { %2551 = vadd.xlane.f32.xlu0 %v2550_v13  ;;  %2554 = vadd.xlane.f32.xlu1 %v2553_v46  ;;  %v5875_v23 = vld [vmem:[%s7645_s6 + $0x50] sm:$0xff]  }
 0xb31   :  { %v2546_v55 = vmul.f32 %v2542_v14, %v2542_v14  ;;  %v5877_v13 = vld [vmem:[%s7645_s6 + $0x70] sm:$0xff]  }
 0xb33   :  { %v2556_v56 = vsel %vm244_vm6, %v2546_v55, 0.0 }
 0xb34   :  { %2557 = vadd.xlane.f32.xlu0 %v2556_v56 }
 0xbb5   :  { %v2549_v57 = vpop.xlane.xlu1 %2548 }
 0xbb6   :  { %v2559_v39 = vmul.f32 0.03125, %v2549_v57 }
 0xbb8   :  { %v2563_v53 = vadd.f32 1e-05, %v2559_v39 }
 0xbb9   :  { %v2552_v54 = vpop.xlane.xlu0 %2551  ;;  %v2555_v63 = vpop.xlane.xlu1 %2554 }
 0xbba   :  { %6010 = vrsqrt.f32 %v2563_v53  ;;  %v2560_v43 = vmul.f32 0.03125, %v2552_v54  ;;  %v2561_v8 = vmul.f32 0.03125, %v2555_v63 }
 0xbbc   :  { %v2564_v25 = vadd.f32 1e-05, %v2560_v43  ;;  %v2565_v19 = vadd.f32 1e-05, %v2561_v8 }
 0xbbd   :  { %v2558_v26 = vpop.xlane.xlu0 %2557 }
 0xbbe   :  { %6012 = vrsqrt.f32 %v2564_v25  ;;  %v2562_v6 = vmul.f32 0.03125, %v2558_v26 }
 0xbbf   :  { %6014 = vrsqrt.f32 %v2565_v19 }
 0xbc0   :  { %v2566_v62 = vadd.f32 1e-05, %v2562_v6 }
 0xbc2   :  { %6016 = vrsqrt.f32 %v2566_v62 }
 0xbc7   :  { %v6011_v1 = vpop.eup %6010 }
 0xbc8   :  { %v2571_v3 = vmul.f32 %v6011_v1, %v2539_v31 }
 0xbca   :  { %v2579_v47 = vmul.f32 %v5063_v7, %v2571_v3 }
 0xbcb   :  { %v6013_v9 = vpop.eup %6012 }
 0xbcc   :  { %v6015_v40 = vpop.eup %6014  ;;  %v2572_v52 = vmul.f32 %v6013_v9, %v2540_v58  ;;  %v2587_v4 = vadd.f32 %v5064_v2, %v2579_v47  ;;  %v5869_v58 = vld [vmem:[%s7645_s6 + $0x60] sm:$0xff]  }
 0xbcd   :  { %v2573_v20 = vmul.f32 %v6015_v40, %v2541_v60  ;;  %v5870_v60 = vld [vmem:[%s7644_s5 + $0x68] sm:$0xff]  }
 0xbce   :  { %v2580_v33 = vmul.f32 %v5063_v7, %v2572_v52 }
 0xbcf   :  { %v6017_v24 = vpop.eup %6016  ;;  %v2581_v44 = vmul.f32 %v5063_v7, %v2573_v20 }
 0xbd0   :  { %v2588_v27 = vadd.f32 %v5064_v2, %v2580_v33  ;;  %v2574_v59 = vmul.f32 %v6017_v24, %v2542_v14  ;;  %v5876_v14 = vld [vmem:[%s7645_s6 + $0x78] sm:$0xff]  }
 0xbd1   :  { %v2589_v0 = vadd.f32 %v5064_v2, %v2581_v44 }
 0xbd2   :  { %v2591_v31 = vpack.c.bf16 %v2588_v27, %v2587_v4  ;;  %v2582_v10 = vmul.f32 %v5063_v7, %v2574_v59 }
 0xbd4   :  { %v2590_v32 = vadd.f32 %v5064_v2, %v2582_v10  ;;  %5595 = vmatprep.mubr.msk.bf16.mxu0 %vm244_vm6, %v2591_v31  ;;  %5627 = vmatprep.mubr.msk.bf16.mxu1 %vm244_vm6, %v2591_v31 }
 0xbd6   :  { %v2592_v15 = vpack.c.bf16 %v2590_v32, %v2589_v0 }
 0xbd8   :  { %5596 = vmatmul.mubr.msk.bf16.vlgmr.msra.gmra.mxu0 %vm244_vm6, %v2592_v15  ;;  %5628 = vmatmul.mubr.msk.bf16.vlgmr.msra.gmra.mxu1 %vm244_vm6, %v2592_v15 }
 0xbd9   :  { %5600 = vmatpush3.bf16.msra.mxu0 %v5866_v37  ;;  %5603 = vmatprep.mubr.msk.bf16.mxu0 %vm244_vm6, %v2591_v31 }
 0xbda   :  { %5640 = vmatpush3.bf16.msra.mxu1 %v5867_v17  ;;  %5643 = vmatprep.mubr.msk.bf16.mxu1 %vm244_vm6, %v2591_v31 }
 0xbdb   :  { %5601 = vmatprep.subr.bf16.mxu0 %v5868_v51  ;;  %5641 = vmatprep.subr.bf16.mxu1 %v5869_v58 }
 0xbdd   :  { %5602 = vmatpush3.bf16.msra.mxu0 %v5868_v51 }
 0xbde   :  { %5642 = vmatpush3.bf16.msra.mxu1 %v5869_v58  ;;  %5607 = vmatprep.subr.bf16.mxu0 %v5870_v60 }
 0xbdf   :  { %5655 = vmatprep.subr.bf16.mxu1 %v6162_v61 }
 0xbe0   :  { %5604 = vmatmul.mubr.msk.bf16.vlgmr.msra.gmra.mxu0 %vm244_vm6, %v2592_v15 }
 0xbe1   :  { %5644 = vmatmul.mubr.msk.bf16.vlgmr.msra.gmra.mxu1 %vm244_vm6, %v2592_v15  ;;  %5608 = vmatpush3.bf16.msra.mxu0 %v5870_v60 }
 0xbe2   :  { %5611 = vmatprep.mubr.msk.bf16.mxu0 %vm244_vm6, %v2591_v31  ;;  %5609 = vmatprep.subr.bf16.mxu0 %v5871_v18 }
 0xbe3   :  { %5657 = vmatprep.mubr.msk.bf16.mxu1 %vm6163_vm8, %v6162_v61 }
 0xbe5   :  { %5610 = vmatpush3.bf16.msra.mxu0 %v5871_v18 }
 0xbe6   :  { %5615 = vmatprep.subr.bf16.mxu0 %v5872_v28 }
 0xbe8   :  { %5612 = vmatmul.mubr.msk.bf16.vlgmr.msra.gmra.mxu0 %vm244_vm6, %v2592_v15 }
 0xbe9   :  { %5616 = vmatpush3.bf16.msra.mxu0 %v5872_v28  ;;  %5619 = vmatprep.mubr.msk.bf16.mxu0 %vm244_vm6, %v2591_v31 }
 0xbea   :  { %5617 = vmatprep.subr.bf16.mxu0 %v5873_v21 }
 0xbed   :  { %5618 = vmatpush3.bf16.msra.mxu0 %v5873_v21 }
 0xbee   :  { %5631 = vmatprep.subr.bf16.mxu0 %v5874_v12 }
 0xbf0   :  { %5620 = vmatmul.mubr.msk.bf16.vlgmr.msra.gmra.mxu0 %vm244_vm6, %v2592_v15 }
 0xbf1   :  { %5632 = vmatpush3.bf16.msra.mxu0 %v5874_v12  ;;  %5635 = vmatprep.mubr.msk.bf16.mxu0 %vm244_vm6, %v2591_v31 }
 0xbf2   :  { %5633 = vmatprep.subr.bf16.mxu0 %v5875_v23 }
 0xbf5   :  { %5634 = vmatpush3.bf16.msra.mxu0 %v5875_v23 }
 0xbf6   :  { %5647 = vmatprep.subr.bf16.mxu0 %v5876_v14 }
 0xbf8   :  { %5636 = vmatmul.mubr.msk.bf16.vlgmr.msra.gmra.mxu0 %vm244_vm6, %v2592_v15 }
 0xbf9   :  { %5648 = vmatpush3.bf16.msra.mxu0 %v5876_v14  ;;  %5651 = vmatprep.mubr.msk.bf16.mxu0 %vm244_vm6, %v2591_v31 }
 0xbfa   :  { %5649 = vmatprep.subr.bf16.mxu0 %v5877_v13 }
 0xbfd   :  { %5650 = vmatpush3.bf16.msra.mxu0 %v5877_v13 }
 0xbfe   :  { %5661 = vmatprep.subr.bf16.mxu0 %v6162_v61 }
 0xc00   :  { %5652 = vmatmul.mubr.msk.bf16.vlgmr.msra.gmra.mxu0 %vm244_vm6, %v2592_v15 }
 0xc01   :  { %5663 = vmatprep.mubr.msk.bf16.mxu0 %vm6163_vm8, %v6162_v61 }
 0xc98   :  { %v7054_v46 = vpop.f32.mrf.mxu0  ;;  %v7056_v55 = vpop.f32.mrf.mxu1 }
 0xc99   :  { %v3097_v17 = vmul.f32 %v7054_v46, %v7054_v46 }
 0xc9a   :  { %v7058_v56 = vpop.f32.mrf.mxu0  ;;  %v7060_v22 = vpop.f32.mrf.mxu1 }
 0xc9b   :  { %v3095_v50 = vmul.f32 %v7058_v56, %v7058_v56  ;;  %v3117_v43 = vsel %vm834_vm7, %v3097_v17, 0.0 }
 0xc9c   :  { %v7064_v36 = vpop.f32.mrf.mxu0  ;;  %v7066_v30 = vpop.f32.mrf.mxu1 }
 0xc9d   :  { %v3111_v37 = vsel %vm834_vm7, %v3095_v50, 0.0  ;;  %v3098_v25 = vmul.f32 %v7064_v36, %v7064_v36 }
 0xc9e   :  { %v7071_v57 = vpop.f32.mrf.mxu1  ;;  %3112 = vadd.xlane.f32.xlu1 %v3111_v37  ;;  %v7073_v39 = vpop.f32.mrf.mxu0 }
 0xc9f   :  { %v3096_v53 = vmul.f32 %v7073_v39, %v7073_v39  ;;  %v3120_v3 = vsel %vm834_vm7, %v3098_v25, 0.0 }
 0xca0   :  { %v7077_v54 = vpop.f32.mrf.mxu0 }
 0xca1   :  { %v7079_v63 = vpop.f32.mrf.mxu1  ;;  %v3114_v8 = vsel %vm834_vm7, %v3096_v53, 0.0  ;;  %v3101_v9 = vmul.f32 %v7077_v54, %v7077_v54 }
 0xca2   :  { %3118 = vadd.xlane.f32.xlu1 %v3117_v43  ;;  %3115 = vadd.xlane.f32.xlu0 %v3114_v8  ;;  %v7085_v19 = vpop.f32.mrf.mxu0 }
 0xca3   :  { %v7087_v26 = vpop.f32.mrf.mxu1  ;;  %v3099_v6 = vmul.f32 %v7085_v19, %v7085_v19  ;;  %v3129_v20 = vsel %vm834_vm7, %v3101_v9, 0.0 }
 0xca4   :  { %v7091_v62 = vpop.f32.mrf.mxu0 }
 0xca5   :  { %v7093_v1 = vpop.f32.mrf.mxu1  ;;  %v3123_v7 = vsel %vm834_vm7, %v3099_v6, 0.0  ;;  %v3102_v24 = vmul.f32 %v7091_v62, %v7091_v62 }
 0xca6   :  { %3121 = vadd.xlane.f32.xlu0 %v3120_v3  ;;  %3124 = vadd.xlane.f32.xlu1 %v3123_v7  ;;  %v7101_v47 = vpop.f32.mrf.mxu0 }
 0xca7   :  { %v3100_v52 = vmul.f32 %v7101_v47, %v7101_v47  ;;  %v3132_v59 = vsel %vm834_vm7, %v3102_v24, 0.0 }
 0xca8   :  { %v7105_v2 = vpop.f32.mrf.mxu0 }
 0xca9   :  { %v3126_v33 = vsel %vm834_vm7, %v3100_v52, 0.0  ;;  %v3105_v10 = vmul.f32 %v7105_v2, %v7105_v2 }
 0xcaa   :  { %3130 = vadd.xlane.f32.xlu1 %v3129_v20  ;;  %3127 = vadd.xlane.f32.xlu0 %v3126_v33  ;;  %v7111_v4 = vpop.f32.mrf.mxu0 }
 0xcab   :  { %v3103_v27 = vmul.f32 %v7111_v4, %v7111_v4  ;;  %v3141_v51 = vsel %vm834_vm7, %v3105_v10, 0.0 }
 0xcac   :  { %v7115_v44 = vpop.f32.mrf.mxu0 }
 0xcad   :  { %v3135_v31 = vsel %vm834_vm7, %v3103_v27, 0.0  ;;  %v3106_v60 = vmul.f32 %v7115_v44, %v7115_v44 }
 0xcae   :  { %3133 = vadd.xlane.f32.xlu0 %v3132_v59  ;;  %3136 = vadd.xlane.f32.xlu1 %v3135_v31  ;;  %v7121_v0 = vpop.f32.mrf.mxu0 }
 0xcaf   :  { %v3104_v32 = vmul.f32 %v7121_v0, %v7121_v0  ;;  %v3144_v12 = vsel %vm834_vm7, %v3106_v60, 0.0 }
 0xcb0   :  { %v7125_v15 = vpop.f32.mrf.mxu0 }
 0xcb1   :  { %v3138_v58 = vsel %vm834_vm7, %v3104_v32, 0.0  ;;  %v3109_v14 = vmul.f32 %v7125_v15, %v7125_v15 }
 0xcb2   :  { %3142 = vadd.xlane.f32.xlu1 %v3141_v51  ;;  %3139 = vadd.xlane.f32.xlu0 %v3138_v58  ;;  %v7131_v18 = vpop.f32.mrf.mxu0 }
 0xcb3   :  { %v3107_v28 = vmul.f32 %v7131_v18, %v7131_v18  ;;  %v3153_v17 = vsel %vm834_vm7, %v3109_v14, 0.0 }
 0xcb4   :  { %v7135_v21 = vpop.f32.mrf.mxu0 }
 0xcb5   :  { %v3147_v23 = vsel %vm834_vm7, %v3107_v28, 0.0  ;;  %v3110_v43 = vmul.f32 %v7135_v21, %v7135_v21 }
 0xcb6   :  { %3145 = vadd.xlane.f32.xlu0 %v3144_v12  ;;  %3148 = vadd.xlane.f32.xlu1 %v3147_v23  ;;  %v7141_v13 = vpop.f32.mrf.mxu0 }
 0xcb7   :  { %v3108_v50 = vmul.f32 %v7141_v13, %v7141_v13  ;;  %v3156_v3 = vsel %vm834_vm7, %v3110_v43, 0.0 }
 0xcb8   :  { %v7145_v37 = vpop.f32.mrf.mxu0 }
 0xcb9   :  { %v3150_v53 = vsel %vm834_vm7, %v3108_v50, 0.0 }
 0xcba   :  { %3154 = vadd.xlane.f32.xlu1 %v3153_v17  ;;  %3151 = vadd.xlane.f32.xlu0 %v3150_v53  ;;  %v7151_v8 = vpop.f32.mrf.mxu0 }
 0xcbc   :  { %v7153_v25 = vpop.f32.mrf.mxu0 }
 0xcbd   :  { %v3090_v6 = vpack.c.bf16 %v7153_v25, %v7145_v37 }
 0xcbe   :  { %3157 = vadd.xlane.f32.xlu0 %v3156_v3  ;;  %v7158_v7 = vpop.f32.mrf.mxu0 }
 0xcbf   :  { %v3089_v9 = vpack.c.bf16 %v7158_v7, %v7151_v8 }
 0xcc0   :  { %v7162_v52 = vpop.f32.mrf.mxu0 }
 0xcc2   :  { %v7164_v20 = vpop.f32.mrf.mxu0 }
 0xcc4   :  { %v7166_v33 = vpop.f32.mrf.mxu0 }
 0xd27   :  { %v3113_v27 = vpop.xlane.xlu1 %3112 }
 0xd28   :  { %v3159_v59 = vmax.f32 %v3113_v27, 1e-24 }
 0xd2a   :  { %6018 = vrsqrt.f32 %v3159_v59 }
 0xd2b   :  { %v3119_v31 = vpop.xlane.xlu1 %3118  ;;  %v3116_v10 = vpop.xlane.xlu0 %3115 }
 0xd2c   :  { %v3161_v32 = vmax.f32 %v3119_v31, 1e-24  ;;  %v3160_v51 = vmax.f32 %v3116_v10, 1e-24 }
 0xd2e   :  { %6020 = vrsqrt.f32 %v3160_v51 }
 0xd2f   :  { %v3122_v58 = vpop.xlane.xlu0 %3121  ;;  %v3125_v60 = vpop.xlane.xlu1 %3124  ;;  %6022 = vrsqrt.f32 %v3161_v32 }
 0xd30   :  { %v3162_v28 = vmax.f32 %v3122_v58, 1e-24  ;;  %v3163_v12 = vmax.f32 %v3125_v60, 1e-24 }
 0xd32   :  { %6024 = vrsqrt.f32 %v3162_v28 }
 0xd33   :  { %v3131_v23 = vpop.xlane.xlu1 %3130  ;;  %v3128_v14 = vpop.xlane.xlu0 %3127  ;;  %6026 = vrsqrt.f32 %v3163_v12 }
 0xd34   :  { %v3165_v50 = vmax.f32 %v3131_v23, 1e-24  ;;  %v3164_v17 = vmax.f32 %v3128_v14, 1e-24 }
 0xd36   :  { %6028 = vrsqrt.f32 %v3164_v17 }
 0xd37   :  { %v3134_v53 = vpop.xlane.xlu0 %3133  ;;  %v3137_v43 = vpop.xlane.xlu1 %3136  ;;  %6030 = vrsqrt.f32 %v3165_v50 }
 0xd38   :  { %v3166_v3 = vmax.f32 %v3134_v53, 1e-24  ;;  %v3167_v27 = vmax.f32 %v3137_v43, 1e-24  ;;  %v6019_v31 = vpop.eup %6018 }
 0xd39   :  { %v3191_v28 = vmul.f32 %v6019_v31, %v7058_v56 }
 0xd3a   :  { %6032 = vrsqrt.f32 %v3166_v3 }
 0xd3b   :  { %v3143_v59 = vpop.xlane.xlu1 %3142  ;;  %v3140_v10 = vpop.xlane.xlu0 %3139  ;;  %6034 = vrsqrt.f32 %v3167_v27 }
 0xd3c   :  { %v6021_v51 = vpop.eup %6020  ;;  %v3169_v32 = vmax.f32 %v3143_v59, 1e-24  ;;  %v3168_v58 = vmax.f32 %v3140_v10, 1e-24 }
 0xd3d   :  { %v6023_v60 = vpop.eup %6022  ;;  %v3192_v23 = vmul.f32 %v6021_v51, %v7073_v39 }
 0xd3e   :  { %6036 = vrsqrt.f32 %v3168_v58  ;;  %v3193_v43 = vmul.f32 %v6023_v60, %v7054_v46 }
 0xd3f   :  { %v6025_v12 = vpop.eup %6024  ;;  %v3146_v14 = vpop.xlane.xlu0 %3145  ;;  %v3215_v50 = vpack.c.bf16 %v3192_v23, %v3191_v28  ;;  %6038 = vrsqrt.f32 %v3169_v32 }
 0xd40   :  { %v3149_v17 = vpop.xlane.xlu1 %3148  ;;  %v3170_v53 = vmax.f32 %v3146_v14, 1e-24  ;;  %v3194_v3 = vmul.f32 %v6025_v12, %v7064_v36  ;;  %v6027_v10 = vpop.eup %6026 }
 0xd41   :  { %v3171_v24 = vmax.f32 %v3149_v17, 1e-24  ;;  %v3227_v59 = vsel %vm834_vm7, %v3215_v50, 0  ;;  %v3195_v60 = vmul.f32 %v6027_v10, %v7085_v19  ;;  %v3207_v17 = vpack.c.bf16 %v7073_v39, %v7058_v56 }
 0xd42   :  { %6040 = vrsqrt.f32 %v3170_v53  ;;  %5656 = vmatpush3.bf16.xpose.msra.mxu1 %v3227_v59  ;;  %v3216_v27 = vpack.c.bf16 %v3194_v3, %v3193_v43 }
 0xd43   :  { %v3152_v51 = vpop.xlane.xlu0 %3151  ;;  %5667 = vmatprep.subr.bf16.mxu1 %v6162_v61  ;;  %v6029_v58 = vpop.eup %6028  ;;  %6042 = vrsqrt.f32 %v3171_v24 }
 0xd44   :  { %v3155_v31 = vpop.xlane.xlu1 %3154  ;;  %v3172_v28 = vmax.f32 %v3152_v51, 1e-24  ;;  %v3274_v32 = vsel %vm834_vm7, %v3216_v27, 0  ;;  %v6031_v23 = vpop.eup %6030  ;;  %v3196_v12 = vmul.f32 %v6029_v58, %v7101_v47  ;;  %v3208_v27 = vpack.c.bf16 %v7064_v36, %v7054_v46 }
 0xd45   :  { %v3173_v40 = vmax.f32 %v3155_v31, 1e-24  ;;  %5662 = vmatpush3.bf16.xpose.msra.mxu0 %v3274_v32  ;;  %v3197_v3 = vmul.f32 %v6031_v23, %v7077_v54  ;;  %v3209_v36 = vpack.c.bf16 %v7101_v47, %v7085_v19 }
 0xd46   :  { %5673 = vmatprep.subr.bf16.mxu0 %v6162_v61  ;;  %6044 = vrsqrt.f32 %v3172_v28  ;;  %v3217_v53 = vpack.c.bf16 %v3196_v12, %v3195_v60 }
 0xd47   :  { %v6033_v14 = vpop.eup %6032  ;;  %v3158_v50 = vpop.xlane.xlu0 %3157  ;;  %6046 = vrsqrt.f32 %v3173_v40 }
 0xd48   :  { %v3174_v43 = vmax.f32 %v3158_v50, 1e-24  ;;  %v3198_v24 = vmul.f32 %v6033_v14, %v7091_v62  ;;  %v3321_v59 = vsel %vm834_vm7, %v3217_v53, 0  ;;  %v6035_v10 = vpop.eup %6034  ;;  %v3210_v14 = vpack.c.bf16 %v7091_v62, %v7077_v54 }
 0xd49   :  { %5658 = vmatmul.mubr.msk.bf16.vlgmr.msra.gmra.mxu1 %vm834_vm7, %v3207_v17  ;;  %v3199_v51 = vmul.f32 %v6035_v10, %v7111_v4  ;;  %v3211_v62 = vpack.c.bf16 %v7121_v0, %v7111_v4 }
 0xd4a   :  { %6048 = vrsqrt.f32 %v3174_v43  ;;  %5668 = vmatpush3.bf16.xpose.msra.mxu1 %v3321_v59  ;;  %v3218_v56 = vpack.c.bf16 %v3198_v24, %v3197_v3  ;;  %5669 = vmatprep.mubr.msk.bf16.mxu1 %vm6163_vm8, %v6162_v61 }
 0xd4b   :  { %5679 = vmatprep.subr.bf16.mxu1 %v6162_v61  ;;  %v6037_v39 = vpop.eup %6036 }
 0xd4c   :  { %5664 = vmatmul.mubr.msk.bf16.vlgmr.msra.gmra.mxu0 %vm834_vm7, %v3208_v27  ;;  %v3368_v40 = vsel %vm834_vm7, %v3218_v56, 0  ;;  %v6039_v31 = vpop.eup %6038  ;;  %v3200_v58 = vmul.f32 %v6037_v39, %v7121_v0  ;;  %v3212_v27 = vpack.c.bf16 %v7115_v44, %v7105_v2  ;;  %v3214_v0 = vpack.c.bf16 %v7135_v21, %v7125_v15 }
 0xd4d   :  { %5674 = vmatpush3.bf16.xpose.msra.mxu0 %v3368_v40  ;;  %5675 = vmatprep.mubr.msk.bf16.mxu0 %vm6163_vm8, %v6162_v61  ;;  %v3201_v32 = vmul.f32 %v6039_v31, %v7105_v2  ;;  %v3213_v2 = vpack.c.bf16 %v7141_v13, %v7131_v18  ;;  %v3088_v39 = vpack.c.bf16 %v7066_v30, %v7056_v55 }
 0xd4e   :  { %5685 = vmatprep.subr.bf16.mxu0 %v6162_v61  ;;  %v3219_v28 = vpack.c.bf16 %v3200_v58, %v3199_v51 }
 0xd4f   :  { %v6041_v46 = vpop.eup %6040 }
 0xd50   :  { %v3202_v23 = vmul.f32 %v6041_v46, %v7115_v44  ;;  %v3415_v60 = vsel %vm834_vm7, %v3219_v28, 0  ;;  %v6043_v12 = vpop.eup %6042  ;;  %v3087_v44 = vpack.c.bf16 %v7071_v57, %v7060_v22  ;;  %v7248_v22 = vpop.f32.mrf.mxu1 }
 0xd51   :  { %5670 = vmatmul.mubr.msk.bf16.vlgmr.msra.gmra.mxu1 %vm834_vm7, %v3209_v36  ;;  %v3203_v53 = vmul.f32 %v6043_v12, %v7131_v18 }
 0xd52   :  { %5680 = vmatpush3.bf16.xpose.msra.mxu1 %v3415_v60  ;;  %v3220_v17 = vpack.c.bf16 %v3202_v23, %v3201_v32  ;;  %5681 = vmatprep.mubr.msk.bf16.mxu1 %vm6163_vm8, %v6162_v61 }
 0xd53   :  { %5691 = vmatprep.subr.bf16.mxu1 %v6162_v61  ;;  %v6045_v19 = vpop.eup %6044 }
 0xd54   :  { %5676 = vmatmul.mubr.msk.bf16.vlgmr.msra.gmra.mxu0 %vm834_vm7, %v3210_v14  ;;  %v3462_v47 = vsel %vm834_vm7, %v3220_v17, 0  ;;  %v6047_v50 = vpop.eup %6046  ;;  %v3204_v43 = vmul.f32 %v6045_v19, %v7141_v13 }
 0xd55   :  { %5686 = vmatpush3.bf16.xpose.msra.mxu0 %v3462_v47  ;;  %5687 = vmatprep.mubr.msk.bf16.mxu0 %vm6163_vm8, %v6162_v61  ;;  %v3205_v24 = vmul.f32 %v6047_v50, %v7125_v15  ;;  %v7250_v15 = vpop.f32.mrf.mxu0 }
 0xd56   :  { %5697 = vmatprep.subr.bf16.mxu0 %v6162_v61  ;;  %v3221_v3 = vpack.c.bf16 %v3204_v43, %v3203_v53 }
 0xd57   :  { %v6049_v54 = vpop.eup %6048 }
 0xd58   :  { %v3206_v59 = vmul.f32 %v6049_v54, %v7135_v21  ;;  %v3509_v10 = vsel %vm834_vm7, %v3221_v3, 0 }
 0xd59   :  { %5682 = vmatmul.mubr.msk.bf16.vlgmr.msra.gmra.mxu1 %vm834_vm7, %v3211_v62 }
 0xd5a   :  { %5692 = vmatpush3.bf16.xpose.msra.mxu1 %v3509_v10  ;;  %v3222_v56 = vpack.c.bf16 %v3206_v59, %v3205_v24  ;;  %5693 = vmatprep.mubr.msk.bf16.mxu1 %vm6163_vm8, %v6162_v61 }
 0xd5b   :  { %5703 = vmatprep.subr.bf16.mxu1 %v6162_v61 }
 0xd5c   :  { %5688 = vmatmul.mubr.msk.bf16.vlgmr.msra.gmra.mxu0 %vm834_vm7, %v3212_v27  ;;  %v3556_v4 = vsel %vm834_vm7, %v3222_v56, 0 }
 0xd5d   :  { %5698 = vmatpush3.bf16.xpose.msra.mxu0 %v3556_v4  ;;  %5699 = vmatprep.mubr.msk.bf16.mxu0 %vm6163_vm8, %v6162_v61 }
 0xd5e   :  { %5709 = vmatprep.subr.bf16.mxu0 %v6162_v61 }
 0xd61   :  { %5694 = vmatmul.mubr.msk.bf16.vlgmr.msra.gmra.mxu1 %vm834_vm7, %v3213_v2 }
 0xd62   :  { %5704 = vmatpush3.bf16.msra.mxu1 %v3087_v44  ;;  %5705 = vmatprep.mubr.msk.bf16.mxu1 %vm6163_vm8, %v6162_v61 }
 0xd63   :  { %5715 = vmatprep.subr.bf16.mxu1 %v6162_v61 }
 0xd64   :  { %5700 = vmatmul.mubr.msk.bf16.vlgmr.msra.gmra.mxu0 %vm834_vm7, %v3214_v0 }
 0xd65   :  { %5710 = vmatpush3.bf16.msra.mxu0 %v3088_v39  ;;  %5711 = vmatprep.mubr.msk.bf16.mxu0 %vm6163_vm8, %v6162_v61 }
 0xd66   :  { %5721 = vmatprep.subr.bf16.mxu0 %v6162_v61 }
 0xe09   :  { %v3263_v57 = vpop.f32.mrf.mxu1 }
 0xe0a   :  { %v3599_v18 = vmul.f32 %v6585_v38, %v3263_v57 }
 0xe0b   :  { %v5659_v21 = vpop.f32.mrf.mxu1 }
 0xe0c   :  { %v3310_v13 = vpop.f32.mrf.mxu0  ;;  %v7254_v55 = vadd.f32 %v3599_v18, %v6588_v42 }
 0xe0d   :  { %v3266_v30 = vpop.f32.mrf.mxu1  ;;  %v3601_v40 = vmul.f32 %v6585_v38, %v3310_v13 }
 0xe0e   :  { %v3600_v31 = vmul.f32 %v6596_v49, %v3266_v30  ;;  %v3631_v51 = vsel %vm1355_vm15, %v7254_v55, -inf  ;;  %v5665_v58 = vpop.f32.mrf.mxu0 }
 0xe0f   :  { %v5660_v46 = vpop.f32.mrf.mxu1  ;;  %3632 = vmax.xlane.f32.xlu1 %v3631_v51  ;;  %v7261_v36 = vadd.f32 %v3601_v40, %v6588_v42 }
 0xe10   :  { %v3313_v28 = vpop.f32.mrf.mxu0  ;;  %v7264_v32 = vadd.f32 %v3600_v31, %v6602_v29 }
 0xe11   :  { %v3602_v23 = vmul.f32 %v6596_v49, %v3313_v28  ;;  %v3357_v60 = vpop.f32.mrf.mxu1  ;;  %v3637_v12 = vsel %vm1355_vm15, %v7261_v36, -inf }
 0xe12   :  { %v3603_v14 = vmul.f32 %v6585_v38, %v3357_v60  ;;  %v3634_v17 = vsel %vm1355_vm15, %v7264_v32, -inf  ;;  %v5666_v19 = vpop.f32.mrf.mxu0 }
 0xe13   :  { %v5671_v47 = vpop.f32.mrf.mxu1  ;;  %3635 = vmax.xlane.f32.xlu0 %v3634_v17  ;;  %3638 = vmax.xlane.f32.xlu1 %v3637_v12  ;;  %v7273_v50 = vadd.f32 %v3602_v23, %v6602_v29 }
 0xe14   :  { %v3404_v53 = vpop.f32.mrf.mxu0  ;;  %v7276_v43 = vadd.f32 %v3603_v14, %v6588_v42 }
 0xe15   :  { %v3360_v54 = vpop.f32.mrf.mxu1  ;;  %v3605_v62 = vmul.f32 %v6585_v38, %v3404_v53  ;;  %v3640_v3 = vsel %vm1355_vm15, %v7273_v50, -inf }
 0xe16   :  { %v3604_v24 = vmul.f32 %v6596_v49, %v3360_v54  ;;  %v3643_v59 = vsel %vm1355_vm15, %v7276_v43, -inf  ;;  %v5677_v10 = vpop.f32.mrf.mxu0 }
 0xe17   :  { %v5672_v27 = vpop.f32.mrf.mxu1  ;;  %3644 = vmax.xlane.f32.xlu1 %v3643_v59  ;;  %3641 = vmax.xlane.f32.xlu0 %v3640_v3  ;;  %v7285_v56 = vadd.f32 %v3605_v62, %v6588_v42 }
 0xe18   :  { %v7288_v4 = vadd.f32 %v3604_v24, %v6602_v29  ;;  %v3407_v2 = vpop.f32.mrf.mxu0 }
 0xe19   :  { %v3606_v44 = vmul.f32 %v6596_v49, %v3407_v2  ;;  %v3451_v0 = vpop.f32.mrf.mxu1  ;;  %v3649_v39 = vsel %vm1355_vm15, %v7285_v56, -inf }
 0xe1a   :  { %v3607_v57 = vmul.f32 %v6585_v38, %v3451_v0  ;;  %v3646_v18 = vsel %vm1355_vm15, %v7288_v4, -inf  ;;  %v5678_v21 = vpop.f32.mrf.mxu0 }
 0xe1b   :  { %v7297_v13 = vadd.f32 %v3606_v44, %v6602_v29  ;;  %v5683_v30 = vpop.f32.mrf.mxu1  ;;  %3647 = vmax.xlane.f32.xlu0 %v3646_v18  ;;  %3650 = vmax.xlane.f32.xlu1 %v3649_v39 }
 0xe1c   :  { %v7300_v40 = vadd.f32 %v3607_v57, %v6588_v42  ;;  %v3498_v31 = vpop.f32.mrf.mxu0 }
 0xe1d   :  { %v3454_v51 = vpop.f32.mrf.mxu1  ;;  %v3609_v58 = vmul.f32 %v6585_v38, %v3498_v31  ;;  %v3652_v46 = vsel %vm1355_vm15, %v7297_v13, -inf }
 0xe1e   :  { %v3608_v28 = vmul.f32 %v6596_v49, %v3454_v51  ;;  %v3655_v23 = vsel %vm1355_vm15, %v7300_v40, -inf  ;;  %v5689_v60 = vpop.f32.mrf.mxu0 }
 0xe1f   :  { %v7309_v12 = vadd.f32 %v3609_v58, %v6588_v42  ;;  %v5684_v14 = vpop.f32.mrf.mxu1  ;;  %3656 = vmax.xlane.f32.xlu1 %v3655_v23  ;;  %3653 = vmax.xlane.f32.xlu0 %v3652_v46 }
 0xe20   :  { %v7312_v17 = vadd.f32 %v3608_v28, %v6602_v29  ;;  %v3501_v19 = vpop.f32.mrf.mxu0 }
 0xe21   :  { %v3610_v47 = vmul.f32 %v6596_v49, %v3501_v19  ;;  %v3545_v53 = vpop.f32.mrf.mxu1  ;;  %v3661_v54 = vsel %vm1355_vm15, %v7309_v12, -inf }
 0xe22   :  { %v3611_v62 = vmul.f32 %v6585_v38, %v3545_v53  ;;  %v3658_v3 = vsel %vm1355_vm15, %v7312_v17, -inf  ;;  %v5690_v24 = vpop.f32.mrf.mxu0 }
 0xe23   :  { %v7321_v59 = vadd.f32 %v3610_v47, %v6602_v29  ;;  %v5695_v10 = vpop.f32.mrf.mxu1  ;;  %3659 = vmax.xlane.f32.xlu0 %v3658_v3  ;;  %3662 = vmax.xlane.f32.xlu1 %v3661_v54 }
 0xe24   :  { %v7324_v27 = vadd.f32 %v3611_v62, %v6588_v42  ;;  %v3592_v2 = vpop.f32.mrf.mxu0 }
 0xe25   :  { %v3548_v44 = vpop.f32.mrf.mxu1  ;;  %v3613_v0 = vmul.f32 %v6585_v38, %v3592_v2  ;;  %v3664_v39 = vsel %vm1355_vm15, %v7321_v59, -inf }
 0xe26   :  { %v3612_v57 = vmul.f32 %v6596_v49, %v3548_v44  ;;  %v3667_v18 = vsel %vm1355_vm15, %v7324_v27, -inf  ;;  %v5701_v21 = vpop.f32.mrf.mxu0 }
 0xe27   :  { %v7333_v30 = vadd.f32 %v3613_v0, %v6588_v42  ;;  %v5696_v31 = vpop.f32.mrf.mxu1  ;;  %3668 = vmax.xlane.f32.xlu1 %v3667_v18  ;;  %3665 = vmax.xlane.f32.xlu0 %v3664_v39 }
 0xe28   :  { %v7336_v51 = vadd.f32 %v3612_v57, %v6602_v29  ;;  %v3595_v58 = vpop.f32.mrf.mxu0 }
 0xe29   :  { %v3614_v38 = vmul.f32 %v6596_v49, %v3595_v58  ;;  %v3673_v46 = vsel %vm1355_vm15, %v7333_v30, -inf }
 0xe2a   :  { %v3670_v28 = vsel %vm1355_vm15, %v7336_v51, -inf  ;;  %v5702_v23 = vpop.f32.mrf.mxu0 }
 0xe2b   :  { %v7344_v60 = vadd.f32 %v3614_v38, %v6602_v29  ;;  %3671 = vmax.xlane.f32.xlu0 %v3670_v28  ;;  %3674 = vmax.xlane.f32.xlu1 %v3673_v46 }
 0xe2d   :  { %v3676_v42 = vsel %vm1355_vm15, %v7344_v60, -inf }
 0xe2f   :  { %3677 = vmax.xlane.f32.xlu0 %v3676_v42 }
 0xe98   :  { %v3633_v14 = vpop.xlane.xlu1 %3632 }
 0xe99   :  { %v3679_v19 = vsub.f32 %v7254_v55, %v3633_v14 }
 0xe9b   :  { %v3695_v49 = vmul.f32 1.442695, %v3679_v19 }
 0xe9c   :  { %v3636_v47 = vpop.xlane.xlu0 %3635  ;;  %v3639_v53 = vpop.xlane.xlu1 %3638 }
 0xe9d   :  { %6050 = vpow2.f32 %v3695_v49  ;;  %v3680_v54 = vsub.f32 %v7264_v32, %v3636_v47  ;;  %v3681_v62 = vsub.f32 %v7261_v36, %v3639_v53 }
 0xe9f   :  { %v3697_v3 = vmul.f32 1.442695, %v3680_v54  ;;  %v3699_v29 = vmul.f32 1.442695, %v3681_v62 }
 0xea0   :  { %v3645_v24 = vpop.xlane.xlu1 %3644  ;;  %v3642_v10 = vpop.xlane.xlu0 %3641 }
 0xea1   :  { %6052 = vpow2.f32 %v3697_v3  ;;  %v3683_v2 = vsub.f32 %v7276_v43, %v3645_v24  ;;  %v3682_v44 = vsub.f32 %v7273_v50, %v3642_v10 }
 0xea2   :  { %6054 = vpow2.f32 %v3699_v29 }
 0xea3   :  { %v3703_v0 = vmul.f32 1.442695, %v3683_v2  ;;  %v3701_v55 = vmul.f32 1.442695, %v3682_v44 }
 0xea4   :  { %v3648_v39 = vpop.xlane.xlu0 %3647  ;;  %v3651_v57 = vpop.xlane.xlu1 %3650 }
 0xea5   :  { %6056 = vpow2.f32 %v3703_v0  ;;  %v3684_v18 = vsub.f32 %v7288_v4, %v3648_v39  ;;  %v3685_v32 = vsub.f32 %v7285_v56, %v3651_v57 }
 0xea6   :  { %6058 = vpow2.f32 %v3701_v55 }
 0xea7   :  { %v3705_v36 = vmul.f32 1.442695, %v3684_v18  ;;  %v3707_v21 = vmul.f32 1.442695, %v3685_v32 }
 0xea8   :  { %v3657_v31 = vpop.xlane.xlu1 %3656  ;;  %v3654_v58 = vpop.xlane.xlu0 %3653 }
 0xea9   :  { %6060 = vpow2.f32 %v3705_v36  ;;  %v3687_v43 = vsub.f32 %v7300_v40, %v3657_v31  ;;  %v3686_v50 = vsub.f32 %v7297_v13, %v3654_v58 }
 0xeaa   :  { %v7357_v38 = vpop.eup %6050  ;;  %6062 = vpow2.f32 %v3707_v21 }
 0xeab   :  { %v3711_v46 = vmul.f32 1.442695, %v3687_v43  ;;  %v3709_v28 = vmul.f32 1.442695, %v3686_v50  ;;  %v3727_v4 = vsel %vm1355_vm15, %v7357_v38, 0.0 }
 0xeac   :  { %v3660_v23 = vpop.xlane.xlu0 %3659  ;;  %v3663_v56 = vpop.xlane.xlu1 %3662  ;;  %3728 = vadd.xlane.f32.xlu1 %v3727_v4 }
 0xead   :  { %6064 = vpow2.f32 %v3711_v46  ;;  %v3688_v42 = vsub.f32 %v7312_v17, %v3660_v23  ;;  %v3689_v14 = vsub.f32 %v7309_v12, %v3663_v56 }
 0xeae   :  { %v7363_v19 = vpop.eup %6052  ;;  %6066 = vpow2.f32 %v3709_v28 }
 0xeaf   :  { %v7365_v13 = vpop.eup %6054  ;;  %v3713_v40 = vmul.f32 1.442695, %v3688_v42  ;;  %v3715_v49 = vmul.f32 1.442695, %v3689_v14  ;;  %v3730_v47 = vsel %vm1355_vm15, %v7363_v19, 0.0 }
 0xeb0   :  { %v3669_v53 = vpop.xlane.xlu1 %3668  ;;  %v3666_v54 = vpop.xlane.xlu0 %3665  ;;  %v3733_v62 = vsel %vm1355_vm15, %v7365_v13, 0.0  ;;  %3731 = vadd.xlane.f32.xlu0 %v3730_v47 }
 0xeb1   :  { %6068 = vpow2.f32 %v3713_v40  ;;  %v3691_v17 = vsub.f32 %v7324_v27, %v3669_v53  ;;  %v3690_v12 = vsub.f32 %v7321_v59, %v3666_v54  ;;  %3734 = vadd.xlane.f32.xlu1 %v3733_v62 }
 0xeb2   :  { %v7373_v3 = vpop.eup %6056  ;;  %6070 = vpow2.f32 %v3715_v49 }
 0xeb3   :  { %v7375_v29 = vpop.eup %6058  ;;  %v3719_v24 = vmul.f32 1.442695, %v3691_v17  ;;  %v3717_v10 = vmul.f32 1.442695, %v3690_v12  ;;  %v3739_v2 = vsel %vm1355_vm15, %v7373_v3, 0.0 }
 0xeb4   :  { %v3672_v44 = vpop.xlane.xlu0 %3671  ;;  %v3675_v0 = vpop.xlane.xlu1 %3674  ;;  %v3736_v55 = vsel %vm1355_vm15, %v7375_v29, 0.0 }
 0xeb5   :  { %6072 = vpow2.f32 %v3719_v24  ;;  %v3692_v27 = vsub.f32 %v7336_v51, %v3672_v44  ;;  %3740 = vadd.xlane.f32.xlu1 %v3739_v2  ;;  %v3693_v59 = vsub.f32 %v7333_v30, %v3675_v0  ;;  %3737 = vadd.xlane.f32.xlu0 %v3736_v55 }
 0xeb6   :  { %v7383_v39 = vpop.eup %6060  ;;  %6074 = vpow2.f32 %v3717_v10 }
 0xeb7   :  { %v7385_v57 = vpop.eup %6062  ;;  %v3721_v18 = vmul.f32 1.442695, %v3692_v27  ;;  %v3723_v32 = vmul.f32 1.442695, %v3693_v59  ;;  %v3742_v36 = vsel %vm1355_vm15, %v7383_v39, 0.0 }
 0xeb8   :  { %v3745_v21 = vsel %vm1355_vm15, %v7385_v57, 0.0  ;;  %v3678_v31 = vpop.xlane.xlu0 %3677 }
 0xeb9   :  { %6076 = vpow2.f32 %v3721_v18  ;;  %3746 = vadd.xlane.f32.xlu1 %v3745_v21  ;;  %3743 = vadd.xlane.f32.xlu0 %v3742_v36  ;;  %v3694_v30 = vsub.f32 %v7344_v60, %v3678_v31 }
 0xeba   :  { %v7392_v51 = vpop.eup %6064  ;;  %6078 = vpow2.f32 %v3723_v32 }
 0xebb   :  { %v7394_v58 = vpop.eup %6066  ;;  %v3725_v43 = vmul.f32 1.442695, %v3694_v30  ;;  %v3751_v50 = vsel %vm1355_vm15, %v7392_v51, 0.0 }
 0xebc   :  { %v3748_v46 = vsel %vm1355_vm15, %v7394_v58, 0.0 }
 0xebd   :  { %6080 = vpow2.f32 %v3725_v43  ;;  %3752 = vadd.xlane.f32.xlu1 %v3751_v50  ;;  %3749 = vadd.xlane.f32.xlu0 %v3748_v46 }
 0xebe   :  { %v7400_v28 = vpop.eup %6068 }
 0xebf   :  { %v7402_v4 = vpop.eup %6070  ;;  %v3754_v60 = vsel %vm1355_vm15, %v7400_v28, 0.0 }
 0xec0   :  { %v3757_v23 = vsel %vm1355_vm15, %v7402_v4, 0.0 }
 0xec1   :  { %3758 = vadd.xlane.f32.xlu1 %v3757_v23  ;;  %3755 = vadd.xlane.f32.xlu0 %v3754_v60 }
 0xec2   :  { %v7408_v56 = vpop.eup %6072 }
 0xec3   :  { %v7410_v42 = vpop.eup %6074  ;;  %v3763_v14 = vsel %vm1355_vm15, %v7408_v56, 0.0 }
 0xec4   :  { %v3760_v40 = vsel %vm1355_vm15, %v7410_v42, 0.0 }
 0xec5   :  { %3764 = vadd.xlane.f32.xlu1 %v3763_v14  ;;  %3761 = vadd.xlane.f32.xlu0 %v3760_v40 }
 0xec6   :  { %v7416_v49 = vpop.eup %6076 }
 0xec7   :  { %v7418_v47 = vpop.eup %6078  ;;  %v3766_v53 = vsel %vm1355_vm15, %v7416_v49, 0.0 }
 0xec8   :  { %v3769_v54 = vsel %vm1355_vm15, %v7418_v47, 0.0 }
 0xec9   :  { %3770 = vadd.xlane.f32.xlu1 %v3769_v54  ;;  %3767 = vadd.xlane.f32.xlu0 %v3766_v53 }
 0xeca   :  { %v7424_v62 = vpop.eup %6080 }
 0xecb   :  { %v3772_v17 = vsel %vm1355_vm15, %v7424_v62, 0.0 }
 0xecd   :  { %3773 = vadd.xlane.f32.xlu0 %v3772_v17 }
 0xf35   :  { %v3729_v12 = vpop.xlane.xlu1 %3728 }
 0xf36   :  { %6082 = vrcp.f32 %v3729_v12  ;;  %v3091_v12 = vpack.c.bf16 %v7248_v22, %v7087_v26 }
 0xf39   :  { %v3732_v24 = vpop.xlane.xlu0 %3731 }
 0xf3a   :  { %v3735_v10 = vpop.xlane.xlu1 %3734  ;;  %6084 = vrcp.f32 %v3732_v24 }
 0xf3b   :  { %6086 = vrcp.f32 %v3735_v10 }
 0xf3e   :  { %v3741_v2 = vpop.xlane.xlu1 %3740  ;;  %v3738_v44 = vpop.xlane.xlu0 %3737 }
 0xf3f   :  { %6088 = vrcp.f32 %v3738_v44  ;;  %v3093_v44 = vpack.c.bf16 %v7250_v15, %v7164_v20  ;;  %v7652_v15 = vpack.c.bf16 %v7166_v33, %v7162_v52 }
 0xf40   :  { %6090 = vrcp.f32 %v3741_v2 }
 0xf42   :  { %v3747_v0 = vpop.xlane.xlu1 %3746  ;;  %v3744_v55 = vpop.xlane.xlu0 %3743 }
 0xf43   :  { %6092 = vrcp.f32 %v3744_v55  ;;  %v6083_v27 = vpop.eup %6082 }
 0xf44   :  { %6094 = vrcp.f32 %v3747_v0  ;;  %v3791_v36 = vmul.f32 %v6083_v27, %v7357_v38 }
 0xf46   :  { %v3753_v59 = vpop.xlane.xlu1 %3752  ;;  %v3750_v18 = vpop.xlane.xlu0 %3749 }
 0xf47   :  { %v6085_v32 = vpop.eup %6084  ;;  %6096 = vrcp.f32 %v3750_v18 }
 0xf48   :  { %v3792_v21 = vmul.f32 %v6085_v32, %v7363_v19  ;;  %6098 = vrcp.f32 %v3753_v59  ;;  %v6087_v50 = vpop.eup %6086 }
 0xf49   :  { %v3793_v19 = vmul.f32 %v6087_v50, %v7365_v13 }
 0xf4a   :  { %v3759_v31 = vpop.xlane.xlu1 %3758  ;;  %v3756_v30 = vpop.xlane.xlu0 %3755  ;;  %v3807_v43 = vpack.c.bf16 %v3792_v21, %v3791_v36 }
 0xf4b   :  { %6100 = vrcp.f32 %v3756_v30 }
 0xf4c   :  { %5706 = vmatmul.mubr.msk.bf16.vlgmr.msra.gmra.mxu1 %vm1355_vm15, %v3807_v43  ;;  %v6089_v46 = vpop.eup %6088  ;;  %6102 = vrcp.f32 %v3759_v31 }
 0xf4d   :  { %5716 = vmatpush3.bf16.msra.mxu1 %v3089_v9  ;;  %5717 = vmatprep.mubr.msk.bf16.mxu1 %vm6163_vm8, %v6162_v61  ;;  %v3794_v23 = vmul.f32 %v6089_v46, %v7375_v29  ;;  %v6091_v14 = vpop.eup %6090 }
 0xf4e   :  { %v3765_v38 = vpop.xlane.xlu1 %3764  ;;  %v3762_v60 = vpop.xlane.xlu0 %3761  ;;  %5727 = vmatprep.subr.bf16.mxu1 %v6162_v61  ;;  %v3795_v9 = vmul.f32 %v6091_v14, %v7373_v3 }
 0xf4f   :  { %6104 = vrcp.f32 %v3762_v60  ;;  %v3808_v40 = vpack.c.bf16 %v3794_v23, %v3793_v19 }
 0xf50   :  { %v6093_v53 = vpop.eup %6092  ;;  %6106 = vrcp.f32 %v3765_v38 }
 0xf51   :  { %5712 = vmatmul.mubr.msk.bf16.vlgmr.msra.gmra.mxu0 %vm1355_vm15, %v3808_v40  ;;  %v3796_v54 = vmul.f32 %v6093_v53, %v7383_v39  ;;  %v6095_v17 = vpop.eup %6094 }
 0xf52   :  { %v3771_v8 = vpop.xlane.xlu1 %3770  ;;  %v3768_v7 = vpop.xlane.xlu0 %3767  ;;  %5722 = vmatpush3.bf16.msra.mxu0 %v3090_v6  ;;  %5723 = vmatprep.mubr.msk.bf16.mxu0 %vm6163_vm8, %v6162_v61  ;;  %v3797_v39 = vmul.f32 %v6095_v17, %v7385_v57  ;;  %v7651_v57 = vpack.c.bf16 %v7093_v1, %v7079_v63 }
 0xf53   :  { %6108 = vrcp.f32 %v3768_v7  ;;  %v3809_v13 = vpack.c.bf16 %v3796_v54, %v3795_v9  ;;  %5733 = vmatprep.subr.bf16.mxu0 %v6162_v61 }
 0xf54   :  { %v6097_v29 = vpop.eup %6096  ;;  %6110 = vrcp.f32 %v3771_v8 }
 0xf55   :  { %5718 = vmatmul.mubr.msk.bf16.vlgmr.msra.gmra.mxu1 %vm1355_vm15, %v3809_v13  ;;  %v3798_v37 = vmul.f32 %v6097_v29, %v7394_v58  ;;  %v6099_v25 = vpop.eup %6098 }
 0xf56   :  { %v3774_v3 = vpop.xlane.xlu0 %3773  ;;  %5728 = vmatpush3.bf16.msra.mxu1 %v3091_v12  ;;  %5729 = vmatprep.mubr.msk.bf16.mxu1 %vm6163_vm8, %v6162_v61  ;;  %v3799_v26 = vmul.f32 %v6099_v25, %v7392_v51 }
 0xf57   :  { %6112 = vrcp.f32 %v3774_v3  ;;  %v3810_v6 = vpack.c.bf16 %v3798_v37, %v3797_v39  ;;  %5739 = vmatprep.subr.bf16.mxu1 %v6162_v61 }
 0xf58   :  { %v6101_v24 = vpop.eup %6100 }
 0xf59   :  { %5724 = vmatmul.mubr.msk.bf16.vlgmr.msra.gmra.mxu0 %vm1355_vm15, %v3810_v6  ;;  %v3800_v22 = vmul.f32 %v6101_v24, %v7400_v28  ;;  %v6103_v10 = vpop.eup %6102 }
 0xf5a   :  { %5734 = vmatpush3.bf16.msra.mxu0 %v7651_v57  ;;  %5735 = vmatprep.mubr.msk.bf16.mxu0 %vm6163_vm8, %v6162_v61  ;;  %v3801_v51 = vmul.f32 %v6103_v10, %v7402_v4 }
 0xf5b   :  { %v3811_v58 = vpack.c.bf16 %v3800_v22, %v3799_v26  ;;  %5745 = vmatprep.subr.bf16.mxu0 %v6162_v61 }
 0xf5c   :  { %v6105_v2 = vpop.eup %6104 }
 0xf5d   :  { %5730 = vmatmul.mubr.msk.bf16.vlgmr.msra.gmra.mxu1 %vm1355_vm15, %v3811_v58  ;;  %v3802_v28 = vmul.f32 %v6105_v2, %v7410_v42  ;;  %v6107_v0 = vpop.eup %6106 }
 0xf5e   :  { %5740 = vmatpush3.bf16.msra.mxu1 %v3093_v44  ;;  %5741 = vmatprep.mubr.msk.bf16.mxu1 %vm6163_vm8, %v6162_v61  ;;  %v3803_v27 = vmul.f32 %v6107_v0, %v7408_v56  ;;  %v5059_v56 = vld [vmem:[%s7646_s7 + $0x10] sm:$0xf] }
 0xf5f   :  { %v3812_v63 = vpack.c.bf16 %v3802_v28, %v3801_v51  ;;  %5815 = vmatprep.subr.msk.bf16.mxu1 %vm1906_vm0, %v5059_v56  ;;  %v4182_v52 = vsel %vm1906_vm0, %v5059_v56, 0 }
 0xf60   :  { %v6109_v1 = vpop.eup %6108 }
 0xf61   :  { %v6111_v55 = vpop.eup %6110  ;;  %5736 = vmatmul.mubr.msk.bf16.vlgmr.msra.gmra.mxu0 %vm1355_vm15, %v3812_v63  ;;  %v3804_v20 = vmul.f32 %v6109_v1, %v7416_v49  ;;  %v5061_v49 = vld [vmem:[%s7646_s7 + $0x18] sm:$0xf] }
 0xf62   :  { %5746 = vmatpush3.bf16.msra.mxu0 %v7652_v15  ;;  %5747 = vmatprep.mubr.msk.bf16.mxu0 %vm6163_vm8, %v6162_v61  ;;  %v3805_v59 = vmul.f32 %v6111_v55, %v7418_v47  ;;  %v5060_v61 = vld [vmem:[%s7646_s7 + $0x14] sm:$0xf]  ;;  %v5062_v47 = vld [vmem:[%s7646_s7 + $0x1c] sm:$0xf]  ;;  %v4298_v19 = vsel %vm1906_vm0, %v5061_v49, 0 }
 0xf63   :  { %v3813_v42 = vpack.c.bf16 %v3804_v20, %v3803_v27  ;;  %5816 = vmatprep.subr.msk.bf16.mxu0 %vm1906_vm0, %v5060_v61  ;;  %v4240_v33 = vsel %vm1906_vm0, %v5060_v61, 0  ;;  %v4356_v29 = vsel %vm1906_vm0, %v5062_v47, 0 }
 0xf64   :  { %v6113_v4 = vpop.eup %6112 }
 0xf65   :  { %v3806_v18 = vmul.f32 %v6113_v4, %v7424_v62  ;;  %5742 = vmatmul.mubr.msk.bf16.vlgmr.msra.gmra.mxu1 %vm1355_vm15, %v3813_v42 }
 0xf66   :  { %5752 = vmatpush3.bf16.msra.mxu1 %v4182_v52 }
 0xf67   :  { %v3814_v32 = vpack.c.bf16 %v3806_v18, %v3805_v59  ;;  %5817 = vmatprep.subr.msk.bf16.mxu1 %vm1906_vm0, %v5061_v49 }
 0xf69   :  { %5748 = vmatmul.mubr.msk.bf16.vlgmr.msra.gmra.mxu0 %vm1355_vm15, %v3814_v32 }
 0xf6a   :  { %5758 = vmatpush3.bf16.msra.mxu0 %v4240_v33 }
 0xf6b   :  { %5818 = vmatprep.subr.msk.bf16.mxu0 %vm1906_vm0, %v5062_v47 }
0x100c   :  { %v3852_v62 = vpop.f32.mrf.mxu1 }
0x100e   :  { %v5707_v36 = vpop.f32.mrf.mxu1 }
0x1010   :  { %v3855_v21 = vpop.f32.mrf.mxu1 }
0x1011   :  { %v4167_v31 = vpack.c.bf16 %v3855_v21, %v3852_v62  ;;  %v3896_v30 = vpop.f32.mrf.mxu0 }
0x1012   :  { %v5708_v43 = vpop.f32.mrf.mxu1 }
0x1013   :  { %5753 = vmatprep.mubr.msk.bf16.mxu1 %vm834_vm7, %v4167_v31  ;;  %v5713_v50 = vpop.f32.mrf.mxu0 }
0x1015   :  { %v3899_v46 = vpop.f32.mrf.mxu0  ;;  %v3940_v38 = vpop.f32.mrf.mxu1 }
0x1016   :  { %v4168_v60 = vpack.c.bf16 %v3899_v46, %v3896_v30 }
0x1017   :  { %v5714_v23 = vpop.f32.mrf.mxu0  ;;  %v5719_v14 = vpop.f32.mrf.mxu1 }
0x1018   :  { %5754 = vmatmul.mubr.msk.bf16.vlgmr.msra.gmra.mxu1 %vm834_vm7, %v4168_v60 }
0x1019   :  { %v3943_v40 = vpop.f32.mrf.mxu1  ;;  %v3984_v53 = vpop.f32.mrf.mxu0  ;;  %5764 = vmatpush3.bf16.msra.mxu1 %v4298_v19 }
0x101a   :  { %v4169_v8 = vpack.c.bf16 %v3943_v40, %v3940_v38 }
0x101b   :  { %v5720_v7 = vpop.f32.mrf.mxu1  ;;  %v5725_v9 = vpop.f32.mrf.mxu0 }
0x101c   :  { %5759 = vmatprep.mubr.msk.bf16.mxu0 %vm834_vm7, %v4169_v8 }
0x101d   :  { %v3987_v54 = vpop.f32.mrf.mxu0  ;;  %v4028_v17 = vpop.f32.mrf.mxu1 }
0x101e   :  { %v4170_v13 = vpack.c.bf16 %v3987_v54, %v3984_v53 }
0x101f   :  { %v5726_v12 = vpop.f32.mrf.mxu0  ;;  %v5731_v3 = vpop.f32.mrf.mxu1 }
0x1020   :  { %5760 = vmatmul.mubr.msk.bf16.vlgmr.msra.gmra.mxu0 %vm834_vm7, %v4170_v13 }
0x1021   :  { %v4031_v39 = vpop.f32.mrf.mxu1  ;;  %v4072_v37 = vpop.f32.mrf.mxu0  ;;  %5770 = vmatpush3.bf16.msra.mxu0 %v4356_v29 }
0x1022   :  { %v4171_v25 = vpack.c.bf16 %v4031_v39, %v4028_v17  ;;  %v5121_v17 = vld [vmem:[%s7642_s3 + $0x8] ss:$0 sm:$0xff] }
0x1023   :  { %v5732_v6 = vpop.f32.mrf.mxu1  ;;  %v5737_v24 = vpop.f32.mrf.mxu0 }
0x1024   :  { %5765 = vmatprep.mubr.msk.bf16.mxu1 %vm834_vm7, %v4171_v25 }
0x1025   :  { %v4075_v26 = vpop.f32.mrf.mxu0  ;;  %v4116_v22 = vpop.f32.mrf.mxu1 }
0x1026   :  { %v4172_v10 = vpack.c.bf16 %v4075_v26, %v4072_v37 }
0x1027   :  { %v5738_v57 = vpop.f32.mrf.mxu0  ;;  %v5743_v58 = vpop.f32.mrf.mxu1 }
0x1028   :  { %5766 = vmatmul.mubr.msk.bf16.vlgmr.msra.gmra.mxu1 %vm834_vm7, %v4172_v10 }
0x1029   :  { %v4119_v2 = vpop.f32.mrf.mxu1  ;;  %v4160_v44 = vpop.f32.mrf.mxu0 }
0x102a   :  { %v4173_v51 = vpack.c.bf16 %v4119_v2, %v4116_v22 }
0x102b   :  { %v5744_v28 = vpop.f32.mrf.mxu1  ;;  %v5749_v0 = vpop.f32.mrf.mxu0 }
0x102c   :  { %5771 = vmatprep.mubr.msk.bf16.mxu0 %vm834_vm7, %v4173_v51 }
0x102d   :  { %v4163_v63 = vpop.f32.mrf.mxu0 }
0x102e   :  { %v4174_v1 = vpack.c.bf16 %v4163_v63, %v4160_v44 }
0x102f   :  { %v5750_v55 = vpop.f32.mrf.mxu0 }
0x1030   :  { %5772 = vmatmul.mubr.msk.bf16.vlgmr.msra.gmra.mxu0 %vm834_vm7, %v4174_v1 }
0x10d8   :  { %v5755_v27 = vpop.f32.mrf.mxu1 }
0x10d9   :  { %v4421_v33 = vsel %vm244_vm6, %v5755_v27, 0.0 }
0x10da   :  { %v4218_v20 = vpop.f32.mrf.mxu1 }
0x10db   :  { %v4407_v21 = vsel %vm244_vm6, %v4218_v20, 0.0 }
0x10dc   :  { %v5756_v15 = vpop.f32.mrf.mxu1 }
0x10dd   :  { %v4428_v60 = vsel %vm244_vm6, %v5756_v15, 0.0 }
0x10de   :  { %v4221_v42 = vpop.f32.mrf.mxu1 }
0x10df   :  { %v4414_v9 = vsel %vm244_vm6, %v4221_v42, 0.0 }
0x10e0   :  { %v5761_v4 = vpop.f32.mrf.mxu0 }
0x10e1   :  { %v4422_v52 = vsel %vm244_vm6, %v5761_v4, 0.0 }
0x10e2   :  { %v4276_v59 = vpop.f32.mrf.mxu0  ;;  %v4423_v62 = vadd.f32 %v4422_v52, %v4421_v33 }
0x10e3   :  { %v4408_v49 = vsel %vm244_vm6, %v4276_v59, 0.0 }
0x10e4   :  { %v5762_v32 = vpop.f32.mrf.mxu0  ;;  %v4409_v43 = vadd.f32 %v4408_v49, %v4407_v21 }
0x10e5   :  { %v4429_v31 = vsel %vm244_vm6, %v5762_v32, 0.0 }
0x10e6   :  { %v4279_v36 = vpop.f32.mrf.mxu0  ;;  %v4430_v40 = vadd.f32 %v4429_v31, %v4428_v60  ;;  %v5878_v31 = vld [vmem:[%s7647_s8 + $0x18] sm:$0xff]  }
0x10e7   :  { %v4415_v19 = vsel %vm244_vm6, %v4279_v36, 0.0  ;;  %5775 = vmatprep.subr.bf16.mxu1 %v5878_v31 }
0x10e8   :  { %v5767_v18 = vpop.f32.mrf.mxu1  ;;  %v4416_v29 = vadd.f32 %v4415_v19, %v4414_v9  ;;  %5776 = vmatpush3.bf16.msra.mxu1 %v5878_v31 }
0x10e9   :  { %v4424_v47 = vsel %vm244_vm6, %v5767_v18, 0.0 }
0x10ea   :  { %v4334_v56 = vpop.f32.mrf.mxu1  ;;  %v4425_v50 = vadd.f32 %v4424_v47, %v4423_v62 }
0x10eb   :  { %v4410_v30 = vsel %vm244_vm6, %v4334_v56, 0.0 }
0x10ec   :  { %v5768_v61 = vpop.f32.mrf.mxu1  ;;  %v4411_v53 = vadd.f32 %v4410_v30, %v4409_v43  ;;  %v5879_v30 = vld [vmem:[%s7647_s8 + $0x10] sm:$0xff]  }
0x10ed   :  { %v4431_v23 = vsel %vm244_vm6, %v5768_v61, 0.0  ;;  %5777 = vmatprep.subr.bf16.mxu1 %v5879_v30 }
0x10ee   :  { %v4337_v46 = vpop.f32.mrf.mxu1  ;;  %v4432_v12 = vadd.f32 %v4431_v23, %v4430_v40  ;;  %5778 = vmatpush3.bf16.msra.mxu1 %v5879_v30 }
0x10ef   :  { %v4417_v54 = vsel %vm244_vm6, %v4337_v46, 0.0 }
0x10f0   :  { %v5773_v38 = vpop.f32.mrf.mxu0  ;;  %v4418_v25 = vadd.f32 %v4417_v54, %v4416_v29 }
0x10f1   :  { %v4426_v14 = vsel %vm244_vm6, %v5773_v38, 0.0 }
0x10f2   :  { %v4427_v8 = vadd.f32 %v4426_v14, %v4425_v50  ;;  %v4392_v7 = vpop.f32.mrf.mxu0 }
0x10f3   :  { %v4412_v13 = vsel %vm244_vm6, %v4392_v7, 0.0 }
0x10f4   :  { %v4413_v3 = vadd.f32 %v4412_v13, %v4411_v53  ;;  %v5774_v39 = vpop.f32.mrf.mxu0  ;;  %v4442_v6 = vadd.f32 %v5121_v17, %v4427_v8 }
0x10f5   :  { %v4433_v37 = vsel %vm244_vm6, %v5774_v39, 0.0 }
0x10f6   :  { %v4440_v24 = vadd.f32 %v5121_v17, %v4413_v3  ;;  %v4434_v26 = vadd.f32 %v4433_v37, %v4432_v12  ;;  %v4395_v22 = vpop.f32.mrf.mxu0  ;;  %v7535_v2 = vadd.f32 %v4442_v6, %v6884_v11  ;;  %v5123_v37 = vld [vmem:[%s7642_s3 + $0xa] ss:$0 sm:$0xff] }
0x10f7   :  { %v4419_v10 = vsel %vm244_vm6, %v4395_v22, 0.0 }
0x10f8   :  { %v7532_v57 = vadd.f32 %v4440_v24, %v6879_v5  ;;  %v4420_v58 = vadd.f32 %v4419_v10, %v4418_v25  ;;  %v4443_v44 = vadd.f32 %v5121_v17, %v4434_v26  ;;  %v4456_v5 = vsel %vm244_vm6, %v7535_v2, 0.0 }
0x10fa   :  { %v4441_v51 = vadd.f32 %v5121_v17, %v4420_v58  ;;  %v4450_v28 = vsel %vm244_vm6, %v7532_v57, 0.0  ;;  %v7543_v63 = vadd.f32 %v4443_v44, %v6894_v34  ;;  %v5122_v17 = vld [vmem:[%s7642_s3 + $0x9] ss:$0 sm:$0xff] }
0x10fb   :  { %4451 = vadd.xlane.f32.xlu1 %v4450_v28 }
0x10fc   :  { %v7540_v0 = vadd.f32 %v4441_v51, %v6887_v48  ;;  %v4459_v11 = vsel %vm244_vm6, %v7543_v63, 0.0 }
0x10fe   :  { %v4453_v1 = vsel %vm244_vm6, %v7540_v0, 0.0 }
0x10ff   :  { %4457 = vadd.xlane.f32.xlu1 %v4456_v5  ;;  %4454 = vadd.xlane.f32.xlu0 %v4453_v1  ;;  %v5880_v1 = vld [vmem:[%s7648_s9 + $0x78] sm:$0xff]  }
0x1100   :  { %5783 = vmatprep.subr.bf16.mxu0 %v5880_v1 }
0x1101   :  { %5784 = vmatpush3.bf16.msra.mxu0 %v5880_v1 }
0x1103   :  { %4460 = vadd.xlane.f32.xlu0 %v4459_v11  ;;  %v5881_v11 = vld [vmem:[%s7648_s9 + $0x70] sm:$0xff]  }
0x1104   :  { %5785 = vmatprep.subr.bf16.mxu0 %v5881_v11 }
0x1105   :  { %5786 = vmatpush3.bf16.msra.mxu0 %v5881_v11 }
0x1184   :  { %v4452_v55 = vpop.xlane.xlu1 %4451 }
0x1185   :  { %v4462_v27 = vmul.f32 0.03125, %v4452_v55  ;;  %v5882_v55 = vld [vmem:[%s7648_s9 + $0x68] sm:$0xff]  }
0x1186   :  { %5787 = vmatprep.subr.bf16.mxu0 %v5882_v55 }
0x1187   :  { %v4466_v48 = vsub.f32 %v7532_v57, %v4462_v27  ;;  %5788 = vmatpush3.bf16.msra.mxu0 %v5882_v55  ;;  %v5883_v27 = vld [vmem:[%s7648_s9 + $0x60] sm:$0xff]  }
0x1188   :  { %v4458_v20 = vpop.xlane.xlu1 %4457  ;;  %v4455_v15 = vpop.xlane.xlu0 %4454  ;;  %5789 = vmatprep.subr.bf16.mxu0 %v5883_v27 }
0x1189   :  { %v4464_v34 = vmul.f32 0.03125, %v4458_v20  ;;  %v4463_v4 = vmul.f32 0.03125, %v4455_v15  ;;  %v4470_v42 = vmul.f32 %v4466_v48, %v4466_v48  ;;  %v5885_v20 = vld [vmem:[%s7648_s9 + $0x50] sm:$0xff]   ;;  %v5886_v15 = vld [vmem:[%s7648_s9 + $0x48] sm:$0xff]  }
0x118b   :  { %v4468_v59 = vsub.f32 %v7535_v2, %v4464_v34  ;;  %v4467_v18 = vsub.f32 %v7540_v0, %v4463_v4  ;;  %v4474_v32 = vsel %vm244_vm6, %v4470_v42, 0.0  ;;  %5790 = vmatpush3.bf16.msra.mxu0 %v5883_v27  ;;  %v5887_v34 = vld [vmem:[%s7648_s9 + $0x40] sm:$0xff]  }
0x118c   :  { %4475 = vadd.xlane.f32.xlu1 %v4474_v32  ;;  %v4461_v56 = vpop.xlane.xlu0 %4460  ;;  %v5128_v4 = vld [vmem:[%s7643_s4 + $0x1] ss:$0 sm:$0xff] }
0x118d   :  { %v4465_v52 = vmul.f32 0.03125, %v4461_v56  ;;  %v4472_v61 = vmul.f32 %v4468_v59, %v4468_v59  ;;  %v4471_v33 = vmul.f32 %v4467_v18, %v4467_v18 }
0x118f   :  { %v4469_v49 = vsub.f32 %v7543_v63, %v4465_v52  ;;  %v4480_v47 = vsel %vm244_vm6, %v4472_v61, 0.0  ;;  %v4477_v62 = vsel %vm244_vm6, %v4471_v33, 0.0 }
0x1190   :  { %4481 = vadd.xlane.f32.xlu1 %v4480_v47  ;;  %4478 = vadd.xlane.f32.xlu0 %v4477_v62 }
0x1191   :  { %v4473_v36 = vmul.f32 %v4469_v49, %v4469_v49 }
0x1193   :  { %v4483_v21 = vsel %vm244_vm6, %v4473_v36, 0.0 }
0x1194   :  { %4484 = vadd.xlane.f32.xlu0 %v4483_v21 }
0x1215   :  { %v4476_v43 = vpop.xlane.xlu1 %4475 }
0x1216   :  { %v4486_v50 = vmul.f32 0.03125, %v4476_v43 }
0x1218   :  { %v4490_v46 = vadd.f32 1e-05, %v4486_v50 }
0x1219   :  { %v4482_v38 = vpop.xlane.xlu1 %4481  ;;  %v4479_v60 = vpop.xlane.xlu0 %4478 }
0x121a   :  { %6114 = vrsqrt.f32 %v4490_v46  ;;  %v4488_v19 = vmul.f32 0.03125, %v4482_v38  ;;  %v4487_v23 = vmul.f32 0.03125, %v4479_v60 }
0x121c   :  { %v4492_v14 = vadd.f32 1e-05, %v4488_v19  ;;  %v4491_v40 = vadd.f32 1e-05, %v4487_v23 }
0x121d   :  { %v4485_v53 = vpop.xlane.xlu0 %4484 }
0x121e   :  { %6116 = vrsqrt.f32 %v4492_v14  ;;  %v4489_v8 = vmul.f32 0.03125, %v4485_v53 }
0x121f   :  { %6118 = vrsqrt.f32 %v4491_v40 }
0x1220   :  { %v4493_v7 = vadd.f32 1e-05, %v4489_v8 }
0x1222   :  { %6120 = vrsqrt.f32 %v4493_v7 }
0x1227   :  { %v6115_v9 = vpop.eup %6114 }
0x1228   :  { %v4498_v54 = vmul.f32 %v6115_v9, %v4466_v48  ;;  %v5884_v48 = vld [vmem:[%s7648_s9 + $0x58] sm:$0xff]  }
0x1229   :  { %5791 = vmatprep.subr.bf16.mxu0 %v5884_v48 }
0x122a   :  { %v4506_v39 = vmul.f32 %v5122_v17, %v4498_v54  ;;  %5792 = vmatpush3.bf16.msra.mxu0 %v5884_v48 }
0x122b   :  { %v6117_v13 = vpop.eup %6116  ;;  %5793 = vmatprep.subr.bf16.mxu0 %v5885_v20 }
0x122c   :  { %v6119_v29 = vpop.eup %6118  ;;  %v4500_v12 = vmul.f32 %v6117_v13, %v4468_v59  ;;  %v4514_v22 = vadd.f32 %v5123_v37, %v4506_v39 }
0x122d   :  { %v4499_v3 = vmul.f32 %v6119_v29, %v4467_v18 }
0x122e   :  { %v4508_v26 = vmul.f32 %v5122_v17, %v4500_v12  ;;  %5794 = vmatpush3.bf16.msra.mxu0 %v5885_v20 }
0x122f   :  { %v6121_v25 = vpop.eup %6120  ;;  %v4507_v6 = vmul.f32 %v5122_v17, %v4499_v3  ;;  %5795 = vmatprep.subr.bf16.mxu0 %v5886_v15 }
0x1230   :  { %v4501_v24 = vmul.f32 %v6121_v25, %v4469_v49  ;;  %v4516_v51 = vadd.f32 %v5123_v37, %v4508_v26 }
0x1231   :  { %v4515_v10 = vadd.f32 %v5123_v37, %v4507_v6 }
0x1232   :  { %v4509_v58 = vmul.f32 %v5122_v17, %v4501_v24  ;;  %5796 = vmatpush3.bf16.msra.mxu0 %v5886_v15 }
0x1233   :  { %v4518_v44 = vpack.c.bf16 %v4515_v10, %v4514_v22  ;;  %5797 = vmatprep.subr.bf16.mxu0 %v5887_v34 }
0x1234   :  { %v4517_v28 = vadd.f32 %v5123_v37, %v4509_v58 }
0x1235   :  { %5779 = vmatprep.mubr.msk.bf16.mxu1 %vm244_vm6, %v4518_v44 }
0x1236   :  { %v4519_v5 = vpack.c.bf16 %v4517_v28, %v4516_v51  ;;  %5798 = vmatpush3.bf16.msra.mxu0 %v5887_v34 }
0x1238   :  { %5780 = vmatmul.mubr.msk.bf16.vlgmr.msra.gmra.mxu1 %vm244_vm6, %v4519_v5  ;;  %v5149_v5 = vld [vmem:[%s7642_s3 + $0xb] ss:$0 sm:$0xff] }
0x12f8   :  { %v5781_v42 = vpop.f32.mrf.mxu1 }
0x12f9   :  { %v4591_v59 = vadd.f32 %v5781_v42, %v5128_v4 }
0x12fa   :  { %v4582_v18 = vpop.f32.mrf.mxu1 }
0x12fb   :  { %v4599_v32 = vmul.f32 %v4591_v59, %v4591_v59  ;;  %v4583_v56 = vadd.f32 %v5128_v4, %v4582_v18 }
0x12fc   :  { %v5782_v52 = vpop.f32.mrf.mxu1 }
0x12fd   :  { %v4603_v61 = vmul.f32 %v4599_v32, %v4591_v59  ;;  %v4597_v33 = vmul.f32 %v4583_v56, %v4583_v56  ;;  %v4594_v49 = vadd.f32 %v5782_v52, %v5128_v4 }
0x12fe   :  { %v4585_v47 = vpop.f32.mrf.mxu1 }
0x12ff   :  { %v4607_v62 = vmul.f32 0.044715, %v4603_v61  ;;  %v4601_v36 = vmul.f32 %v4597_v33, %v4583_v56  ;;  %v4600_v21 = vmul.f32 %v4594_v49, %v4594_v49  ;;  %v4586_v31 = vadd.f32 %v5128_v4, %v4585_v47 }
0x1301   :  { %v4611_v30 = vadd.f32 %v4607_v62, %v4591_v59  ;;  %v4605_v43 = vmul.f32 0.044715, %v4601_v36  ;;  %v4604_v50 = vmul.f32 %v4600_v21, %v4594_v49  ;;  %v4598_v46 = vmul.f32 %v4586_v31, %v4586_v31 }
0x1303   :  { %v4615_v38 = vmul.f32 0.7978846, %v4611_v30  ;;  %v4609_v60 = vadd.f32 %v4605_v43, %v4583_v56  ;;  %v4608_v19 = vmul.f32 0.044715, %v4604_v50  ;;  %v4602_v23 = vmul.f32 %v4598_v46, %v4586_v31 }
0x1305   :  { %v4613_v14 = vmul.f32 0.7978846, %v4609_v60  ;;  %v4612_v40 = vadd.f32 %v4608_v19, %v4594_v49  ;;  %v4606_v53 = vmul.f32 0.044715, %v4602_v23  ;;  %6122 = vtanh.f32 %v4615_v38 }
0x1307   :  { %6124 = vtanh.f32 %v4613_v14  ;;  %v4616_v8 = vmul.f32 0.7978846, %v4612_v40  ;;  %v4610_v7 = vadd.f32 %v4606_v53, %v4586_v31 }
0x1309   :  { %6126 = vtanh.f32 %v4616_v8  ;;  %v4614_v9 = vmul.f32 0.7978846, %v4610_v7 }
0x130b   :  { %6128 = vtanh.f32 %v4614_v9  ;;  %v5888_v9 = vld [vmem:[%s7649_s10 + $0x8] sm:$0xff]  }
0x130c   :  { %5803 = vmatprep.subr.bf16.mxu1 %v5888_v9 }
0x130d   :  { %5804 = vmatpush3.bf16.msra.mxu1 %v5888_v9 }
0x1312   :  { %v6123_v54 = vpop.eup %6122 }
0x1313   :  { %v4623_v12 = vadd.f32 1.0, %v6123_v54  ;;  %v5889_v54 = vld [vmem:[%s7649_s10] sm:$0xff]  }
0x1314   :  { %v6125_v17 = vpop.eup %6124  ;;  %5805 = vmatprep.subr.bf16.mxu1 %v5889_v54 }
0x1315   :  { %v4621_v13 = vadd.f32 1.0, %v6125_v17  ;;  %v4627_v24 = vmul.f32 0.5, %v4623_v12  ;;  %5806 = vmatpush3.bf16.msra.mxu1 %v5889_v54 }
0x1316   :  { %v6127_v29 = vpop.eup %6126 }
0x1317   :  { %v4624_v3 = vadd.f32 1.0, %v6127_v29  ;;  %v4625_v6 = vmul.f32 0.5, %v4621_v13  ;;  %v4631_v44 = vmul.f32 %v4627_v24, %v4591_v59 }
0x1318   :  { %v6129_v39 = vpop.eup %6128 }
0x1319   :  { %v4628_v37 = vmul.f32 0.5, %v4624_v3  ;;  %v4622_v25 = vadd.f32 1.0, %v6129_v39  ;;  %v4629_v10 = vmul.f32 %v4625_v6, %v4583_v56 }
0x131b   :  { %v4626_v26 = vmul.f32 0.5, %v4622_v25  ;;  %v4632_v22 = vmul.f32 %v4628_v37, %v4594_v49 }
0x131d   :  { %v4630_v58 = vmul.f32 %v4626_v26, %v4586_v31  ;;  %v4634_v28 = vpack.c.bf16 %v4632_v22, %v4631_v44  ;;  %v5158_v44 = vld [vmem:[%s7642_s3 + $0xc] ss:$0 sm:$0xff] }
0x131f   :  { %v4633_v51 = vpack.c.bf16 %v4630_v58, %v4629_v10 }
0x1321   :  { %5799 = vmatprep.mubr.bf16.mxu0 %v4633_v51 }
0x1322   :  { %5800 = vmatmul.mubr.bf16.vlgmr.msra.gmra.mxu0 %v4634_v28 }
0x13e2   :  { %v5801_v1 = vpop.f32.mrf.mxu0 }
0x13e3   :  { %v4748_v11 = vadd.f32 %v5801_v1, %v5149_v5 }
0x13e4   :  { %v4739_v55 = vpop.f32.mrf.mxu0 }
0x13e5   :  { %v4756_v27 = vadd.f32 %v4748_v11, %v6954_v35  ;;  %v4740_v48 = vadd.f32 %v5149_v5, %v4739_v55  ;;  %v5159_v55 = vld [vmem:[%s7642_s3 + $0xd] ss:$0 sm:$0xff]  ;;  %s6164_s3 = smov [#allocation2]  }
0x13e6   :  { %v5802_v20 = vpop.f32.mrf.mxu0  ;;  %s4923_s22 = sshll.u32 %s6164_s3, 4  ;;  %s4924_s22 = int_to_ptr.vmem [resolvable:$true] %s4923_s22 }
0x13e7   :  { %v4754_v15 = vadd.f32 %v4740_v48, %v6951_v45  ;;  %v4751_v34 = vadd.f32 %v5802_v20, %v5149_v5  ;;  %v4760_v32 = vadd.f32 %v4756_v27, %v7535_v2  ;;  %s6138_s23 = scalar_lea.vmem %s4924_s22, 512  ;;  %p6143_p1 = scmp.lt.s32.totalorder %s4924_s22, %s4924_s22 }
0x13e8   :  { %v4742_v4 = vpop.f32.mrf.mxu0  ;;  %p6139_p0 = scmp.ne.s32.totalorder %s4924_s22, %s6138_s23  ;;  %p6144_p2 = scmp.lt.s32.totalorder %s6138_s23, %s6138_s23 }
0x13e9   :  { %v4757_v42 = vadd.f32 %v4751_v34, %v6962_v16  ;;  %v4743_v59 = vadd.f32 %v5149_v5, %v4742_v4  ;;  %v4758_v18 = vadd.f32 %v4754_v15, %v7532_v57  ;;  %v4764_v33 = vmul.f32 0.5, %v4760_v32 }
0x13ea   :  { %p6145_p3 = por %p6144_p2, %p6143_p1 }
0x13eb   :  { %v4755_v56 = vadd.f32 %v4743_v59, %v6959_v41  ;;  %v4762_v52 = vmul.f32 0.5, %v4758_v18  ;;  %v4761_v49 = vadd.f32 %v4757_v42, %v7543_v63  ;;  %v4774_v16 = vsel %vm244_vm6, %v4764_v33, 0.0 }
0x13ec   :  { %p6146_p4 = pnand %p6145_p3, %p6139_p0 }
0x13ed   :  { %v4768_v61 = vsel %vm244_vm6, %v4762_v52, 0.0  ;;  %v4759_v35 = vadd.f32 %v4755_v56, %v7540_v0  ;;  %v4765_v62 = vmul.f32 0.5, %v4761_v49 }
0x13ee   :  { %4769 = vadd.xlane.f32.xlu1 %v4768_v61 }
0x13ef   :  { %v4763_v45 = vmul.f32 0.5, %v4759_v35  ;;  %v4777_v57 = vsel %vm244_vm6, %v4765_v62, 0.0 }
0x13f1   :  { %v4771_v47 = vsel %vm244_vm6, %v4763_v45, 0.0 }
0x13f2   :  { %4772 = vadd.xlane.f32.xlu0 %v4771_v47  ;;  %4775 = vadd.xlane.f32.xlu1 %v4774_v16 }
0x13f6   :  { %4778 = vadd.xlane.f32.xlu0 %v4777_v57 }
0x1477   :  { %v4770_v41 = vpop.xlane.xlu1 %4769 }
0x1478   :  { %v4780_v2 = vmul.f32 0.03125, %v4770_v41 }
0x147a   :  { %v4784_v36 = vsub.f32 %v4762_v52, %v4780_v2  ;;  %v5160_v52 = vld [vmem:[%s7643_s4 + $0x2] ss:$0 sm:$0xff] }
0x147b   :  { %v4773_v21 = vpop.xlane.xlu0 %4772  ;;  %v4776_v0 = vpop.xlane.xlu1 %4775 }
0x147c   :  { %v4781_v31 = vmul.f32 0.03125, %v4773_v21  ;;  %v4782_v30 = vmul.f32 0.03125, %v4776_v0  ;;  %v4788_v63 = vmul.f32 %v4784_v36, %v4784_v36 }
0x147e   :  { %v4785_v43 = vsub.f32 %v4763_v45, %v4781_v31  ;;  %v4786_v50 = vsub.f32 %v4764_v33, %v4782_v30  ;;  %v4792_v46 = vsel %vm244_vm6, %v4788_v63, 0.0 }
0x147f   :  { %v4779_v38 = vpop.xlane.xlu0 %4778  ;;  %4793 = vadd.xlane.f32.xlu1 %v4792_v46 }
0x1480   :  { %v4783_v60 = vmul.f32 0.03125, %v4779_v38  ;;  %v4789_v19 = vmul.f32 %v4785_v43, %v4785_v43  ;;  %v4790_v23 = vmul.f32 %v4786_v50, %v4786_v50 }
0x1482   :  { %v4787_v14 = vsub.f32 %v4765_v62, %v4783_v60  ;;  %v4795_v40 = vsel %vm244_vm6, %v4789_v19, 0.0  ;;  %v4798_v53 = vsel %vm244_vm6, %v4790_v23, 0.0 }
0x1483   :  { %4796 = vadd.xlane.f32.xlu0 %v4795_v40  ;;  %4799 = vadd.xlane.f32.xlu1 %v4798_v53 }
0x1484   :  { %v4791_v8 = vmul.f32 %v4787_v14, %v4787_v14 }
0x1486   :  { %v4801_v7 = vsel %vm244_vm6, %v4791_v8, 0.0 }
0x1487   :  { %4802 = vadd.xlane.f32.xlu0 %v4801_v7 }
0x1508   :  { %v4794_v17 = vpop.xlane.xlu1 %4793 }
0x1509   :  { %v4804_v13 = vmul.f32 0.03125, %v4794_v17 }
0x150b   :  { %v4808_v29 = vadd.f32 1e-05, %v4804_v13 }
0x150c   :  { %v4797_v12 = vpop.xlane.xlu0 %4796  ;;  %v4800_v3 = vpop.xlane.xlu1 %4799 }
0x150d   :  { %6130 = vrsqrt.f32 %v4808_v29  ;;  %v4805_v39 = vmul.f32 0.03125, %v4797_v12  ;;  %v4806_v37 = vmul.f32 0.03125, %v4800_v3 }
0x150f   :  { %v4809_v25 = vadd.f32 1e-05, %v4805_v39  ;;  %v4810_v6 = vadd.f32 1e-05, %v4806_v37 }
0x1510   :  { %v4803_v24 = vpop.xlane.xlu0 %4802 }
0x1511   :  { %6132 = vrsqrt.f32 %v4809_v25  ;;  %v4807_v26 = vmul.f32 0.03125, %v4803_v24 }
0x1512   :  { %6134 = vrsqrt.f32 %v4810_v6 }
0x1513   :  { %v4811_v22 = vadd.f32 1e-05, %v4807_v26 }
0x1515   :  { %6136 = vrsqrt.f32 %v4811_v22 }
0x151a   :  { %v6131_v10 = vpop.eup %6130 }
0x151b   :  { %v4816_v58 = vmul.f32 %v6131_v10, %v4784_v36 }
0x151d   :  { %v4824_v1 = vmul.f32 %v5158_v44, %v4816_v58 }
0x151e   :  { %v6133_v51 = vpop.eup %6132 }
0x151f   :  { %v6135_v28 = vpop.eup %6134  ;;  %v4817_v5 = vmul.f32 %v6133_v51, %v4785_v43  ;;  %v4832_v34 = vadd.f32 %v5159_v55, %v4824_v1 }
0x1520   :  { %v4818_v11 = vmul.f32 %v6135_v28, %v4786_v50 }
0x1521   :  { %v4825_v27 = vmul.f32 %v5158_v44, %v4817_v5 }
0x1522   :  { %v6137_v48 = vpop.eup %6136  ;;  %v4826_v15 = vmul.f32 %v5158_v44, %v4818_v11 }
0x1523   :  { %v4819_v20 = vmul.f32 %v6137_v48, %v4787_v14  ;;  %v4833_v4 = vadd.f32 %v5159_v55, %v4825_v27 }
0x1524   :  { %v4834_v18 = vadd.f32 %v5159_v55, %v4826_v15 }
0x1525   :  { %v4827_v42 = vmul.f32 %v5158_v44, %v4819_v20  ;;  %v4836_v59 = vpack.c.bf16 %v4833_v4, %v4832_v34 }
0x1527   :  { %v4835_v32 = vadd.f32 %v5159_v55, %v4827_v42  ;;  %5807 = vmatprep.mubr.msk.bf16.mxu1 %vm244_vm6, %v4836_v59 }
0x1529   :  { %v4837_v56 = vpack.c.bf16 %v4835_v32, %v4834_v18 }
0x152b   :  { %5808 = vmatmul.mubr.msk.bf16.vlgmr.msra.gmra.mxu1 %vm244_vm6, %v4837_v56 }
0x15eb   :  { %v5809_v61 = vpop.f32.mrf.mxu1 }
0x15ec   :  { %v4908_v35 = vadd.f32 %v5809_v61, %v5160_v52 }
0x15ed   :  { %v4899_v33 = vpop.f32.mrf.mxu1 }
0x15ee   :  { %4916 = vst [vmem:[#allocation2 + $0x10] sm:$0xff] %v4908_v35  ;;  %v4900_v49 = vadd.f32 %v5160_v52, %v4899_v33 }
0x15ef   :  { %v5810_v45 = vpop.f32.mrf.mxu1 }
0x15f0   :  { %4914 = vst [vmem:[#allocation2] sm:$0xff] %v4900_v49  ;;  %v4911_v47 = vadd.f32 %v5810_v45, %v5160_v52 }
0x15f1   :  { %v4902_v16 = vpop.f32.mrf.mxu1 }
0x15f2   :  { %4917 = vst [vmem:[#allocation2 + $0x18] sm:$0xff] %v4911_v47  ;;  %v4903_v62 = vadd.f32 %v5160_v52, %v4902_v16 }
0x15f4   :  { %4915 = vst [vmem:[#allocation2 + $0x8] sm:$0xff] %v4903_v62 }
0x15f5   :  { %6149 = shalt.err (!%p6146_p4)
}
0x15f6   :  { %s6165_s4 = smov 128   ;;  %s6166_s5 = smov 8  }
0x15f7   :  { %4929 = dma.vmem_to_hbm [thread:$0]  %s4924_s22, 512, %s7650_s11, [#allocation3], %s6165_s4, %s6165_s4, %s6166_s5  }
0x15f8   :  { %6158 = dma.done.wait [#allocation3], 512  }
0x15f9   :  { %6159 = vsyncadd [#allocation3], 4294966784 }
0x15fa   :  { %4933 = vsyncpa [#allocation3], 1 }

</bundles_post_ra>
